<compile_context>
chip_gen: v6e
topology: v6e:2x2x1
jax: 0.10.0
libtpu: 0.0.40
codegen_flags: <defaults>
</compile_context>

<pallas_src>
import functools

import jax
import jax.numpy as jnp
from jax.experimental import pallas as pl
from jax.experimental.pallas import tpu as pltpu


def _round_up(x, m):
    return (x + m - 1) // m * m


def _pick_oh_tile(oh, ow, max_positions):
    """Largest t dividing oh with (t*ow) % 8 == 0 (or t == oh) fitting the budget."""
    best = None
    for t in range(1, oh + 1):
        if oh % t:
            continue
        if (t * ow) % 8 != 0 and t != oh:
            continue
        if t * ow <= max_positions:
            best = t
    if best is None:
        # Nothing fits the budget: take the smallest legal row tile instead.
        for t in range(1, oh + 1):
            if oh % t == 0 and ((t * ow) % 8 == 0 or t == oh):
                best = t
                break
    return best


def _pick_pos_tile(p, max_positions):
    """Largest multiple-of-8 divisor of p within the budget (p itself if it fits)."""
    if p <= max_positions:
        return p
    best = None
    t = 8
    while t <= max_positions:
        if p % t == 0:
            best = t
        t += 8
    # TODO(synk): pathological p with no multiple-of-8 divisor under the budget
    # falls back to the full extent.
    return best if best is not None else p


def _vmem_limit(est_bytes):
    # Generous (2x) margin over the block-size estimate, floor at 32 MiB
    # (covers v5e's 16 MiB default), capped below physical VMEM ceilings.
    return int(min(max(2 * est_bytes, 32 << 20), 100 << 20))


# ----------------------------------------------------------------------------
# Kernel 1: spatially-tiled fused-im2col conv (bf16 MXU, f32 acc) + stats
# ----------------------------------------------------------------------------
def _conv_stats_kernel(x_ref, w_ref, y_ref, s1_ref, s2_ref, *scratch,
                       kh, kw, stride, dilation, ow, t_oh, cin_p,
                       packed, w_resident):
    # x_ref : [1, Hp, Wp, Cin_p]            zero-padded image (bf16), resident
    # w_ref : [n_ct, KKC, tn] (resident) or [1, KKC, tn]   packed weights (bf16)
    # y_ref : [1, t_oh*ow, tn]              conv output tile (bf16)
    # s1/s2 : [1, 1, tn]                    spatial sum / sum-of-squares (f32,
    #                                       accumulated across the spatial axis)
    j = pl.program_id(1)
    s = pl.program_id(2)
    kk = kh * kw
    t_p = t_oh * ow

    w_tile = w_ref[j] if w_resident else w_ref[0]        # [KKC, tn]
    base = s * (t_oh * stride)                            # first input row

    def tap_slice(t):
        di = (t // kw) * dilation
        dj = (t % kw) * dilation
        if stride == 1:
            xt = x_ref[0, pl.ds(base + di, t_oh), pl.ds(dj, ow), :]
        else:
            # TODO(synk): strided sublane reads; see module-level note.
            xt = x_ref[0, pl.ds(base + di, t_oh, stride),
                       pl.ds(dj, ow, stride), :]
        return xt.reshape(t_p, cin_p)

    if packed:
        # Assemble the [t_p, kk*cin_p] patch in VMEM (never in HBM) and do a
        # single MXU dot with K = kk*cin_p.
        patch_ref, = scratch
        for t in range(kk):                               # static unroll
            patch_ref[:, t * cin_p:(t + 1) * cin_p] = tap_slice(t)
        acc = jnp.dot(patch_ref[...], w_tile,
                      preferred_element_type=jnp.float32)
    else:
        acc = jnp.zeros((t_p, w_tile.shape[-1]), jnp.float32)
        for t in range(kk):                               # static unroll
            acc = acc + jnp.dot(tap_slice(t),
                                w_tile[t * cin_p:(t + 1) * cin_p, :],
                                preferred_element_type=jnp.float32)

    # bf16 writeback halves the HBM traffic; stats come from the f32 acc.
    y_ref[0] = acc.astype(y_ref.dtype)

    @pl.when(s == 0)
    def _():
        s1_ref[...] = jnp.zeros_like(s1_ref)
        s2_ref[...] = jnp.zeros_like(s2_ref)

    s1_ref[...] += jnp.sum(acc, axis=0, keepdims=True)[None]
    s2_ref[...] += jnp.sum(acc * acc, axis=0, keepdims=True)[None]


def _conv_with_stats(x_pad, w_packed, *, kh, kw, stride, dilation, oh, ow,
                     t_oh, packed, w_resident):
    n, hp, wp, cin_p = x_pad.shape
    n_ct, kkc, tn = w_packed.shape
    cp = n_ct * tn
    t_p = t_oh * ow
    p = oh * ow

    kernel = functools.partial(
        _conv_stats_kernel, kh=kh, kw=kw, stride=stride, dilation=dilation,
        ow=ow, t_oh=t_oh, cin_p=cin_p, packed=packed, w_resident=w_resident)

    if w_resident:
        w_spec = pl.BlockSpec((n_ct, kkc, tn), lambda i, j, s: (0, 0, 0))
        w_block_elems = n_ct * kkc * tn
    else:
        w_spec = pl.BlockSpec((1, kkc, tn), lambda i, j, s: (j, 0, 0))
        w_block_elems = kkc * tn

    scratch = [pltpu.VMEM((t_p, kkc), jnp.bfloat16)] if packed else []

    est = (2 * hp * wp * cin_p * 2            # double-buffered input image
           + 2 * w_block_elems * 2            # weight block(s)
           + 2 * t_p * tn * 2                 # double-buffered bf16 out tile
           + t_p * tn * 4                     # f32 accumulator
           + (t_p * kkc * 2 if packed else 0) # patch scratch
           + 8 * tn * 4 + (1 << 20))          # stats blocks + working margin

    return pl.pallas_call(
        kernel,
        out_shape=(jax.ShapeDtypeStruct((n, p, cp), jnp.bfloat16),
                   jax.ShapeDtypeStruct((n, 1, cp), jnp.float32),
                   jax.ShapeDtypeStruct((n, 1, cp), jnp.float32)),
        grid=(n, cp // tn, oh // t_oh),
        in_specs=[
            pl.BlockSpec((1, hp, wp, cin_p), lambda i, j, s: (i, 0, 0, 0)),
            w_spec,
        ],
        out_specs=(
            pl.BlockSpec((1, t_p, tn), lambda i, j, s: (i, s, j)),
            pl.BlockSpec((1, 1, tn), lambda i, j, s: (i, 0, j)),
            pl.BlockSpec((1, 1, tn), lambda i, j, s: (i, 0, j)),
        ),
        scratch_shapes=tuple(scratch),
        compiler_params=pltpu.CompilerParams(
            dimension_semantics=("parallel", "parallel", "arbitrary"),
            vmem_limit_bytes=_vmem_limit(est)),
    )(x_pad, w_packed)


# ----------------------------------------------------------------------------
# Kernel 2: fused normalize (pre-blended per-(n,c) scale/shift) + ReLU
# ----------------------------------------------------------------------------
def _norm_relu_kernel(y_ref, scale_ref, shift_ref, o_ref, *, activate):
    y = y_ref[...].astype(jnp.float32) * scale_ref[...] + shift_ref[...]
    if activate:
        y = jnp.maximum(y, 0.0)
    o_ref[...] = y


def _apply_norm_relu(y, scale, shift, *, activate):
    n, p, cp = y.shape
    # ~2 MiB block budget (v7x-safe): bf16 read + f32 write per position.
    max_pos = max(8, ((2 << 20) // (cp * 6)) // 8 * 8)
    tp = _pick_pos_tile(p, max_pos)
    est = 2 * tp * cp * 2 + 2 * tp * cp * 4 + 8 * cp * 4 + (1 << 20)
    kernel = functools.partial(_norm_relu_kernel, activate=activate)
    return pl.pallas_call(
        kernel,
        out_shape=jax.ShapeDtypeStruct((n, p, cp), jnp.float32),
        grid=(n, p // tp),
        in_specs=[
            pl.BlockSpec((1, tp, cp), lambda i, j: (i, j, 0)),
            pl.BlockSpec((1, 1, cp), lambda i, j: (i, 0, 0)),
            pl.BlockSpec((1, 1, cp), lambda i, j: (i, 0, 0)),
        ],
        out_specs=pl.BlockSpec((1, tp, cp), lambda i, j: (i, j, 0)),
        compiler_params=pltpu.CompilerParams(
            dimension_semantics=("parallel", "parallel"),
            vmem_limit_bytes=_vmem_limit(est)),
    )(y, scale, shift)


# ----------------------------------------------------------------------------
# Wrapper (layout plumbing + tiny [N, C]-sized stats/param blending)
# ----------------------------------------------------------------------------
def _pad_1d(v, n):
    v = jnp.asarray(v, jnp.float32)
    return jnp.pad(v, (0, n - v.shape[0]))


def ibn_net_conv(x_nchw, weight, in_w, in_b, bn_w, bn_b, *, stride, padding,
                 dilation=1, norm_type="ibn", activate=True, eps=1e-5):
    """Forward pass of IBNNetConv (groups=1, bias=False), train-mode norms."""
    assert norm_type in ("bn", "ibn")
    n, cin, h, w = x_nchw.shape
    cout, _, kh, kw = weight.shape
    oh = (h + 2 * padding - dilation * (kh - 1) - 1) // stride + 1
    ow = (w + 2 * padding - dilation * (kw - 1) - 1) // stride + 1
    p = oh * ow
    cp = _round_up(cout, 128)            # lane-dense out-channel padding
    cin_p = _round_up(cin, 8)            # sublane-aligned in-channel padding
    kk = kh * kw
    kkc = kk * cin_p
    tn = 256 if cp % 256 == 0 else 128   # 256-wide MXU tile on v6e/v7x shapes
    n_ct = cp // tn

    # --- conv inputs: NHWC, zero-padded spatially + channel-wise, bf16 ------
    x_nhwc = jnp.transpose(x_nchw, (0, 2, 3, 1)).astype(jnp.float32)
    x_pad = jnp.pad(x_nhwc, ((0, 0), (padding, padding), (padding, padding),
                             (0, cin_p - cin))).astype(jnp.bfloat16)

    # weights: [Cout, Cin, KH, KW] -> [n_ct, KH*KW*Cin_p, tn] (zero-padded)
    w_t = jnp.transpose(weight.astype(jnp.float32), (2, 3, 1, 0))
    w_t = jnp.pad(w_t, ((0, 0), (0, 0), (0, cin_p - cin), (0, cp - cout)))
    w_packed = jnp.transpose(w_t.reshape(kkc, n_ct, tn), (1, 0, 2))
    w_packed = w_packed.astype(jnp.bfloat16)

    packed = (kk > 1) and (cin_p < 128) and (kkc <= 512)
    w_resident = (n_ct * kkc * tn * 2) <= (8 << 20)

    # spatial row tile: ~4 MiB of {acc + double-buffered out + patch} per step
    max_pos_conv = max(8, (4 << 20) // (tn * 8 + (kkc * 2 if packed else 0)))
    t_oh = _pick_oh_tile(oh, ow, max_pos_conv)

    y, s1, s2 = _conv_with_stats(
        x_pad, w_packed, kh=kh, kw=kw, stride=stride, dilation=dilation,
        oh=oh, ow=ow, t_oh=t_oh, packed=packed, w_resident=w_resident)

    # --- blend IN/BN statistics + affine into per-(n, c) scale/shift --------
    # (tiny [N, Cp] math; all per-element work stays inside the Pallas kernels)
    s1 = s1[:, 0, :]                       # [N, Cp] spatial sums
    s2 = s2[:, 0, :]                       # [N, Cp] spatial sums of squares
    half = cout // 2 if norm_type == "ibn" else 0

    if norm_type == "ibn":
        g_in = _pad_1d(in_w, cp)
        b_in = _pad_1d(in_b, cp)
        g_bn = _pad_1d(jnp.concatenate([jnp.zeros((half,), jnp.float32),
                                        jnp.asarray(bn_w, jnp.float32)]), cp)
        b_bn = _pad_1d(jnp.concatenate([jnp.zeros((half,), jnp.float32),
                                        jnp.asarray(bn_b, jnp.float32)]), cp)
    else:
        g_in = jnp.zeros((cp,), jnp.float32)
        b_in = jnp.zeros((cp,), jnp.float32)
        g_bn = _pad_1d(bn_w, cp)
        b_bn = _pad_1d(bn_b, cp)

    mean_in = s1 / p                                            # [N, Cp]
    var_in = jnp.maximum(s2 / p - mean_in * mean_in, 0.0)       # biased
    mean_bn = jnp.sum(s1, axis=0) / (n * p)                     # [Cp]
    var_bn = jnp.maximum(jnp.sum(s2, axis=0) / (n * p) - mean_bn * mean_bn, 0.0)

    sc_in = g_in * jax.lax.rsqrt(var_in + eps)                  # [N, Cp]
    sh_in = b_in - mean_in * sc_in
    sc_bn = g_bn * jax.lax.rsqrt(var_bn + eps)                  # [Cp]
    sh_bn = b_bn - mean_bn * sc_bn

    use_in = (jnp.arange(cp) < half)[None, :]                   # [1, Cp]
    scale = jnp.where(use_in, sc_in, sc_bn[None, :])[:, None, :]  # [N, 1, Cp]
    shift = jnp.where(use_in, sh_in, sh_bn[None, :])[:, None, :]

    # --- fused scale/shift + ReLU apply pass (lane-dense, bf16 read) --------
    out = _apply_norm_relu(y, scale, shift, activate=activate)

    # XLA fuses the channel un-pad slice into the NHWC -> NCHW copy below.
    out = out[:, :, :cout].reshape(n, oh, ow, cout)
    return jnp.transpose(out, (0, 3, 1, 2))


# ----------------------------------------------------------------------------
# Pure-JAX reference (NCHW, PyTorch train-mode norm semantics) for validation
# ----------------------------------------------------------------------------
def reference_forward(x, w, in_w, in_b, bn_w, bn_b, *, stride, padding,
                      dilation, norm_type, activate, eps=1e-5):
    y = jax.lax.conv_general_dilated(
        x.astype(jnp.float32), w.astype(jnp.float32),
        window_strides=(stride, stride),
        padding=[(padding, padding), (padding, padding)],
        rhs_dilation=(dilation, dilation),
        dimension_numbers=("NCHW", "OIHW", "NCHW"))
    if norm_type == "ibn":
        half = y.shape[1] // 2
        x1, x2 = y[:, :half], y[:, half:]
        m1 = x1.mean(axis=(2, 3), keepdims=True)
        v1 = ((x1 - m1) ** 2).mean(axis=(2, 3), keepdims=True)
        x1 = (x1 - m1) / jnp.sqrt(v1 + eps) * in_w[None, :, None, None] \
             + in_b[None, :, None, None]
        m2 = x2.mean(axis=(0, 2, 3), keepdims=True)
        v2 = ((x2 - m2) ** 2).mean(axis=(0, 2, 3), keepdims=True)
        x2 = (x2 - m2) / jnp.sqrt(v2 + eps) * bn_w[None, :, None, None] \
             + bn_b[None, :, None, None]
        y = jnp.concatenate([x1, x2], axis=1)
    else:
        m = y.mean(axis=(0, 2, 3), keepdims=True)
        v = ((y - m) ** 2).mean(axis=(0, 2, 3), keepdims=True)
        y = (y - m) / jnp.sqrt(v + eps) * bn_w[None, :, None, None] \
            + bn_b[None, :, None, None]
    if activate:
        y = jnp.maximum(y, 0.0)
    return y


def _check_case(key, *, N, Cin, H, W, Cout, KH, KW, stride, padding, dilation,
                norm_type, activate):
    k_x, k_w, k1, k2, k3, k4 = jax.random.split(key, 6)
    half = Cout // 2 if norm_type == "ibn" else 0
    nbn = Cout - half

    x = jax.random.normal(k_x, (N, Cin, H, W), jnp.float32)
    weight = jax.random.normal(k_w, (Cout, Cin, KH, KW), jnp.float32) * 0.1
    in_w = 1.0 + 0.1 * jax.random.normal(k1, (half,), jnp.float32)
    in_b = 0.1 * jax.random.normal(k2, (half,), jnp.float32)
    bn_w = 1.0 + 0.1 * jax.random.normal(k3, (nbn,), jnp.float32)
    bn_b = 0.1 * jax.random.normal(k4, (nbn,), jnp.float32)

    fwd = jax.jit(functools.partial(
        ibn_net_conv, stride=stride, padding=padding, dilation=dilation,
        norm_type=norm_type, activate=activate))
    out = jax.block_until_ready(fwd(x, weight, in_w, in_b, bn_w, bn_b))

    OH = (H + 2 * padding - dilation * (KH - 1) - 1) // stride + 1
    OW = (W + 2 * padding - dilation * (KW - 1) - 1) // stride + 1
    assert out.shape == (N, Cout, OH, OW), out.shape

    # Reference 1: same bf16-rounded conv operands (isolates kernel math from
    # the intentional bf16 MXU / bf16-intermediate precision policy).
    ref_bf16 = reference_forward(
        x.astype(jnp.bfloat16).astype(jnp.float32),
        weight.astype(jnp.bfloat16).astype(jnp.float32),
        in_w, in_b, bn_w, bn_b, stride=stride, padding=padding,
        dilation=dilation, norm_type=norm_type, activate=activate)
    err_kernel = float(jnp.max(jnp.abs(out - ref_bf16)))
    assert err_kernel < 2e-2, f"kernel-math max abs err {err_kernel}"

    # Reference 2: pure f32 PyTorch semantics (bounds bf16 rounding overall).
    ref_f32 = reference_forward(
        x, weight, in_w, in_b, bn_w, bn_b, stride=stride, padding=padding,
        dilation=dilation, norm_type=norm_type, activate=activate)
    err_full = float(jnp.max(jnp.abs(out - ref_f32)))
    assert err_full < 5e-2, f"f32-reference max abs err {err_full}"


# ----------------------------------------------------------------------------
if __name__ == "__main__":
    key = jax.random.PRNGKey(0)
    k_a, k_b = jax.random.split(key)

    # Case 1: IBNNetConv(4, 8, 3, stride=1, padding=1, norm_type='ibn').
    # Exercises the packed small-Cin path, IBN blending and ReLU.
    _check_case(k_a, N=2, Cin=4, H=16, W=16, Cout=8, KH=3, KW=3,
                stride=1, padding=1, dilation=1, norm_type="ibn",
                activate=True)

    # Case 2: larger Cin exercises the per-tap fallback path + pure-BN branch.
    _check_case(k_b, N=2, Cin=64, H=8, W=8, Cout=16, KH=3, KW=3,
                stride=1, padding=1, dilation=1, norm_type="bn",
                activate=False)

    print("KERNEL_OK")
</pallas_src>

<mosaic_0001>
module attributes {stable_mosaic.version = 11 : i64} {
  func.func @_conv_stats_kernel(%arg0: i32, %arg1: i32, %arg2: i32, %arg3: memref<1x18x18x8xbf16, #tpu.memory_space<vmem>>, %arg4: memref<1x72x128xbf16, #tpu.memory_space<vmem>>, %arg5: memref<1x256x128xbf16, #tpu.memory_space<vmem>>, %arg6: memref<1x1x128xf32, #tpu.memory_space<vmem>>, %arg7: memref<1x1x128xf32, #tpu.memory_space<vmem>>, %arg8: memref<256x72xbf16, #tpu.memory_space<vmem>>) attributes {dimension_semantics = [#tpu.dimension_semantics<parallel>, #tpu.dimension_semantics<parallel>, #tpu.dimension_semantics<arbitrary>], iteration_bounds = array<i64: 2, 1, 1>, scalar_prefetch = 0 : i64, scratch_operands = 1 : i64, tpu.core_type = #tpu.core_type<tc>, window_params = [{transform_indices = @transform_0, window_bounds = array<i64: 1, 18, 18, 8>}, {pipeline_mode = #tpu.pipeline_mode<synchronous>, transform_indices = @transform_1, window_bounds = array<i64: 1, 72, 128>}, {transform_indices = @transform_2, window_bounds = array<i64: 1, 256, 128>}, {transform_indices = @transform_3, window_bounds = array<i64: 1, 1, 128>}, {transform_indices = @transform_4, window_bounds = array<i64: 1, 1, 128>}]} {
    %0 = arith.index_cast %arg1 : i32 to index
    %c0 = arith.constant 0 : index
    %c0_0 = arith.constant 0 : index
    %1 = vector.load %arg4[%0, %c0, %c0_0] : memref<1x72x128xbf16, #tpu.memory_space<vmem>>, vector<1x72x128xbf16>
    %2 = vector.shape_cast %1 : vector<1x72x128xbf16> to vector<72x128xbf16>
    %c16_i32 = arith.constant 16 : i32
    %3 = arith.muli %arg2, %c16_i32 : i32
    %c0_i32 = arith.constant 0 : i32
    %4 = arith.addi %3, %c0_i32 : i32
    %c0_1 = arith.constant 0 : index
    %5 = arith.index_cast %4 : i32 to index
    %c0_2 = arith.constant 0 : index
    %c0_3 = arith.constant 0 : index
    %6 = vector.load %arg3[%c0_1, %5, %c0_2, %c0_3] : memref<1x18x18x8xbf16, #tpu.memory_space<vmem>>, vector<1x16x16x8xbf16>
    %7 = vector.shape_cast %6 : vector<1x16x16x8xbf16> to vector<16x16x8xbf16>
    %8 = vector.shape_cast %7 : vector<16x16x8xbf16> to vector<256x8xbf16>
    %c0_4 = arith.constant 0 : index
    %c0_5 = arith.constant 0 : index
    %9 = vector.load %arg8[%c0_4, %c0_5] : memref<256x72xbf16, #tpu.memory_space<vmem>>, vector<256x8xbf16>
    tpu.vector_store %arg8[%c0_4, %c0_5], %8 {strides = array<i32>} : memref<256x72xbf16, #tpu.memory_space<vmem>>, vector<256x8xbf16>,
    %c0_i32_6 = arith.constant 0 : i32
    %10 = arith.addi %3, %c0_i32_6 : i32
    %c0_7 = arith.constant 0 : index
    %11 = arith.index_cast %10 : i32 to index
    %c1 = arith.constant 1 : index
    %c0_8 = arith.constant 0 : index
    %12 = vector.load %arg3[%c0_7, %11, %c1, %c0_8] : memref<1x18x18x8xbf16, #tpu.memory_space<vmem>>, vector<1x16x16x8xbf16>
    %13 = vector.shape_cast %12 : vector<1x16x16x8xbf16> to vector<16x16x8xbf16>
    %14 = vector.shape_cast %13 : vector<16x16x8xbf16> to vector<256x8xbf16>
    %c0_9 = arith.constant 0 : index
    %c8 = arith.constant 8 : index
    %15 = vector.load %arg8[%c0_9, %c8] : memref<256x72xbf16, #tpu.memory_space<vmem>>, vector<256x8xbf16>
    tpu.vector_store %arg8[%c0_9, %c8], %14 {strides = array<i32>} : memref<256x72xbf16, #tpu.memory_space<vmem>>, vector<256x8xbf16>,
    %c0_i32_10 = arith.constant 0 : i32
    %16 = arith.addi %3, %c0_i32_10 : i32
    %c0_11 = arith.constant 0 : index
    %17 = arith.index_cast %16 : i32 to index
    %c2 = arith.constant 2 : index
    %c0_12 = arith.constant 0 : index
    %18 = vector.load %arg3[%c0_11, %17, %c2, %c0_12] : memref<1x18x18x8xbf16, #tpu.memory_space<vmem>>, vector<1x16x16x8xbf16>
    %19 = vector.shape_cast %18 : vector<1x16x16x8xbf16> to vector<16x16x8xbf16>
    %20 = vector.shape_cast %19 : vector<16x16x8xbf16> to vector<256x8xbf16>
    %c0_13 = arith.constant 0 : index
    %c16 = arith.constant 16 : index
    %21 = vector.load %arg8[%c0_13, %c16] : memref<256x72xbf16, #tpu.memory_space<vmem>>, vector<256x8xbf16>
    tpu.vector_store %arg8[%c0_13, %c16], %20 {strides = array<i32>} : memref<256x72xbf16, #tpu.memory_space<vmem>>, vector<256x8xbf16>,
    %c1_i32 = arith.constant 1 : i32
    %22 = arith.addi %3, %c1_i32 : i32
    %c0_14 = arith.constant 0 : index
    %23 = arith.index_cast %22 : i32 to index
    %c0_15 = arith.constant 0 : index
    %c0_16 = arith.constant 0 : index
    %24 = vector.load %arg3[%c0_14, %23, %c0_15, %c0_16] : memref<1x18x18x8xbf16, #tpu.memory_space<vmem>>, vector<1x16x16x8xbf16>
    %25 = vector.shape_cast %24 : vector<1x16x16x8xbf16> to vector<16x16x8xbf16>
    %26 = vector.shape_cast %25 : vector<16x16x8xbf16> to vector<256x8xbf16>
    %c0_17 = arith.constant 0 : index
    %c24 = arith.constant 24 : index
    %27 = vector.load %arg8[%c0_17, %c24] : memref<256x72xbf16, #tpu.memory_space<vmem>>, vector<256x8xbf16>
    tpu.vector_store %arg8[%c0_17, %c24], %26 {strides = array<i32>} : memref<256x72xbf16, #tpu.memory_space<vmem>>, vector<256x8xbf16>,
    %c1_i32_18 = arith.constant 1 : i32
    %28 = arith.addi %3, %c1_i32_18 : i32
    %c0_19 = arith.constant 0 : index
    %29 = arith.index_cast %28 : i32 to index
    %c1_20 = arith.constant 1 : index
    %c0_21 = arith.constant 0 : index
    %30 = vector.load %arg3[%c0_19, %29, %c1_20, %c0_21] : memref<1x18x18x8xbf16, #tpu.memory_space<vmem>>, vector<1x16x16x8xbf16>
    %31 = vector.shape_cast %30 : vector<1x16x16x8xbf16> to vector<16x16x8xbf16>
    %32 = vector.shape_cast %31 : vector<16x16x8xbf16> to vector<256x8xbf16>
    %c0_22 = arith.constant 0 : index
    %c32 = arith.constant 32 : index
    %33 = vector.load %arg8[%c0_22, %c32] : memref<256x72xbf16, #tpu.memory_space<vmem>>, vector<256x8xbf16>
    tpu.vector_store %arg8[%c0_22, %c32], %32 {strides = array<i32>} : memref<256x72xbf16, #tpu.memory_space<vmem>>, vector<256x8xbf16>,
    %c1_i32_23 = arith.constant 1 : i32
    %34 = arith.addi %3, %c1_i32_23 : i32
    %c0_24 = arith.constant 0 : index
    %35 = arith.index_cast %34 : i32 to index
    %c2_25 = arith.constant 2 : index
    %c0_26 = arith.constant 0 : index
    %36 = vector.load %arg3[%c0_24, %35, %c2_25, %c0_26] : memref<1x18x18x8xbf16, #tpu.memory_space<vmem>>, vector<1x16x16x8xbf16>
    %37 = vector.shape_cast %36 : vector<1x16x16x8xbf16> to vector<16x16x8xbf16>
    %38 = vector.shape_cast %37 : vector<16x16x8xbf16> to vector<256x8xbf16>
    %c0_27 = arith.constant 0 : index
    %c40 = arith.constant 40 : index
    %39 = vector.load %arg8[%c0_27, %c40] : memref<256x72xbf16, #tpu.memory_space<vmem>>, vector<256x8xbf16>
    tpu.vector_store %arg8[%c0_27, %c40], %38 {strides = array<i32>} : memref<256x72xbf16, #tpu.memory_space<vmem>>, vector<256x8xbf16>,
    %c2_i32 = arith.constant 2 : i32
    %40 = arith.addi %3, %c2_i32 : i32
    %c0_28 = arith.constant 0 : index
    %41 = arith.index_cast %40 : i32 to index
    %c0_29 = arith.constant 0 : index
    %c0_30 = arith.constant 0 : index
    %42 = vector.load %arg3[%c0_28, %41, %c0_29, %c0_30] : memref<1x18x18x8xbf16, #tpu.memory_space<vmem>>, vector<1x16x16x8xbf16>
    %43 = vector.shape_cast %42 : vector<1x16x16x8xbf16> to vector<16x16x8xbf16>
    %44 = vector.shape_cast %43 : vector<16x16x8xbf16> to vector<256x8xbf16>
    %c0_31 = arith.constant 0 : index
    %c48 = arith.constant 48 : index
    %45 = vector.load %arg8[%c0_31, %c48] : memref<256x72xbf16, #tpu.memory_space<vmem>>, vector<256x8xbf16>
    tpu.vector_store %arg8[%c0_31, %c48], %44 {strides = array<i32>} : memref<256x72xbf16, #tpu.memory_space<vmem>>, vector<256x8xbf16>,
    %c2_i32_32 = arith.constant 2 : i32
    %46 = arith.addi %3, %c2_i32_32 : i32
    %c0_33 = arith.constant 0 : index
    %47 = arith.index_cast %46 : i32 to index
    %c1_34 = arith.constant 1 : index
    %c0_35 = arith.constant 0 : index
    %48 = vector.load %arg3[%c0_33, %47, %c1_34, %c0_35] : memref<1x18x18x8xbf16, #tpu.memory_space<vmem>>, vector<1x16x16x8xbf16>
    %49 = vector.shape_cast %48 : vector<1x16x16x8xbf16> to vector<16x16x8xbf16>
    %50 = vector.shape_cast %49 : vector<16x16x8xbf16> to vector<256x8xbf16>
    %c0_36 = arith.constant 0 : index
    %c56 = arith.constant 56 : index
    %51 = vector.load %arg8[%c0_36, %c56] : memref<256x72xbf16, #tpu.memory_space<vmem>>, vector<256x8xbf16>
    tpu.vector_store %arg8[%c0_36, %c56], %50 {strides = array<i32>} : memref<256x72xbf16, #tpu.memory_space<vmem>>, vector<256x8xbf16>,
    %c2_i32_37 = arith.constant 2 : i32
    %52 = arith.addi %3, %c2_i32_37 : i32
    %c0_38 = arith.constant 0 : index
    %53 = arith.index_cast %52 : i32 to index
    %c2_39 = arith.constant 2 : index
    %c0_40 = arith.constant 0 : index
    %54 = vector.load %arg3[%c0_38, %53, %c2_39, %c0_40] : memref<1x18x18x8xbf16, #tpu.memory_space<vmem>>, vector<1x16x16x8xbf16>
    %55 = vector.shape_cast %54 : vector<1x16x16x8xbf16> to vector<16x16x8xbf16>
    %56 = vector.shape_cast %55 : vector<16x16x8xbf16> to vector<256x8xbf16>
    %c0_41 = arith.constant 0 : index
    %c64 = arith.constant 64 : index
    %57 = vector.load %arg8[%c0_41, %c64] : memref<256x72xbf16, #tpu.memory_space<vmem>>, vector<256x8xbf16>
    tpu.vector_store %arg8[%c0_41, %c64], %56 {strides = array<i32>} : memref<256x72xbf16, #tpu.memory_space<vmem>>, vector<256x8xbf16>,
    %c0_42 = arith.constant 0 : index
    %c0_43 = arith.constant 0 : index
    %58 = vector.load %arg8[%c0_42, %c0_43] : memref<256x72xbf16, #tpu.memory_space<vmem>>, vector<256x72xbf16>
    %cst = arith.constant dense<0.000000e+00> : vector<256x128xf32>
    %59 = tpu.matmul %58, %2, %cst {dimension_numbers = #tpu.dot_dimension_numbers<[1], [0], [0], [1], [0, 0, 1, 1], [], []>} : vector<256x72xbf16>, vector<72x128xbf16>, vector<256x128xf32> -> vector<256x128xf32>
    %60 = arith.truncf %59 : vector<256x128xf32> to vector<256x128xbf16>
    %c0_44 = arith.constant 0 : index
    %c0_45 = arith.constant 0 : index
    %c0_46 = arith.constant 0 : index
    %61 = vector.load %arg5[%c0_44, %c0_45, %c0_46] : memref<1x256x128xbf16, #tpu.memory_space<vmem>>, vector<1x256x128xbf16>
    %62 = vector.shape_cast %61 : vector<1x256x128xbf16> to vector<256x128xbf16>
    %63 = vector.shape_cast %60 : vector<256x128xbf16> to vector<1x256x128xbf16>
    tpu.vector_store %arg5[%c0_44, %c0_45, %c0_46], %63 {strides = array<i32>} : memref<1x256x128xbf16, #tpu.memory_space<vmem>>, vector<1x256x128xbf16>,
    %c0_i32_47 = arith.constant 0 : i32
    %64 = arith.cmpi eq, %arg2, %c0_i32_47 : i32
    %65 = arith.extui %64 : i1 to i32
    %c0_i32_48 = arith.constant 0 : i32
    %66 = arith.cmpi ne, %65, %c0_i32_48 : i32
    scf.if %66 {
      %cst_63 = arith.constant 0.000000e+00 : f32
      %80 = vector.broadcast %cst_63 : f32 to vector<1x1x128xf32>
      %c0_64 = arith.constant 0 : index
      %c0_65 = arith.constant 0 : index
      %c0_66 = arith.constant 0 : index
      %81 = vector.load %arg6[%c0_64, %c0_65, %c0_66] : memref<1x1x128xf32, #tpu.memory_space<vmem>>, vector<1x1x128xf32>
      tpu.vector_store %arg6[%c0_64, %c0_65, %c0_66], %80 {strides = array<i32>} : memref<1x1x128xf32, #tpu.memory_space<vmem>>, vector<1x1x128xf32>,
      %cst_67 = arith.constant 0.000000e+00 : f32
      %82 = vector.broadcast %cst_67 : f32 to vector<1x1x128xf32>
      %c0_68 = arith.constant 0 : index
      %c0_69 = arith.constant 0 : index
      %c0_70 = arith.constant 0 : index
      %83 = vector.load %arg7[%c0_68, %c0_69, %c0_70] : memref<1x1x128xf32, #tpu.memory_space<vmem>>, vector<1x1x128xf32>
      tpu.vector_store %arg7[%c0_68, %c0_69, %c0_70], %82 {strides = array<i32>} : memref<1x1x128xf32, #tpu.memory_space<vmem>>, vector<1x1x128xf32>,
    } else {
    }
    %c0_49 = arith.constant 0 : index
    %c0_50 = arith.constant 0 : index
    %c0_51 = arith.constant 0 : index
    %67 = vector.load %arg6[%c0_49, %c0_50, %c0_51] : memref<1x1x128xf32, #tpu.memory_space<vmem>>, vector<1x1x128xf32>
    %cst_52 = arith.constant dense<0.000000e+00> : vector<128xf32>
    %68 = vector.multi_reduction <add>, %59, %cst_52 [0] : vector<256x128xf32> to vector<128xf32>
    %69 = vector.shape_cast %68 : vector<128xf32> to vector<1x128xf32>
    %70 = vector.shape_cast %69 : vector<1x128xf32> to vector<1x1x128xf32>
    %71 = arith.addf %67, %70 : vector<1x1x128xf32>
    %c0_53 = arith.constant 0 : index
    %c0_54 = arith.constant 0 : index
    %c0_55 = arith.constant 0 : index
    %72 = vector.load %arg6[%c0_53, %c0_54, %c0_55] : memref<1x1x128xf32, #tpu.memory_space<vmem>>, vector<1x1x128xf32>
    tpu.vector_store %arg6[%c0_53, %c0_54, %c0_55], %71 {strides = array<i32>} : memref<1x1x128xf32, #tpu.memory_space<vmem>>, vector<1x1x128xf32>,
    %c0_56 = arith.constant 0 : index
    %c0_57 = arith.constant 0 : index
    %c0_58 = arith.constant 0 : index
    %73 = vector.load %arg7[%c0_56, %c0_57, %c0_58] : memref<1x1x128xf32, #tpu.memory_space<vmem>>, vector<1x1x128xf32>
    %74 = arith.mulf %59, %59 : vector<256x128xf32>
    %cst_59 = arith.constant dense<0.000000e+00> : vector<128xf32>
    %75 = vector.multi_reduction <add>, %74, %cst_59 [0] : vector<256x128xf32> to vector<128xf32>
    %76 = vector.shape_cast %75 : vector<128xf32> to vector<1x128xf32>
    %77 = vector.shape_cast %76 : vector<1x128xf32> to vector<1x1x128xf32>
    %78 = arith.addf %73, %77 : vector<1x1x128xf32>
    %c0_60 = arith.constant 0 : index
    %c0_61 = arith.constant 0 : index
    %c0_62 = arith.constant 0 : index
    %79 = vector.load %arg7[%c0_60, %c0_61, %c0_62] : memref<1x1x128xf32, #tpu.memory_space<vmem>>, vector<1x1x128xf32>
    tpu.vector_store %arg7[%c0_60, %c0_61, %c0_62], %78 {strides = array<i32>} : memref<1x1x128xf32, #tpu.memory_space<vmem>>, vector<1x1x128xf32>,
    return
  }
  func.func @transform_0(%arg0: i32, %arg1: i32, %arg2: i32) -> (i32, i32, i32, i32) {
    %c0_i32 = arith.constant 0 : i32
    %c0_i32_0 = arith.constant 0 : i32
    %c0_i32_1 = arith.constant 0 : i32
    %c0_i32_2 = arith.constant 0 : i32
    return %arg0, %c0_i32, %c0_i32_0, %c0_i32_1 : i32, i32, i32, i32
  }
  func.func @transform_1(%arg0: i32, %arg1: i32, %arg2: i32) -> (i32, i32, i32) {
    %c0_i32 = arith.constant 0 : i32
    %c0_i32_0 = arith.constant 0 : i32
    %c0_i32_1 = arith.constant 0 : i32
    %c0_i32_2 = arith.constant 0 : i32
    return %c0_i32, %c0_i32_0, %c0_i32_1 : i32, i32, i32
  }
  func.func @transform_2(%arg0: i32, %arg1: i32, %arg2: i32) -> (i32, i32, i32) {
    %c0_i32 = arith.constant 0 : i32
    return %arg0, %arg2, %arg1 : i32, i32, i32
  }
  func.func @transform_3(%arg0: i32, %arg1: i32, %arg2: i32) -> (i32, i32, i32) {
    %c0_i32 = arith.constant 0 : i32
    %c0_i32_0 = arith.constant 0 : i32
    return %arg0, %c0_i32, %arg1 : i32, i32, i32
  }
  func.func @transform_4(%arg0: i32, %arg1: i32, %arg2: i32) -> (i32, i32, i32) {
    %c0_i32 = arith.constant 0 : i32
    %c0_i32_0 = arith.constant 0 : i32
    return %arg0, %c0_i32, %arg1 : i32, i32, i32
  }
}

module attributes {stable_mosaic.version = 11 : i64} {
  func.func @_norm_relu_kernel(%arg0: i32, %arg1: i32, %arg2: memref<1x256x128xbf16, #tpu.memory_space<vmem>>, %arg3: memref<1x1x128xf32, #tpu.memory_space<vmem>>, %arg4: memref<1x1x128xf32, #tpu.memory_space<vmem>>, %arg5: memref<1x256x128xf32, #tpu.memory_space<vmem>>) attributes {dimension_semantics = [#tpu.dimension_semantics<parallel>, #tpu.dimension_semantics<parallel>], iteration_bounds = array<i64: 2, 1>, scalar_prefetch = 0 : i64, scratch_operands = 0 : i64, tpu.core_type = #tpu.core_type<tc>, window_params = [{transform_indices = @transform_0, window_bounds = array<i64: 1, 256, 128>}, {transform_indices = @transform_1, window_bounds = array<i64: 1, 1, 128>}, {transform_indices = @transform_2, window_bounds = array<i64: 1, 1, 128>}, {transform_indices = @transform_3, window_bounds = array<i64: 1, 256, 128>}]} {
    %c0 = arith.constant 0 : index
    %c0_0 = arith.constant 0 : index
    %c0_1 = arith.constant 0 : index
    %0 = vector.load %arg2[%c0, %c0_0, %c0_1] : memref<1x256x128xbf16, #tpu.memory_space<vmem>>, vector<1x256x128xbf16>
    %1 = arith.extf %0 : vector<1x256x128xbf16> to vector<1x256x128xf32>
    %c0_2 = arith.constant 0 : index
    %c0_3 = arith.constant 0 : index
    %c0_4 = arith.constant 0 : index
    %2 = vector.load %arg3[%c0_2, %c0_3, %c0_4] : memref<1x1x128xf32, #tpu.memory_space<vmem>>, vector<1x1x128xf32>
    %3 = vector.broadcast %2 : vector<1x1x128xf32> to vector<1x256x128xf32>
    %4 = arith.mulf %1, %3 : vector<1x256x128xf32>
    %c0_5 = arith.constant 0 : index
    %c0_6 = arith.constant 0 : index
    %c0_7 = arith.constant 0 : index
    %5 = vector.load %arg4[%c0_5, %c0_6, %c0_7] : memref<1x1x128xf32, #tpu.memory_space<vmem>>, vector<1x1x128xf32>
    %6 = vector.broadcast %5 : vector<1x1x128xf32> to vector<1x256x128xf32>
    %7 = arith.addf %4, %6 : vector<1x256x128xf32>
    %cst = arith.constant 0.000000e+00 : f32
    %8 = vector.broadcast %cst : f32 to vector<1x256x128xf32>
    %9 = arith.maximumf %7, %8 : vector<1x256x128xf32>
    %c0_8 = arith.constant 0 : index
    %c0_9 = arith.constant 0 : index
    %c0_10 = arith.constant 0 : index
    %10 = vector.load %arg5[%c0_8, %c0_9, %c0_10] : memref<1x256x128xf32, #tpu.memory_space<vmem>>, vector<1x256x128xf32>
    tpu.vector_store %arg5[%c0_8, %c0_9, %c0_10], %9 {strides = array<i32>} : memref<1x256x128xf32, #tpu.memory_space<vmem>>, vector<1x256x128xf32>,
    return
  }
  func.func @transform_0(%arg0: i32, %arg1: i32) -> (i32, i32, i32) {
    %c0_i32 = arith.constant 0 : i32
    %c0_i32_0 = arith.constant 0 : i32
    return %arg0, %arg1, %c0_i32 : i32, i32, i32
  }
  func.func @transform_1(%arg0: i32, %arg1: i32) -> (i32, i32, i32) {
    %c0_i32 = arith.constant 0 : i32
    %c0_i32_0 = arith.constant 0 : i32
    %c0_i32_1 = arith.constant 0 : i32
    return %arg0, %c0_i32, %c0_i32_0 : i32, i32, i32
  }
  func.func @transform_2(%arg0: i32, %arg1: i32) -> (i32, i32, i32) {
    %c0_i32 = arith.constant 0 : i32
    %c0_i32_0 = arith.constant 0 : i32
    %c0_i32_1 = arith.constant 0 : i32
    return %arg0, %c0_i32, %c0_i32_0 : i32, i32, i32
  }
  func.func @transform_3(%arg0: i32, %arg1: i32) -> (i32, i32, i32) {
    %c0_i32 = arith.constant 0 : i32
    %c0_i32_0 = arith.constant 0 : i32
    return %arg0, %arg1, %c0_i32 : i32, i32, i32
  }
}

</mosaic_0001>

<bundles_post_ra>
// kernel: ibn_net_conv.3
= control target key start
LH: loop header
LB: loop body
LE: loop exit
PB: predicated region body
PF: predicated region fallthrough
CT: control target
= control target key end

     0   :  { %s711_s12 = smov 0   ;;  %s713_s13 = smov 0   ;;  %s876_s0 = inlined_call_operand.vmem [shape: bf16[2,256,128], index: 0, kind: input, shape index: {}]   ;;  %s877_s1 = inlined_call_operand.vmem [shape: f32[2,1,128], index: 1, kind: input, shape index: {}]   ;;  %s878_s2 = inlined_call_operand.vmem [shape: f32[2,1,128], index: 2, kind: input, shape index: {}]   ;;  %s879_s3 = inlined_call_operand.vmem [shape: f32[2,256,128], index: 3, kind: output, shape index: {}]  }
   0x1   :  { %s715_s14 = smov 0  }
   0x2 LB: > { %s25_s15 = sadd.s32 1, %s685_s13  ;;  %p553_p0 = scmp.ge.s32.totalorder %s689_s14, 1  ;;  %s689_s14 = sphi %s715_s14, %s13_s14   ;;  %s685_s13 = sphi %s713_s13, %s881_s13   ;;  %s681_s12 = sphi %s711_s12, %s880_s12  }
   0x3   : > { %p27_p1 = scmp.ge.s32.totalorder %s25_s15, 2  ;;  %p174_p2 = scmp.lt.s32.totalorder %s689_s14, 3 }
   0x5   : > { %s883_s15 = smov (%p27_p1, %s25_s15), 0  ;;  %p175_p3 = pnand %p553_p0, %p174_p2 }
   0x6   : > { %p213_p4 = scmp.lt.s32.totalorder (!%p175_p3), %s681_s12, 1 }
   0x7   : > { %178 = sbr.rel (%p175_p3) target bundleno = 52 (0x34), region = 32 }
   0xc   : > { %s885_s12 = smov (!%p213_p4, %s681_s12), 1 }
   0xd   : > { %s562_s16 = sshll.u32 %s885_s12, 7  ;;  %s224_s19 = scalar_lea.vmem %s877_s1, %s885_s12 }
   0xe   : > { %s739_s22 = scalar_lea.vmem %s876_s0, %s562_s16  ;;  %s227_s25 = scalar_lea.vmem %s878_s2, %s885_s12  ;;  %v746_v1 = vld [vmem:[%s224_s19] ss:$0 sm:$0xff] }
   0xf   : > { %v565_v0 = vld [vmem:[%s739_s22] sm:$0xff]   ;;  %v628_v2 = vld [vmem:[%s739_s22 + $0x8] sm:$0xff]   ;;  %v629_v7 = vld [vmem:[%s739_s22 + $0x10] sm:$0xff]   ;;  %s563_s26 = sshll.u32 %s885_s12, 8 }
  0x10   : > { %v566_v3 = vunpack.c.l.bf16 %v565_v0  ;;  %v567_v4 = vunpack.c.h.bf16 %v565_v0  ;;  %v570_v5 = vunpack.c.l.bf16 %v628_v2  ;;  %v571_v6 = vunpack.c.h.bf16 %v628_v2  ;;  %v630_v8 = vld [vmem:[%s739_s22 + $0x18] sm:$0xff]   ;;  %v751_v9 = vld [vmem:[%s227_s25] ss:$0 sm:$0xff]  ;;  %s769_s29 = scalar_lea.vmem %s879_s3, %s563_s26  ;;  %v632_v31 = vld [vmem:[%s739_s22 + $0x28] sm:$0xff]  }
  0x11   : > { %v574_v10 = vunpack.c.l.bf16 %v629_v7  ;;  %v575_v11 = vunpack.c.h.bf16 %v629_v7  ;;  %v578_v12 = vunpack.c.l.bf16 %v630_v8  ;;  %v579_v13 = vunpack.c.h.bf16 %v630_v8  ;;  %v631_v30 = vld [vmem:[%s739_s22 + $0x20] sm:$0xff]   ;;  %v633_v36 = vld [vmem:[%s739_s22 + $0x30] sm:$0xff]   ;;  %v634_v37 = vld [vmem:[%s739_s22 + $0x38] sm:$0xff]  }
  0x12   : > { %v309_v14 = vmul.f32 %v566_v3, %v746_v1  ;;  %v310_v15 = vmul.f32 %v567_v4, %v746_v1  ;;  %v311_v16 = vmul.f32 %v570_v5, %v746_v1  ;;  %v312_v17 = vmul.f32 %v571_v6, %v746_v1  ;;  %v635_v3 = vld [vmem:[%s739_s22 + $0x40] sm:$0xff]   ;;  %v636_v4 = vld [vmem:[%s739_s22 + $0x48] sm:$0xff]  }
  0x13   : > { %v313_v18 = vmul.f32 %v574_v10, %v746_v1  ;;  %v314_v19 = vmul.f32 %v575_v11, %v746_v1  ;;  %v315_v20 = vmul.f32 %v578_v12, %v746_v1  ;;  %v316_v21 = vmul.f32 %v579_v13, %v746_v1  ;;  %v637_v10 = vld [vmem:[%s739_s22 + $0x50] sm:$0xff]   ;;  %v638_v11 = vld [vmem:[%s739_s22 + $0x58] sm:$0xff]  }
  0x14   : > { %v348_v22 = vadd.f32 %v751_v9, %v309_v14  ;;  %v349_v23 = vadd.f32 %v751_v9, %v310_v15  ;;  %v350_v24 = vadd.f32 %v751_v9, %v311_v16  ;;  %v351_v25 = vadd.f32 %v751_v9, %v312_v17 }
  0x15   : > { %v352_v26 = vadd.f32 %v751_v9, %v313_v18  ;;  %v353_v27 = vadd.f32 %v751_v9, %v314_v19  ;;  %v354_v28 = vadd.f32 %v751_v9, %v315_v20  ;;  %v355_v29 = vadd.f32 %v751_v9, %v316_v21 }
  0x16   : > { %v380_v32 = vmax.f32 %v348_v22, 0.0  ;;  %v381_v33 = vmax.f32 %v349_v23, 0.0  ;;  %v382_v34 = vmax.f32 %v350_v24, 0.0  ;;  %v383_v35 = vmax.f32 %v351_v25, 0.0 }
  0x17   : > { %v384_v38 = vmax.f32 %v352_v26, 0.0  ;;  %v385_v39 = vmax.f32 %v353_v27, 0.0  ;;  %v386_v40 = vmax.f32 %v354_v28, 0.0  ;;  %v387_v41 = vmax.f32 %v355_v29, 0.0 }
  0x18   : > { %412 = vst [vmem:[%s769_s29] sm:$0xff] %v380_v32  ;;  %413 = vst [vmem:[%s769_s29 + $0x8] sm:$0xff] %v381_v33  ;;  %v582_v42 = vunpack.c.l.bf16 %v631_v30  ;;  %v583_v43 = vunpack.c.h.bf16 %v631_v30  ;;  %v586_v44 = vunpack.c.l.bf16 %v632_v31  ;;  %v587_v45 = vunpack.c.h.bf16 %v632_v31 }
  0x19   : > { %414 = vst [vmem:[%s769_s29 + $0x10] sm:$0xff] %v382_v34  ;;  %415 = vst [vmem:[%s769_s29 + $0x18] sm:$0xff] %v383_v35  ;;  %v590_v46 = vunpack.c.l.bf16 %v633_v36  ;;  %v591_v47 = vunpack.c.h.bf16 %v633_v36  ;;  %v594_v48 = vunpack.c.l.bf16 %v634_v37  ;;  %v595_v49 = vunpack.c.h.bf16 %v634_v37 }
  0x1a   : > { %416 = vst [vmem:[%s769_s29 + $0x20] sm:$0xff] %v384_v38  ;;  %417 = vst [vmem:[%s769_s29 + $0x28] sm:$0xff] %v385_v39  ;;  %v317_v50 = vmul.f32 %v582_v42, %v746_v1  ;;  %v318_v51 = vmul.f32 %v583_v43, %v746_v1  ;;  %v319_v52 = vmul.f32 %v586_v44, %v746_v1  ;;  %v598_v16 = vunpack.c.l.bf16 %v635_v3 }
  0x1b   : > { %418 = vst [vmem:[%s769_s29 + $0x30] sm:$0xff] %v386_v40  ;;  %419 = vst [vmem:[%s769_s29 + $0x38] sm:$0xff] %v387_v41  ;;  %v320_v53 = vmul.f32 %v587_v45, %v746_v1  ;;  %v321_v54 = vmul.f32 %v590_v46, %v746_v1  ;;  %v322_v55 = vmul.f32 %v591_v47, %v746_v1  ;;  %v599_v17 = vunpack.c.h.bf16 %v635_v3  ;;  %v639_v40 = vld [vmem:[%s739_s22 + $0x60] sm:$0xff]   ;;  %v640_v41 = vld [vmem:[%s739_s22 + $0x68] sm:$0xff]  }
  0x1c   : > { %v323_v56 = vmul.f32 %v594_v48, %v746_v1  ;;  %v324_v57 = vmul.f32 %v595_v49, %v746_v1  ;;  %v356_v58 = vadd.f32 %v751_v9, %v317_v50  ;;  %v357_v59 = vadd.f32 %v751_v9, %v318_v51  ;;  %v641_v46 = vld [vmem:[%s739_s22 + $0x70] sm:$0xff]   ;;  %v642_v47 = vld [vmem:[%s739_s22 + $0x78] sm:$0xff]  }
  0x1d   : > { %v358_v60 = vadd.f32 %v751_v9, %v319_v52  ;;  %v359_v61 = vadd.f32 %v751_v9, %v320_v53  ;;  %v360_v62 = vadd.f32 %v751_v9, %v321_v54  ;;  %v361_v63 = vadd.f32 %v751_v9, %v322_v55 }
  0x1e   : > { %v362_v0 = vadd.f32 %v751_v9, %v323_v56  ;;  %v363_v2 = vadd.f32 %v751_v9, %v324_v57  ;;  %v388_v5 = vmax.f32 %v356_v58, 0.0  ;;  %v389_v6 = vmax.f32 %v357_v59, 0.0 }
  0x1f   : > { %v390_v7 = vmax.f32 %v358_v60, 0.0  ;;  %v391_v8 = vmax.f32 %v359_v61, 0.0  ;;  %v392_v12 = vmax.f32 %v360_v62, 0.0  ;;  %v393_v13 = vmax.f32 %v361_v63, 0.0 }
  0x20   : > { %v394_v14 = vmax.f32 %v362_v0, 0.0  ;;  %v395_v15 = vmax.f32 %v363_v2, 0.0  ;;  %420 = vst [vmem:[%s769_s29 + $0x40] sm:$0xff] %v388_v5  ;;  %421 = vst [vmem:[%s769_s29 + $0x48] sm:$0xff] %v389_v6  ;;  %v602_v18 = vunpack.c.l.bf16 %v636_v4  ;;  %v603_v19 = vunpack.c.h.bf16 %v636_v4 }
  0x21   : > { %422 = vst [vmem:[%s769_s29 + $0x50] sm:$0xff] %v390_v7  ;;  %423 = vst [vmem:[%s769_s29 + $0x58] sm:$0xff] %v391_v8  ;;  %v606_v20 = vunpack.c.l.bf16 %v637_v10  ;;  %v607_v21 = vunpack.c.h.bf16 %v637_v10  ;;  %v610_v22 = vunpack.c.l.bf16 %v638_v11  ;;  %v611_v23 = vunpack.c.h.bf16 %v638_v11 }
  0x22   : > { %424 = vst [vmem:[%s769_s29 + $0x60] sm:$0xff] %v392_v12  ;;  %425 = vst [vmem:[%s769_s29 + $0x68] sm:$0xff] %v393_v13  ;;  %v325_v24 = vmul.f32 %v598_v16, %v746_v1  ;;  %v326_v25 = vmul.f32 %v599_v17, %v746_v1  ;;  %v327_v26 = vmul.f32 %v602_v18, %v746_v1  ;;  %v614_v52 = vunpack.c.l.bf16 %v639_v40 }
  0x23   : > { %426 = vst [vmem:[%s769_s29 + $0x70] sm:$0xff] %v394_v14  ;;  %427 = vst [vmem:[%s769_s29 + $0x78] sm:$0xff] %v395_v15  ;;  %v328_v27 = vmul.f32 %v603_v19, %v746_v1  ;;  %v329_v28 = vmul.f32 %v606_v20, %v746_v1  ;;  %v330_v29 = vmul.f32 %v607_v21, %v746_v1  ;;  %v615_v53 = vunpack.c.h.bf16 %v639_v40 }
  0x24   : > { %v331_v30 = vmul.f32 %v610_v22, %v746_v1  ;;  %v332_v31 = vmul.f32 %v611_v23, %v746_v1  ;;  %v364_v32 = vadd.f32 %v751_v9, %v325_v24  ;;  %v365_v33 = vadd.f32 %v751_v9, %v326_v25 }
  0x25   : > { %v366_v34 = vadd.f32 %v751_v9, %v327_v26  ;;  %v367_v35 = vadd.f32 %v751_v9, %v328_v27  ;;  %v368_v36 = vadd.f32 %v751_v9, %v329_v28  ;;  %v369_v37 = vadd.f32 %v751_v9, %v330_v29 }
  0x26   : > { %v370_v38 = vadd.f32 %v751_v9, %v331_v30  ;;  %v371_v39 = vadd.f32 %v751_v9, %v332_v31  ;;  %v396_v42 = vmax.f32 %v364_v32, 0.0  ;;  %v397_v43 = vmax.f32 %v365_v33, 0.0 }
  0x27   : > { %v398_v44 = vmax.f32 %v366_v34, 0.0  ;;  %v399_v45 = vmax.f32 %v367_v35, 0.0  ;;  %v400_v48 = vmax.f32 %v368_v36, 0.0  ;;  %v401_v49 = vmax.f32 %v369_v37, 0.0 }
  0x28   : > { %v402_v50 = vmax.f32 %v370_v38, 0.0  ;;  %v403_v51 = vmax.f32 %v371_v39, 0.0  ;;  %428 = vst [vmem:[%s769_s29 + $0x80] sm:$0xff] %v396_v42  ;;  %429 = vst [vmem:[%s769_s29 + $0x88] sm:$0xff] %v397_v43  ;;  %v618_v54 = vunpack.c.l.bf16 %v640_v41  ;;  %v619_v55 = vunpack.c.h.bf16 %v640_v41 }
  0x29   : > { %430 = vst [vmem:[%s769_s29 + $0x90] sm:$0xff] %v398_v44  ;;  %431 = vst [vmem:[%s769_s29 + $0x98] sm:$0xff] %v399_v45  ;;  %v622_v56 = vunpack.c.l.bf16 %v641_v46  ;;  %v623_v57 = vunpack.c.h.bf16 %v641_v46  ;;  %v626_v58 = vunpack.c.l.bf16 %v642_v47  ;;  %v627_v59 = vunpack.c.h.bf16 %v642_v47 }
  0x2a   : > { %432 = vst [vmem:[%s769_s29 + $0xa0] sm:$0xff] %v400_v48  ;;  %433 = vst [vmem:[%s769_s29 + $0xa8] sm:$0xff] %v401_v49  ;;  %v333_v60 = vmul.f32 %v614_v52, %v746_v1  ;;  %v334_v61 = vmul.f32 %v615_v53, %v746_v1  ;;  %v335_v62 = vmul.f32 %v618_v54, %v746_v1 }
  0x2b   : > { %434 = vst [vmem:[%s769_s29 + $0xb0] sm:$0xff] %v402_v50  ;;  %435 = vst [vmem:[%s769_s29 + $0xb8] sm:$0xff] %v403_v51  ;;  %v336_v63 = vmul.f32 %v619_v55, %v746_v1  ;;  %v337_v0 = vmul.f32 %v622_v56, %v746_v1  ;;  %v338_v2 = vmul.f32 %v623_v57, %v746_v1 }
  0x2c   : > { %v339_v3 = vmul.f32 %v626_v58, %v746_v1  ;;  %v340_v4 = vmul.f32 %v627_v59, %v746_v1  ;;  %v372_v5 = vadd.f32 %v751_v9, %v333_v60  ;;  %v373_v6 = vadd.f32 %v751_v9, %v334_v61 }
  0x2d   : > { %v374_v7 = vadd.f32 %v751_v9, %v335_v62  ;;  %v375_v8 = vadd.f32 %v751_v9, %v336_v63  ;;  %v376_v10 = vadd.f32 %v751_v9, %v337_v0  ;;  %v377_v11 = vadd.f32 %v751_v9, %v338_v2 }
  0x2e   : > { %v378_v1 = vadd.f32 %v751_v9, %v339_v3  ;;  %v379_v12 = vadd.f32 %v751_v9, %v340_v4  ;;  %v404_v13 = vmax.f32 %v372_v5, 0.0  ;;  %v405_v14 = vmax.f32 %v373_v6, 0.0 }
  0x2f   : > { %v406_v15 = vmax.f32 %v374_v7, 0.0  ;;  %v407_v16 = vmax.f32 %v375_v8, 0.0  ;;  %v408_v17 = vmax.f32 %v376_v10, 0.0  ;;  %v409_v18 = vmax.f32 %v377_v11, 0.0 }
  0x30   : > { %v410_v19 = vmax.f32 %v378_v1, 0.0  ;;  %v411_v20 = vmax.f32 %v379_v12, 0.0  ;;  %436 = vst [vmem:[%s769_s29 + $0xc0] sm:$0xff] %v404_v13  ;;  %437 = vst [vmem:[%s769_s29 + $0xc8] sm:$0xff] %v405_v14 }
  0x31   : > { %438 = vst [vmem:[%s769_s29 + $0xd0] sm:$0xff] %v406_v15  ;;  %439 = vst [vmem:[%s769_s29 + $0xd8] sm:$0xff] %v407_v16 }
  0x32   : > { %440 = vst [vmem:[%s769_s29 + $0xe0] sm:$0xff] %v408_v17  ;;  %441 = vst [vmem:[%s769_s29 + $0xe8] sm:$0xff] %v409_v18 }
  0x33   : > { %442 = vst [vmem:[%s769_s29 + $0xf0] sm:$0xff] %v410_v19  ;;  %443 = vst [vmem:[%s769_s29 + $0xf8] sm:$0xff] %v411_v20 }
  0x34 PF: > { %s13_s14 = sadd.s32 1, %s689_s14   ;;  %s880_s12 = smov %s685_s13 }
  0x35   : > { %p10_p5 = scmp.ge.s32.totalorder %s13_s14, 4   ;;  %s881_s13 = smov %s883_s15 }
  0x37   :  { %12 = sbr.rel (!%p10_p5) target bundleno = 2 (0x2), region = 68 }

// kernel: ibn_net_conv.2
= control target key start
LH: loop header
LB: loop body
LE: loop exit
PB: predicated region body
PF: predicated region fallthrough
CT: control target
= control target key end

     0   :  { %s4951_s15 = smov 0   ;;  %s4953_s16 = smov 0   ;;  %s6411_s0 = inlined_call_operand.vmem [shape: bf16[2,18,18,8], index: 0, kind: input, shape index: {}]   ;;  %s6412_s1 = inlined_call_operand.vmem [shape: bf16[1,72,128], index: 1, kind: input, shape index: {}]   ;;  %s6413_s2 = inlined_call_operand.vmem [shape: bf16[2,256,128], index: 2, kind: output, shape index: {0}]   ;;  %s6414_s3 = inlined_call_operand.vmem [shape: f32[2,1,128], index: 3, kind: output, shape index: {1}]   ;;  %s6415_s4 = inlined_call_operand.vmem [shape: f32[2,1,128], index: 4, kind: output, shape index: {2}]  }
   0x1   :  { %s4955_s17 = smov 0  }
   0x2 LB: > { %s34_s18 = sadd.s32 1, %s4911_s16  ;;  %p4256_p0 = scmp.ge.s32.totalorder %s4915_s17, 1  ;;  %s4915_s17 = sphi %s4955_s17, %s15_s17   ;;  %s4911_s16 = sphi %s4953_s16, %s6421_s16   ;;  %s4907_s15 = sphi %s4951_s15, %s6420_s15  }
   0x3   : > { %p36_p1 = scmp.ge.s32.totalorder %s34_s18, 2  ;;  %p194_p2 = scmp.lt.s32.totalorder %s4915_s17, 3 }
   0x5   : > { %s6423_s18 = smov (%p36_p1, %s34_s18), 0  ;;  %p195_p3 = pnand %p4256_p0, %p194_p2 }
   0x6   : > { %p239_p4 = scmp.lt.s32.totalorder (!%p195_p3), %s4907_s15, 1  ;;  %s4917_s23 = smov (!%p195_p3), 8  }
   0x7   : > { %198 = sbr.rel (%p195_p3) target bundleno = 880 (0x370), region = 28  ;;  %s4918_s24 = smov (!%p195_p3), 16  }
   0x8   : > { %s4919_s25 = smov (!%p195_p3), 24   ;;  %s4920_s26 = smov (!%p195_p3), 32  }
   0x9   : > { %s4921_s27 = smov (!%p195_p3), 40   ;;  %s4922_s30 = smov (!%p195_p3), 48  }
   0xa   : > { %s4923_s9 = smov (!%p195_p3), 56   ;;  %s4924_s14 = smov (!%p195_p3), 64  }
   0xc   : > { %s6425_s15 = smov (!%p239_p4, %s4907_s15), 1  ;;  %vm399_vm0 = vsmask.f32 3328  ;;  %vm400_vm1 = vsmask.f32 7440  ;;  %vm318_vm3 = vcmask 60416  }
   0xd   : > { %s4838_s19 = smul.u32 216, %s6425_s15  ;;  %vm4986_vm2 = vmor %vm399_vm0, %vm400_vm1  ;;  %vm1011_vm4 = vcmask 1042432   ;;  %vm1012_vm5 = vcmask 1046532   ;;  %vm882_vm7 = vcmask 126016   ;;  %vm1222_vm8 = vcmask 191616   ;;  %s6388_s28 = scalar_lea.vmem %s6415_s4, %s6425_s15 }
   0xe   : > { %vm5130_vm6 = vmor %vm1011_vm4, %vm1012_vm5  ;;  %vm3633_vm9 = vcmask 1043456   ;;  %vm1419_vm10 = vcmask 257216   ;;  %vm1980_vm11 = vcmask 322816   ;;  %vm2317_vm12 = vcmask 388416  }
   0xf   : > { %s4975_s22 = scalar_lea.vmem %s6411_s0, %s4838_s19  ;;  %vm2514_vm13 = vcmask 454016   ;;  %vm3075_vm14 = vcmask 519616   ;;  %vm3412_vm15 = vcmask 585216   ;;  %vm3584_vm0 = vcmask 588800   ;;  %s4635_s19 = sshll.u32 %s6425_s15, 7 }
  0x10   : > { %v354_v0 = vld [vmem:[%s4975_s22 + $0xc] sm:$0xf]  ;;  %v355_v1 = vld [vmem:[%s4975_s22 + $0x10] sm:$0xf]  ;;  %v351_v2 = vld [vmem:[%s4975_s22] sm:$0xf] }
  0x11   : > { %v427_v3 = vshrl.u32 %v354_v0, 16  ;;  %v430_v4 = vshll.u32 %v354_v0, 16  ;;  %v436_v5 = vshll.u32 %v355_v1, 16  ;;  %v440_v6 = vshrl.u32 %v355_v1, 16  ;;  %v352_v7 = vld [vmem:[%s4975_s22 + $0x4] sm:$0xf] }
  0x12   : > { %v403_v8 = vshrl.u32 %v351_v2, 16  ;;  %v406_v9 = vshll.u32 %v351_v2, 16  ;;  %v412_v10 = vshll.u32 %v352_v7, 16  ;;  %v416_v11 = vshrl.u32 %v352_v7, 16  ;;  %v356_v12 = vld [vmem:[%s4975_s22 + $0x14] sm:$0x1] }
  0x13   : > { %v429_v13 = vrot.slane %v427_v3, 4  ;;  %v432_v14 = vrot.slane %v430_v4, 5  ;;  %v438_v15 = vrot.slane %v436_v5, 5  ;;  %v442_v16 = vrot.slane %v440_v6, 4  ;;  %v353_v17 = vld [vmem:[%s4975_s22 + $0x8] sm:$0x1] }
  0x14   : > { %v405_v18 = vrot.slane %v403_v8, 4  ;;  %v408_v19 = vrot.slane %v406_v9, 5  ;;  %v414_v20 = vrot.slane %v412_v10, 5  ;;  %v418_v21 = vrot.slane %v416_v11, 4  ;;  %v358_v22 = vld [vmem:[%s4975_s22 + $0x1c] sm:$0xf] }
  0x15   : > { %v433_v23 = vor.u32 %v432_v14, %v429_v13  ;;  %v443_v24 = vor.u32 %v442_v16, %v438_v15  ;;  %v446_v25 = vshll.u32 %v356_v12, 16  ;;  %v422_v26 = vshll.u32 %v353_v17, 16  ;;  %v359_v30 = vld [vmem:[%s4975_s22 + $0x20] sm:$0x1]  ;;  %v357_v33 = vld [vmem:[%s4975_s22 + $0x18] sm:$0xf] }
  0x16   : > { %v409_v28 = vor.u32 %v408_v19, %v405_v18  ;;  %v419_v29 = vor.u32 %v418_v21, %v414_v20  ;;  %v460_v31 = vshll.u32 %v358_v22, 16  ;;  %v464_v32 = vshrl.u32 %v358_v22, 16  ;;  %v361_v42 = vld [vmem:[%s4975_s22 + $0x28] sm:$0xf]  ;;  %v362_v47 = vld [vmem:[%s4975_s22 + $0x2c] sm:$0x1] }
  0x17   : > { %v434_v34 = vrot.slane %v433_v23, 4  ;;  %v444_v35 = vrot.slane %v443_v24, 4  ;;  %v448_v36 = vrot.slane %v446_v25, 5  ;;  %v424_v37 = vrot.slane %v422_v26, 5  ;;  %v360_v48 = vld [vmem:[%s4975_s22 + $0x24] sm:$0xf] }
  0x18   : > { %v410_v38 = vrot.slane %v409_v28, 4  ;;  %v420_v39 = vrot.slane %v419_v29, 4  ;;  %v462_v40 = vrot.slane %v460_v31, 5  ;;  %v466_v41 = vrot.slane %v464_v32, 4  ;;  %v364_v53 = vld [vmem:[%s4975_s22 + $0x34] sm:$0xf] }
  0x19   : > { %v439_v43 = vsel %vm4986_vm2, %v434_v34, %v438_v15  ;;  %v449_v44 = vsel %vm4986_vm2, %v444_v35, %v448_v36  ;;  %v470_v45 = vshll.u32 %v359_v30, 16  ;;  %v451_v46 = vshrl.u32 %v357_v33, 16  ;;  %v365_v62 = vld [vmem:[%s4975_s22 + $0x38] sm:$0x1]  ;;  %v363_v3 = vld [vmem:[%s4975_s22 + $0x30] sm:$0xf] }
  0x1a   : > { %790 = vrot.lane.b32.xlu1 %v439_v43, %s4917_s23  ;;  %v415_v49 = vsel %vm4986_vm2, %v410_v38, %v414_v20  ;;  %v425_v50 = vsel %vm4986_vm2, %v420_v39, %v424_v37  ;;  %v467_v51 = vor.u32 %v466_v41, %v462_v40  ;;  %v454_v52 = vshll.u32 %v357_v33, 16  ;;  %v367_v8 = vld [vmem:[%s4975_s22 + $0x40] sm:$0xf]  ;;  %v368_v17 = vld [vmem:[%s4975_s22 + $0x44] sm:$0x1] }
  0x1b   : > { %786 = vrot.lane.b32.xlu0 %v415_v49, %s4917_s23  ;;  %v472_v54 = vrot.slane %v470_v45, 5  ;;  %v453_v55 = vrot.slane %v451_v46, 4  ;;  %v484_v56 = vshll.u32 %v361_v42, 16  ;;  %v488_v57 = vshrl.u32 %v361_v42, 16  ;;  %v366_v22 = vld [vmem:[%s4975_s22 + $0x3c] sm:$0xf] }
  0x1c   : > { %v468_v58 = vrot.slane %v467_v51, 4  ;;  %v456_v59 = vrot.slane %v454_v52, 5  ;;  %v494_v60 = vshll.u32 %v362_v47, 16  ;;  %v475_v61 = vshrl.u32 %v360_v48, 16  ;;  %v370_v28 = vld [vmem:[%s4975_s22 + $0x4c] sm:$0xf] }
  0x1d   : > { %v486_v63 = vrot.slane %v484_v56, 5  ;;  %v490_v0 = vrot.slane %v488_v57, 4  ;;  %v478_v1 = vshll.u32 %v360_v48, 16  ;;  %v508_v2 = vshll.u32 %v364_v53, 16  ;;  %v371_v37 = vld [vmem:[%s4975_s22 + $0x50] sm:$0x1] }
  0x1e   : > { %792 = vrot.lane.b32.xlu1 %v449_v44, %s4917_s23  ;;  %v473_v4 = vsel %vm4986_vm2, %v468_v58, %v472_v54  ;;  %v457_v5 = vor.u32 %v456_v59, %v453_v55  ;;  %v496_v6 = vrot.slane %v494_v60, 5  ;;  %v477_v7 = vrot.slane %v475_v61, 4  ;;  %v369_v42 = vld [vmem:[%s4975_s22 + $0x48] sm:$0xf]  ;;  %v373_v47 = vld [vmem:[%s4975_s22 + $0x58] sm:$0xf] }
  0x1f   : > { %788 = vrot.lane.b32.xlu0 %v425_v50, %s4917_s23  ;;  %v491_v9 = vor.u32 %v490_v0, %v486_v63  ;;  %v480_v10 = vrot.slane %v478_v1, 5  ;;  %v510_v11 = vrot.slane %v508_v2, 5  ;;  %v512_v12 = vshrl.u32 %v364_v53, 16  ;;  %v374_v56 = vld [vmem:[%s4975_s22 + $0x5c] sm:$0x1] }
  0x20   : > { %v458_v13 = vrot.slane %v457_v5, 4  ;;  %v518_v14 = vshll.u32 %v365_v62, 16  ;;  %v499_v15 = vshrl.u32 %v363_v3, 16  ;;  %v502_v16 = vshll.u32 %v363_v3, 16  ;;  %v372_v61 = vld [vmem:[%s4975_s22 + $0x54] sm:$0xf] }
  0x21   : > { %v492_v18 = vrot.slane %v491_v9, 4  ;;  %v481_v19 = vor.u32 %v480_v10, %v477_v7  ;;  %v514_v20 = vrot.slane %v512_v12, 4  ;;  %v532_v21 = vshll.u32 %v367_v8, 16 }
  0x22   : > { %796 = vrot.lane.b32.xlu1 %v473_v4, %s4917_s23  ;;  %v463_v23 = vsel %vm4986_vm2, %v458_v13, %v462_v40  ;;  %v520_v24 = vrot.slane %v518_v14, 5  ;;  %v501_v25 = vrot.slane %v499_v15, 4  ;;  %v504_v26 = vrot.slane %v502_v16, 5  ;;  %v377_v15 = vld [vmem:[%s4975_s22 + $0x68] sm:$0x1] }
  0x23   : > { %794 = vrot.lane.b32.xlu0 %v463_v23, %s4917_s23  ;;  %v497_v29 = vsel %vm4986_vm2, %v492_v18, %v496_v6  ;;  %v482_v30 = vrot.slane %v481_v19, 4  ;;  %v515_v31 = vor.u32 %v514_v20, %v510_v11  ;;  %v534_v32 = vrot.slane %v532_v21, 5  ;;  %v376_v6 = vld [vmem:[%s4975_s22 + $0x64] sm:$0xf]  ;;  %v375_v16 = vld [vmem:[%s4975_s22 + $0x60] sm:$0xf] }
  0x24   : > { %v505_v33 = vor.u32 %v504_v26, %v501_v25  ;;  %v536_v34 = vshrl.u32 %v367_v8, 16  ;;  %v542_v35 = vshll.u32 %v368_v17, 16  ;;  %v523_v36 = vshrl.u32 %v366_v22, 16  ;;  %v379_v25 = vld [vmem:[%s4975_s22 + $0x70] sm:$0xf] }
  0x25   : > { %v487_v38 = vsel %vm4986_vm2, %v482_v30, %v486_v63  ;;  %v516_v39 = vrot.slane %v515_v31, 4  ;;  %v526_v40 = vshll.u32 %v366_v22, 16  ;;  %v556_v41 = vshll.u32 %v370_v28, 16 }
  0x26   : > { %800 = vrot.lane.b32.xlu1 %v497_v29, %s4917_s23  ;;  %v506_v43 = vrot.slane %v505_v33, 4  ;;  %v538_v44 = vrot.slane %v536_v34, 4  ;;  %v544_v45 = vrot.slane %v542_v35, 5  ;;  %v525_v46 = vrot.slane %v523_v36, 4  ;;  %v380_v35 = vld [vmem:[%s4975_s22 + $0x74] sm:$0x1] }
  0x27   : > { %798 = vrot.lane.b32.xlu0 %v487_v38, %s4917_s23  ;;  %v521_v48 = vsel %vm4986_vm2, %v516_v39, %v520_v24  ;;  %v528_v49 = vrot.slane %v526_v40, 5  ;;  %v558_v50 = vrot.slane %v556_v41, 5  ;;  %v560_v51 = vshrl.u32 %v370_v28, 16  ;;  %v378_v36 = vld [vmem:[%s4975_s22 + $0x6c] sm:$0xf] }
  0x28   : > { %v511_v52 = vsel %vm4986_vm2, %v506_v43, %v510_v11  ;;  %v539_v53 = vor.u32 %v538_v44, %v534_v32  ;;  %v566_v54 = vshll.u32 %v371_v37, 16  ;;  %v547_v55 = vshrl.u32 %v369_v42, 16 }
  0x29   : > { %v529_v57 = vor.u32 %v528_v49, %v525_v46  ;;  %v562_v58 = vrot.slane %v560_v51, 4  ;;  %v550_v59 = vshll.u32 %v369_v42, 16  ;;  %v580_v60 = vshll.u32 %v373_v47, 16 }
  0x2a   : > { %804 = vrot.lane.b32.xlu1 %v521_v48, %s4917_s23  ;;  %v540_v62 = vrot.slane %v539_v53, 4  ;;  %v568_v63 = vrot.slane %v566_v54, 5  ;;  %v549_v0 = vrot.slane %v547_v55, 4  ;;  %v584_v1 = vshrl.u32 %v373_v47, 16  ;;  %v383_v54 = vld [vmem:[%s4975_s22 + $0x80] sm:$0x1] }
  0x2b   : > { %802 = vrot.lane.b32.xlu0 %v511_v52, %s4917_s23  ;;  %v530_v2 = vrot.slane %v529_v57, 4  ;;  %v563_v3 = vor.u32 %v562_v58, %v558_v50  ;;  %v552_v4 = vrot.slane %v550_v59, 5  ;;  %v582_v5 = vrot.slane %v580_v60, 5  ;;  %v381_v55 = vld [vmem:[%s4975_s22 + $0x78] sm:$0xf] }
  0x2c   : > { %v545_v7 = vsel %vm4986_vm2, %v540_v62, %v544_v45  ;;  %v586_v8 = vrot.slane %v584_v1, 4  ;;  %v590_v9 = vshll.u32 %v374_v56, 16  ;;  %v571_v10 = vshrl.u32 %v372_v61, 16  ;;  %v382_v45 = vld [vmem:[%s4975_s22 + $0x7c] sm:$0xf] }
  0x2d   : > { %v535_v11 = vsel %vm4986_vm2, %v530_v2, %v534_v32  ;;  %v564_v12 = vrot.slane %v563_v3, 4  ;;  %v553_v13 = vor.u32 %v552_v4, %v549_v0  ;;  %v574_v14 = vshll.u32 %v372_v61, 16  ;;  %v385_v0 = vld [vmem:[%s4975_s22 + $0x88] sm:$0xf] }
  0x2e   : > { %808 = vrot.lane.b32.xlu1 %v545_v7, %s4917_s23  ;;  %v587_v17 = vor.u32 %v586_v8, %v582_v5  ;;  %v592_v18 = vrot.slane %v590_v9, 5  ;;  %v573_v19 = vrot.slane %v571_v10, 4  ;;  %v604_v20 = vshll.u32 %v376_v6, 16  ;;  %v384_v10 = vld [vmem:[%s4975_s22 + $0x84] sm:$0xf] }
  0x2f   : > { %806 = vrot.lane.b32.xlu0 %v535_v11, %s4917_s23  ;;  %v569_v21 = vsel %vm4986_vm2, %v564_v12, %v568_v63  ;;  %v554_v22 = vrot.slane %v553_v13, 4  ;;  %v576_v23 = vrot.slane %v574_v14, 5  ;;  %v608_v24 = vshrl.u32 %v376_v6, 16 }
  0x30   : > { %v588_v26 = vrot.slane %v587_v17, 4  ;;  %v606_v28 = vrot.slane %v604_v20, 5  ;;  %v614_v29 = vshll.u32 %v377_v15, 16  ;;  %v595_v30 = vshrl.u32 %v375_v16, 16 }
  0x31   : > { %v559_v31 = vsel %vm4986_vm2, %v554_v22, %v558_v50  ;;  %v577_v32 = vor.u32 %v576_v23, %v573_v19  ;;  %v610_v33 = vrot.slane %v608_v24, 4  ;;  %v598_v34 = vshll.u32 %v375_v16, 16  ;;  %v388_v19 = vld [vmem:[%s4975_s22 + $0x94] sm:$0xf]  ;;  %v389_v24 = vld [vmem:[%s4975_s22 + $0x98] sm:$0x1] }
  0x32   : > { %812 = vrot.lane.b32.xlu1 %v569_v21, %s4917_s23  ;;  %v593_v37 = vsel %vm4986_vm2, %v588_v26, %v592_v18  ;;  %v616_v38 = vrot.slane %v614_v29, 5  ;;  %v597_v39 = vrot.slane %v595_v30, 4  ;;  %v628_v40 = vshll.u32 %v379_v25, 16  ;;  %v387_v30 = vld [vmem:[%s4975_s22 + $0x90] sm:$0xf] }
  0x33   : > { %810 = vrot.lane.b32.xlu0 %v559_v31, %s4917_s23  ;;  %v578_v41 = vrot.slane %v577_v32, 4  ;;  %v611_v42 = vor.u32 %v610_v33, %v606_v28  ;;  %v600_v43 = vrot.slane %v598_v34, 5  ;;  %v632_v44 = vshrl.u32 %v379_v25, 16 }
  0x34   : > { %v630_v46 = vrot.slane %v628_v40, 5  ;;  %v638_v47 = vshll.u32 %v380_v35, 16  ;;  %v619_v48 = vshrl.u32 %v378_v36, 16  ;;  %v622_v49 = vshll.u32 %v378_v36, 16 }
  0x35   : > { %v583_v50 = vsel %vm4986_vm2, %v578_v41, %v582_v5  ;;  %v612_v51 = vrot.slane %v611_v42, 4  ;;  %v601_v52 = vor.u32 %v600_v43, %v597_v39  ;;  %v634_v53 = vrot.slane %v632_v44, 4  ;;  %v386_v5 = vld [vmem:[%s4975_s22 + $0x8c] sm:$0x1]  ;;  %v391_v39 = vld [vmem:[%s4975_s22 + $0xa0] sm:$0xf] }
  0x36   : > { %816 = vrot.lane.b32.xlu1 %v593_v37, %s4917_s23  ;;  %v640_v56 = vrot.slane %v638_v47, 5  ;;  %v621_v57 = vrot.slane %v619_v48, 4  ;;  %v624_v58 = vrot.slane %v622_v49, 5  ;;  %v652_v59 = vshll.u32 %v382_v45, 16  ;;  %v392_v48 = vld [vmem:[%s4975_s22 + $0xa4] sm:$0x1] }
  0x37   : > { %814 = vrot.lane.b32.xlu0 %v583_v50, %s4917_s23  ;;  %v617_v60 = vsel %vm4986_vm2, %v612_v51, %v616_v38  ;;  %v602_v61 = vrot.slane %v601_v52, 4  ;;  %v635_v62 = vor.u32 %v634_v53, %v630_v46  ;;  %v656_v63 = vshrl.u32 %v382_v45, 16  ;;  %v390_v49 = vld [vmem:[%s4975_s22 + $0x9c] sm:$0xf] }
  0x38   : > { %v625_v1 = vor.u32 %v624_v58, %v621_v57  ;;  %v654_v2 = vrot.slane %v652_v59, 5  ;;  %v662_v3 = vshll.u32 %v383_v54, 16  ;;  %v643_v4 = vshrl.u32 %v381_v55, 16  ;;  %v394_v58 = vld [vmem:[%s4975_s22 + $0xac] sm:$0xf] }
  0x39   : > { %v607_v6 = vsel %vm4986_vm2, %v602_v61, %v606_v28  ;;  %v636_v7 = vrot.slane %v635_v62, 4  ;;  %v658_v8 = vrot.slane %v656_v63, 4  ;;  %v646_v9 = vshll.u32 %v381_v55, 16 }
  0x3a   : > { %820 = vrot.lane.b32.xlu1 %v617_v60, %s4917_s23  ;;  %v626_v11 = vrot.slane %v625_v1, 4  ;;  %v664_v12 = vrot.slane %v662_v3, 5  ;;  %v645_v13 = vrot.slane %v643_v4, 4  ;;  %v676_v14 = vshll.u32 %v385_v0, 16  ;;  %v395_v3 = vld [vmem:[%s4975_s22 + $0xb0] sm:$0x1] }
  0x3b   : > { %818 = vrot.lane.b32.xlu0 %v607_v6, %s4917_s23  ;;  %v641_v15 = vsel %vm4986_vm2, %v636_v7, %v640_v56  ;;  %v659_v16 = vor.u32 %v658_v8, %v654_v2  ;;  %v648_v17 = vrot.slane %v646_v9, 5  ;;  %v680_v18 = vshrl.u32 %v385_v0, 16  ;;  %v393_v4 = vld [vmem:[%s4975_s22 + $0xa8] sm:$0xf] }
  0x3c   : > { %v631_v20 = vsel %vm4986_vm2, %v626_v11, %v630_v46  ;;  %v678_v21 = vrot.slane %v676_v14, 5  ;;  %v686_v22 = vshll.u32 %v386_v5, 16  ;;  %v667_v23 = vshrl.u32 %v384_v10, 16 }
  0x3d   : > { %v660_v25 = vrot.slane %v659_v16, 4  ;;  %v649_v26 = vor.u32 %v648_v17, %v645_v13  ;;  %v682_v28 = vrot.slane %v680_v18, 4  ;;  %v670_v29 = vshll.u32 %v384_v10, 16  ;;  %v397_v13 = vld [vmem:[%s4975_s22 + $0xb8] sm:$0xf] }
  0x3e   : > { %824 = vrot.lane.b32.xlu1 %v641_v15, %s4917_s23  ;;  %v688_v31 = vrot.slane %v686_v22, 5  ;;  %v669_v32 = vrot.slane %v667_v23, 4  ;;  %v700_v33 = vshll.u32 %v388_v19, 16  ;;  %v704_v34 = vshrl.u32 %v388_v19, 16  ;;  %v398_v22 = vld [vmem:[%s4975_s22 + $0xbc] sm:$0x1] }
  0x3f   : > { %822 = vrot.lane.b32.xlu0 %v631_v20, %s4917_s23  ;;  %v665_v35 = vsel %vm4986_vm2, %v660_v25, %v664_v12  ;;  %v650_v36 = vrot.slane %v649_v26, 4  ;;  %v683_v37 = vor.u32 %v682_v28, %v678_v21  ;;  %v672_v38 = vrot.slane %v670_v29, 5  ;;  %v396_v23 = vld [vmem:[%s4975_s22 + $0xb4] sm:$0xf] }
  0x40   : > { %v702_v40 = vrot.slane %v700_v33, 5  ;;  %v706_v41 = vrot.slane %v704_v34, 4  ;;  %v710_v42 = vshll.u32 %v389_v24, 16  ;;  %v691_v43 = vshrl.u32 %v387_v30, 16 }
  0x41   : > { %v655_v44 = vsel %vm4986_vm2, %v650_v36, %v654_v2  ;;  %v684_v45 = vrot.slane %v683_v37, 4  ;;  %v673_v46 = vor.u32 %v672_v38, %v669_v32  ;;  %v694_v47 = vshll.u32 %v387_v30, 16  ;;  %v916_v37 = vld [vmem:[%s4975_s22 + $0x4] sm:$0xf] }
  0x42   : > { %828 = vrot.lane.b32.xlu1 %v665_v35, %s4917_s23  ;;  %v707_v50 = vor.u32 %v706_v41, %v702_v40  ;;  %v712_v51 = vrot.slane %v710_v42, 5  ;;  %v693_v52 = vrot.slane %v691_v43, 4  ;;  %v724_v53 = vshll.u32 %v391_v39, 16 }
  0x43   : > { %826 = vrot.lane.b32.xlu0 %v655_v44, %s4917_s23  ;;  %v689_v54 = vsel %vm4986_vm2, %v684_v45, %v688_v31  ;;  %v674_v55 = vrot.slane %v673_v46, 4  ;;  %v696_v56 = vrot.slane %v694_v47, 5  ;;  %v728_v57 = vshrl.u32 %v391_v39, 16 }
  0x44   : > { %v708_v59 = vrot.slane %v707_v50, 4  ;;  %v726_v60 = vrot.slane %v724_v53, 5  ;;  %v734_v61 = vshll.u32 %v392_v48, 16  ;;  %v715_v62 = vshrl.u32 %v390_v49, 16  ;;  %v917_v48 = vld [vmem:[%s4975_s22 + $0x8] sm:$0x1] }
  0x45   : > { %v679_v63 = vsel %vm4986_vm2, %v674_v55, %v678_v21  ;;  %v697_v0 = vor.u32 %v696_v56, %v693_v52  ;;  %v730_v1 = vrot.slane %v728_v57, 4  ;;  %v718_v2 = vshll.u32 %v390_v49, 16  ;;  %v288_v56 = vld [vmem:[%s4975_s22 + $0xc] sm:$0xf] }
  0x46   : > { %832 = vrot.lane.b32.xlu1 %v689_v54, %s4917_s23  ;;  %v713_v5 = vsel %vm4986_vm2, %v708_v59, %v712_v51  ;;  %v736_v6 = vrot.slane %v734_v61, 5  ;;  %v717_v7 = vrot.slane %v715_v62, 4  ;;  %v748_v8 = vshll.u32 %v394_v58, 16  ;;  %v919_v51 = vld [vmem:[%s4975_s22 + $0x10] sm:$0xf] }
  0x47   : > { %830 = vrot.lane.b32.xlu0 %v679_v63, %s4917_s23  ;;  %v698_v9 = vrot.slane %v697_v0, 4  ;;  %v731_v10 = vor.u32 %v730_v1, %v726_v60  ;;  %v720_v11 = vrot.slane %v718_v2, 5  ;;  %v752_v12 = vshrl.u32 %v394_v58, 16  ;;  %v915_v54 = vld [vmem:[%s4975_s22] sm:$0xe] }
  0x48   : > { %v750_v14 = vrot.slane %v748_v8, 5  ;;  %v758_v15 = vshll.u32 %v395_v3, 16  ;;  %v739_v16 = vshrl.u32 %v393_v4, 16  ;;  %v742_v17 = vshll.u32 %v393_v4, 16  ;;  %321 = vst.msk [vmem:[#allocation2 + $0x8] sm:$0xf] %vm318_vm3, %v288_v56 }
  0x49   : > { %v703_v18 = vsel %vm4986_vm2, %v698_v9, %v702_v40  ;;  %v732_v19 = vrot.slane %v731_v10, 4  ;;  %v721_v20 = vor.u32 %v720_v11, %v717_v7  ;;  %v754_v21 = vrot.slane %v752_v12, 4  ;;  %v286_v61 = vld [vmem:[%s4975_s22] sm:$0xf]  ;;  %v920_v0 = vld [vmem:[%s4975_s22 + $0x14] sm:$0x1] }
  0x4a   : > { %836 = vrot.lane.b32.xlu1 %v713_v5, %s4917_s23  ;;  %v760_v24 = vrot.slane %v758_v15, 5  ;;  %v741_v25 = vrot.slane %v739_v16, 4  ;;  %v744_v26 = vrot.slane %v742_v17, 5  ;;  %v772_v28 = vshll.u32 %v397_v13, 16  ;;  %v922_v1 = vld [vmem:[%s4975_s22 + $0x1c] sm:$0xf] }
  0x4b   : > { %834 = vrot.lane.b32.xlu0 %v703_v18, %s4917_s23  ;;  %v737_v29 = vsel %vm4986_vm2, %v732_v19, %v736_v6  ;;  %v722_v30 = vrot.slane %v721_v20, 4  ;;  %v755_v31 = vor.u32 %v754_v21, %v750_v14  ;;  %v776_v32 = vshrl.u32 %v397_v13, 16  ;;  %319 = vst.msk [vmem:[#allocation2] sm:$0xf] %vm318_vm3, %v286_v61  ;;  %v918_v3 = vld [vmem:[%s4975_s22 + $0xc] sm:$0xe] }
  0x4c   : > { %v745_v33 = vor.u32 %v744_v26, %v741_v25  ;;  %v774_v34 = vrot.slane %v772_v28, 5  ;;  %v782_v35 = vshll.u32 %v398_v22, 16  ;;  %v763_v36 = vshrl.u32 %v396_v23, 16  ;;  %v289_v4 = vld [vmem:[%s4975_s22 + $0x10] sm:$0xf] }
  0x4d   : > { %v727_v38 = vsel %vm4986_vm2, %v722_v30, %v726_v60  ;;  %v756_v39 = vrot.slane %v755_v31, 4  ;;  %v778_v40 = vrot.slane %v776_v32, 4  ;;  %v766_v41 = vshll.u32 %v396_v23, 16  ;;  %v287_v5 = vld [vmem:[%s4975_s22 + $0x4] sm:$0xf] }
  0x4e   : > { %840 = vrot.lane.b32.xlu1 %v737_v29, %s4917_s23  ;;  %v746_v42 = vrot.slane %v745_v33, 4  ;;  %v784_v43 = vrot.slane %v782_v35, 5  ;;  %v765_v44 = vrot.slane %v763_v36, 4  ;;  %v1016_v49 = vrot.slane %v916_v37, 5  ;;  %322 = vst.msk [vmem:[#allocation2 + $0xc] sm:$0xf] %vm318_vm3, %v289_v4 }
  0x4f   : > { %838 = vrot.lane.b32.xlu0 %v727_v38, %s4917_s23  ;;  %v761_v45 = vsel %vm4986_vm2, %v756_v39, %v760_v24  ;;  %v779_v46 = vor.u32 %v778_v40, %v774_v34  ;;  %v768_v47 = vrot.slane %v766_v41, 5  ;;  %v1019_v55 = vrot.slane %v917_v48, 5  ;;  %320 = vst.msk [vmem:[#allocation2 + $0x4] sm:$0xf] %vm318_vm3, %v287_v5  ;;  %v923_v12 = vld [vmem:[%s4975_s22 + $0x20] sm:$0x1] }
  0x50   : > { %v751_v50 = vsel %vm4986_vm2, %v746_v42, %v750_v14  ;;  %v1018_v59 = vrot.slane %v1016_v49, 4  ;;  %v1023_v60 = vrot.slane %v919_v51, 5  ;;  %v4260_v63 = vrot.slane %v915_v54, 9  ;;  %v925_v13 = vld [vmem:[%s4975_s22 + $0x28] sm:$0xf] }
  0x51   : > { %v780_v52 = vrot.slane %v779_v46, 4  ;;  %v769_v53 = vor.u32 %v768_v47, %v765_v44  ;;  %v1026_v8 = vrot.slane %v920_v0, 5  ;;  %v1030_v9 = vrot.slane %v922_v1, 5  ;;  %v921_v14 = vld [vmem:[%s4975_s22 + $0x18] sm:$0xe] }
  0x52   : > { %844 = vrot.lane.b32.xlu1 %v761_v45, %s4917_s23  ;;  %v1020_v6 = vsel %vm5130_vm6, %v1018_v59, %v1019_v55  ;;  %v1025_v7 = vrot.slane %v1023_v60, 4  ;;  %v1017_v10 = vsel %vm5130_vm6, %v4260_v63, %v1016_v49  ;;  %v4261_v11 = vrot.slane %v918_v3, 9  ;;  %v291_v15 = vld [vmem:[%s4975_s22 + $0x1c] sm:$0xf]  ;;  %v290_v16 = vld [vmem:[%s4975_s22 + $0x18] sm:$0xf] }
  0x53   : > { %842 = vrot.lane.b32.xlu0 %v751_v50, %s4917_s23  ;;  %v785_v57 = vsel %vm4986_vm2, %v780_v52, %v784_v43  ;;  %v770_v58 = vrot.slane %v769_v53, 4  ;;  %324 = vst.msk [vmem:[#allocation2 + $0x14] sm:$0xf] %vm318_vm3, %v291_v15  ;;  %v1032_v18 = vrot.slane %v1030_v9, 4  ;;  %v1033_v19 = vrot.slane %v923_v12, 5 }
  0x54   : > { %v1027_v17 = vsel %vm5130_vm6, %v1025_v7, %v1026_v8  ;;  %v1037_v20 = vrot.slane %v925_v13, 5  ;;  %323 = vst.msk [vmem:[#allocation2 + $0x10] sm:$0xf] %vm318_vm3, %v290_v16  ;;  %v1024_v21 = vsel %vm5130_vm6, %v4261_v11, %v1023_v60  ;;  %v4262_v22 = vrot.slane %v921_v14, 9  ;;  %v926_v23 = vld [vmem:[%s4975_s22 + $0x2c] sm:$0x1] }
  0x55   : > { %v775_v2 = vsel %vm4986_vm2, %v770_v58, %v774_v34  ;;  %v928_v24 = vld [vmem:[%s4975_s22 + $0x34] sm:$0xf]  ;;  %v924_v25 = vld [vmem:[%s4975_s22 + $0x24] sm:$0xe]  ;;  %v293_v26 = vld [vmem:[%s4975_s22 + $0x28] sm:$0xf]  ;;  %v1034_v29 = vsel %vm5130_vm6, %v1032_v18, %v1033_v19 }
  0x56   : > { %848 = vrot.lane.b32.xlu1 %v785_v57, %s4917_s23  ;;  %326 = vst.msk [vmem:[#allocation2 + $0x1c] sm:$0xf] %vm318_vm3, %v293_v26  ;;  %v292_v28 = vld [vmem:[%s4975_s22 + $0x24] sm:$0xf]  ;;  %v1039_v30 = vrot.slane %v1037_v20, 4  ;;  %v1040_v31 = vrot.slane %v926_v23, 5  ;;  %v1031_v34 = vsel %vm5130_vm6, %v4262_v22, %v1030_v9 }
  0x57   : > { %846 = vrot.lane.b32.xlu0 %v775_v2, %s4917_s23  ;;  %v929_v32 = vld [vmem:[%s4975_s22 + $0x38] sm:$0x1]  ;;  %v1044_v33 = vrot.slane %v928_v24, 5  ;;  %325 = vst.msk [vmem:[#allocation2 + $0x18] sm:$0xf] %vm318_vm3, %v292_v28  ;;  %v4263_v35 = vrot.slane %v924_v25, 9 }
  0x58   : > { %v931_v36 = vld [vmem:[%s4975_s22 + $0x40] sm:$0xf]  ;;  %v295_v37 = vld [vmem:[%s4975_s22 + $0x34] sm:$0xf]  ;;  %v927_v38 = vld [vmem:[%s4975_s22 + $0x30] sm:$0xe]  ;;  %v1041_v41 = vsel %vm5130_vm6, %v1039_v30, %v1040_v31 }
  0x59   : > { %328 = vst.msk [vmem:[#allocation2 + $0x24] sm:$0xf] %vm318_vm3, %v295_v37  ;;  %v294_v39 = vld [vmem:[%s4975_s22 + $0x30] sm:$0xf]  ;;  %v932_v40 = vld [vmem:[%s4975_s22 + $0x44] sm:$0x1]  ;;  %v1038_v46 = vsel %vm5130_vm6, %v4263_v35, %v1037_v20 }
  0x5a   : > { %1128 = vrot.lane.b32.xlu1 %v1020_v6, %s4918_s24  ;;  %327 = vst.msk [vmem:[#allocation2 + $0x20] sm:$0xf] %vm318_vm3, %v294_v39  ;;  %v1046_v42 = vrot.slane %v1044_v33, 4  ;;  %v1047_v43 = vrot.slane %v929_v32, 5  ;;  %v1051_v44 = vrot.slane %v931_v36, 5  ;;  %v4264_v47 = vrot.slane %v927_v38, 9 }
  0x5b   : > { %1126 = vrot.lane.b32.xlu0 %v1017_v10, %s4918_s24  ;;  %v297_v45 = vld [vmem:[%s4975_s22 + $0x40] sm:$0xf]  ;;  %v934_v48 = vld [vmem:[%s4975_s22 + $0x4c] sm:$0xf]  ;;  %v296_v49 = vld [vmem:[%s4975_s22 + $0x3c] sm:$0xf] }
  0x5c   : > { %330 = vst.msk [vmem:[#allocation2 + $0x2c] sm:$0xf] %vm318_vm3, %v297_v45  ;;  %v930_v50 = vld [vmem:[%s4975_s22 + $0x3c] sm:$0xe]  ;;  %329 = vst.msk [vmem:[#allocation2 + $0x28] sm:$0xf] %vm318_vm3, %v296_v49  ;;  %v1048_v53 = vsel %vm5130_vm6, %v1046_v42, %v1047_v43  ;;  %v1045_v58 = vsel %vm5130_vm6, %v4264_v47, %v1044_v33 }
  0x5d   : > { %v935_v51 = vld [vmem:[%s4975_s22 + $0x50] sm:$0x1]  ;;  %v299_v52 = vld [vmem:[%s4975_s22 + $0x4c] sm:$0xf]  ;;  %v1053_v54 = vrot.slane %v1051_v44, 4  ;;  %v1054_v55 = vrot.slane %v932_v40, 5 }
  0x5e   : > { %1132 = vrot.lane.b32.xlu1 %v1027_v17, %s4918_s24  ;;  %v1058_v56 = vrot.slane %v934_v48, 5  ;;  %332 = vst.msk [vmem:[#allocation2 + $0x34] sm:$0xf] %vm318_vm3, %v299_v52  ;;  %v298_v57 = vld [vmem:[%s4975_s22 + $0x48] sm:$0xf]  ;;  %v4265_v59 = vrot.slane %v930_v50, 9 }
  0x5f   : > { %1130 = vrot.lane.b32.xlu0 %v1024_v21, %s4918_s24  ;;  %v937_v60 = vld [vmem:[%s4975_s22 + $0x58] sm:$0xf]  ;;  %331 = vst.msk [vmem:[#allocation2 + $0x30] sm:$0xf] %vm318_vm3, %v298_v57  ;;  %v933_v63 = vld [vmem:[%s4975_s22 + $0x48] sm:$0xe]  ;;  %v1055_v5 = vsel %vm5130_vm6, %v1053_v54, %v1054_v55 }
  0x60   : > { %v301_v61 = vld [vmem:[%s4975_s22 + $0x58] sm:$0xf]  ;;  %v300_v0 = vld [vmem:[%s4975_s22 + $0x54] sm:$0xf]  ;;  %v1061_v1 = vrot.slane %v935_v51, 5  ;;  %v1060_v6 = vrot.slane %v1058_v56, 4  ;;  %v1052_v10 = vsel %vm5130_vm6, %v4265_v59, %v1051_v44 }
  0x61   : > { %334 = vst.msk [vmem:[#allocation2 + $0x3c] sm:$0xf] %vm318_vm3, %v301_v61  ;;  %v938_v2 = vld [vmem:[%s4975_s22 + $0x5c] sm:$0x1]  ;;  %333 = vst.msk [vmem:[#allocation2 + $0x38] sm:$0xf] %vm318_vm3, %v300_v0 }
  0x62   : > { %1136 = vrot.lane.b32.xlu1 %v1034_v29, %s4918_s24  ;;  %v303_v3 = vld [vmem:[%s4975_s22 + $0x64] sm:$0xf]  ;;  %v302_v4 = vld [vmem:[%s4975_s22 + $0x60] sm:$0xf]  ;;  %v1065_v7 = vrot.slane %v937_v60, 5  ;;  %v4266_v11 = vrot.slane %v933_v63, 9  ;;  %v1062_v19 = vsel %vm5130_vm6, %v1060_v6, %v1061_v1 }
  0x63   : > { %1134 = vrot.lane.b32.xlu0 %v1031_v34, %s4918_s24  ;;  %336 = vst.msk [vmem:[#allocation2 + $0x44] sm:$0xf] %vm318_vm3, %v303_v3  ;;  %335 = vst.msk [vmem:[#allocation2 + $0x40] sm:$0xf] %vm318_vm3, %v302_v4  ;;  %v305_v8 = vld [vmem:[%s4975_s22 + $0x70] sm:$0xf] }
  0x64   : > { %v304_v9 = vld [vmem:[%s4975_s22 + $0x6c] sm:$0xf]  ;;  %v940_v12 = vld [vmem:[%s4975_s22 + $0x64] sm:$0xf]  ;;  %338 = vst.msk [vmem:[#allocation2 + $0x4c] sm:$0xf] %vm318_vm3, %v305_v8  ;;  %v1059_v24 = vsel %vm5130_vm6, %v4266_v11, %v1058_v56 }
  0x65   : > { %337 = vst.msk [vmem:[#allocation2 + $0x48] sm:$0xf] %vm318_vm3, %v304_v9  ;;  %v307_v13 = vld [vmem:[%s4975_s22 + $0x7c] sm:$0xf]  ;;  %v936_v14 = vld [vmem:[%s4975_s22 + $0x54] sm:$0xe] }
  0x66   : > { %1140 = vrot.lane.b32.xlu1 %v1041_v41, %s4918_s24  ;;  %340 = vst.msk [vmem:[#allocation2 + $0x54] sm:$0xf] %vm318_vm3, %v307_v13  ;;  %v306_v15 = vld [vmem:[%s4975_s22 + $0x78] sm:$0xf]  ;;  %v941_v16 = vld [vmem:[%s4975_s22 + $0x68] sm:$0x1] }
  0x67   : > { %1138 = vrot.lane.b32.xlu0 %v1038_v46, %s4918_s24  ;;  %339 = vst.msk [vmem:[#allocation2 + $0x50] sm:$0xf] %vm318_vm3, %v306_v15  ;;  %v309_v17 = vld [vmem:[%s4975_s22 + $0x88] sm:$0xf]  ;;  %v308_v18 = vld [vmem:[%s4975_s22 + $0x84] sm:$0xf] }
  0x68   : > { %v1067_v20 = vrot.slane %v1065_v7, 4  ;;  %v1068_v21 = vrot.slane %v938_v2, 5  ;;  %v1072_v22 = vrot.slane %v940_v12, 5  ;;  %v943_v23 = vld [vmem:[%s4975_s22 + $0x70] sm:$0xf]  ;;  %v4267_v25 = vrot.slane %v936_v14, 9 }
  0x69   : > { %342 = vst.msk [vmem:[#allocation2 + $0x5c] sm:$0xf] %vm318_vm3, %v309_v17  ;;  %341 = vst.msk [vmem:[#allocation2 + $0x58] sm:$0xf] %vm318_vm3, %v308_v18  ;;  %v311_v26 = vld [vmem:[%s4975_s22 + $0x94] sm:$0xf] }
  0x6a   : > { %1144 = vrot.lane.b32.xlu1 %v1048_v53, %s4918_s24  ;;  %v310_v28 = vld [vmem:[%s4975_s22 + $0x90] sm:$0xf]  ;;  %v939_v29 = vld [vmem:[%s4975_s22 + $0x60] sm:$0xe]  ;;  %344 = vst.msk [vmem:[#allocation2 + $0x64] sm:$0xf] %vm318_vm3, %v311_v26  ;;  %v1069_v31 = vsel %vm5130_vm6, %v1067_v20, %v1068_v21  ;;  %v1066_v36 = vsel %vm5130_vm6, %v4267_v25, %v1065_v7 }
  0x6b   : > { %1142 = vrot.lane.b32.xlu0 %v1045_v58, %s4918_s24  ;;  %343 = vst.msk [vmem:[#allocation2 + $0x60] sm:$0xf] %vm318_vm3, %v310_v28  ;;  %v944_v30 = vld [vmem:[%s4975_s22 + $0x74] sm:$0x1]  ;;  %v1074_v32 = vrot.slane %v1072_v22, 4  ;;  %v1075_v33 = vrot.slane %v941_v16, 5 }
  0x6c   : > { %v1079_v34 = vrot.slane %v943_v23, 5  ;;  %v313_v35 = vld [vmem:[%s4975_s22 + $0xa0] sm:$0xf]  ;;  %v4268_v37 = vrot.slane %v939_v29, 9  ;;  %v946_v38 = vld [vmem:[%s4975_s22 + $0x7c] sm:$0xf] }
  0x6d   : > { %346 = vst.msk [vmem:[#allocation2 + $0x6c] sm:$0xf] %vm318_vm3, %v313_v35  ;;  %v312_v39 = vld [vmem:[%s4975_s22 + $0x9c] sm:$0xf]  ;;  %v942_v40 = vld [vmem:[%s4975_s22 + $0x6c] sm:$0xe]  ;;  %v1076_v42 = vsel %vm5130_vm6, %v1074_v32, %v1075_v33 }
  0x6e   : > { %1148 = vrot.lane.b32.xlu1 %v1055_v5, %s4918_s24  ;;  %345 = vst.msk [vmem:[#allocation2 + $0x68] sm:$0xf] %vm318_vm3, %v312_v39  ;;  %v1082_v41 = vrot.slane %v944_v30, 5  ;;  %v1081_v43 = vrot.slane %v1079_v34, 4  ;;  %v1086_v44 = vrot.slane %v946_v38, 5  ;;  %v1073_v47 = vsel %vm5130_vm6, %v4268_v37, %v1072_v22 }
  0x6f   : > { %1146 = vrot.lane.b32.xlu0 %v1052_v10, %s4918_s24  ;;  %v315_v45 = vld [vmem:[%s4975_s22 + $0xac] sm:$0xf]  ;;  %v314_v46 = vld [vmem:[%s4975_s22 + $0xa8] sm:$0xf]  ;;  %v4269_v48 = vrot.slane %v942_v40, 9 }
  0x70   : > { %v947_v49 = vld [vmem:[%s4975_s22 + $0x80] sm:$0x1]  ;;  %v949_v50 = vld [vmem:[%s4975_s22 + $0x88] sm:$0xf]  ;;  %348 = vst.msk [vmem:[#allocation2 + $0x74] sm:$0xf] %vm318_vm3, %v315_v45  ;;  %v1083_v54 = vsel %vm5130_vm6, %v1081_v43, %v1082_v41 }
  0x71   : > { %347 = vst.msk [vmem:[#allocation2 + $0x70] sm:$0xf] %vm318_vm3, %v314_v46  ;;  %v945_v51 = vld [vmem:[%s4975_s22 + $0x78] sm:$0xe]  ;;  %v316_v53 = vld [vmem:[%s4975_s22 + $0xb4] sm:$0xf]  ;;  %v1080_v58 = vsel %vm5130_vm6, %v4269_v48, %v1079_v34 }
  0x72   : > { %1152 = vrot.lane.b32.xlu1 %v1062_v19, %s4918_s24  ;;  %v317_v52 = vld [vmem:[%s4975_s22 + $0xb8] sm:$0xf]  ;;  %v1088_v55 = vrot.slane %v1086_v44, 4  ;;  %v1089_v56 = vrot.slane %v947_v49, 5  ;;  %v1093_v57 = vrot.slane %v949_v50, 5  ;;  %v4270_v59 = vrot.slane %v945_v51, 9 }
  0x73   : > { %1150 = vrot.lane.b32.xlu0 %v1059_v24, %s4918_s24  ;;  %350 = vst.msk [vmem:[#allocation2 + $0x7c] sm:$0xf] %vm318_vm3, %v317_v52  ;;  %349 = vst.msk [vmem:[#allocation2 + $0x78] sm:$0xf] %vm318_vm3, %v316_v53  ;;  %v950_v60 = vld [vmem:[%s4975_s22 + $0x8c] sm:$0x1] }
  0x74   : > { %v952_v61 = vld [vmem:[%s4975_s22 + $0x94] sm:$0xf]  ;;  %v948_v63 = vld [vmem:[%s4975_s22 + $0x84] sm:$0xe]  ;;  %v1090_v0 = vsel %vm5130_vm6, %v1088_v55, %v1089_v56  ;;  %v1095_v1 = vrot.slane %v1093_v57, 4  ;;  %v1096_v2 = vrot.slane %v950_v60, 5  ;;  %v1087_v4 = vsel %vm5130_vm6, %v4270_v59, %v1086_v44 }
  0x75   : > { %v1100_v3 = vrot.slane %v952_v61, 5  ;;  %v4271_v5 = vrot.slane %v948_v63, 9  ;;  %v953_v6 = vld [vmem:[%s4975_s22 + $0x98] sm:$0x1]  ;;  %v955_v7 = vld [vmem:[%s4975_s22 + $0xa0] sm:$0xf] }
  0x76   : > { %1156 = vrot.lane.b32.xlu1 %v1069_v31, %s4918_s24  ;;  %v951_v8 = vld [vmem:[%s4975_s22 + $0x90] sm:$0xe]  ;;  %v1097_v9 = vsel %vm5130_vm6, %v1095_v1, %v1096_v2  ;;  %v1103_v11 = vrot.slane %v953_v6, 5  ;;  %v1107_v12 = vrot.slane %v955_v7, 5  ;;  %v956_v15 = vld [vmem:[%s4975_s22 + $0xa4] sm:$0x1] }
  0x77   : > { %1154 = vrot.lane.b32.xlu0 %v1066_v36, %s4918_s24  ;;  %v1102_v10 = vrot.slane %v1100_v3, 4  ;;  %v1094_v13 = vsel %vm5130_vm6, %v4271_v5, %v1093_v57  ;;  %v4272_v14 = vrot.slane %v951_v8, 9  ;;  %v958_v16 = vld [vmem:[%s4975_s22 + $0xac] sm:$0xf]  ;;  %v954_v17 = vld [vmem:[%s4975_s22 + $0x9c] sm:$0xe] }
  0x78   : > { %v1109_v19 = vrot.slane %v1107_v12, 4  ;;  %v1110_v20 = vrot.slane %v956_v15, 5  ;;  %v1114_v21 = vrot.slane %v958_v16, 5  ;;  %v4273_v23 = vrot.slane %v954_v17, 9  ;;  %v959_v24 = vld [vmem:[%s4975_s22 + $0xb0] sm:$0x1] }
  0x79   : > { %v1104_v18 = vsel %vm5130_vm6, %v1102_v10, %v1103_v11  ;;  %v1101_v22 = vsel %vm5130_vm6, %v4272_v14, %v1100_v3  ;;  %v961_v25 = vld [vmem:[%s4975_s22 + $0xb8] sm:$0xf]  ;;  %v957_v26 = vld [vmem:[%s4975_s22 + $0xa8] sm:$0xe]  ;;  %v1117_v30 = vrot.slane %v959_v24, 5 }
  0x7a   : > { %1160 = vrot.lane.b32.xlu1 %v1076_v42, %s4918_s24  ;;  %v1111_v28 = vsel %vm5130_vm6, %v1109_v19, %v1110_v20  ;;  %v1116_v29 = vrot.slane %v1114_v21, 4  ;;  %v1121_v31 = vrot.slane %v961_v25, 5  ;;  %v1108_v33 = vsel %vm5130_vm6, %v4273_v23, %v1107_v12  ;;  %v962_v35 = vld [vmem:[%s4975_s22 + $0xbc] sm:$0x1]  ;;  %v960_v37 = vld [vmem:[%s4975_s22 + $0xb4] sm:$0xe] }
  0x7b   : > { %1158 = vrot.lane.b32.xlu0 %v1073_v47, %s4918_s24  ;;  %v4274_v34 = vrot.slane %v957_v26, 9  ;;  %v1124_v40 = vrot.slane %v962_v35, 5  ;;  %v4275_v43 = vrot.slane %v960_v37, 9  ;;  %v4277_v49 = vld [vmem:[%s4975_s22 + $0x10] sm:$0xf] }
  0x7c   : > { %v1118_v38 = vsel %vm5130_vm6, %v1116_v29, %v1117_v30  ;;  %v1123_v39 = vrot.slane %v1121_v31, 4  ;;  %v4276_v51 = vld [vmem:[%s4975_s22 + $0xc] sm:$0xf]  ;;  %v4279_v53 = vld [vmem:[%s4975_s22 + $0x1c] sm:$0xf] }
  0x7d   : > { %v1115_v42 = vsel %vm5130_vm6, %v4274_v34, %v1114_v21  ;;  %v1122_v47 = vsel %vm5130_vm6, %v4275_v43, %v1121_v31  ;;  %v4278_v55 = vld [vmem:[%s4975_s22 + $0x18] sm:$0xf]  ;;  %v4281_v57 = vld [vmem:[%s4975_s22 + $0x28] sm:$0xf]  ;;  %v4280_v59 = vld [vmem:[%s4975_s22 + $0x24] sm:$0xf] }
  0x7e   : > { %1164 = vrot.lane.b32.xlu1 %v1083_v54, %s4918_s24  ;;  %v1125_v45 = vsel %vm5130_vm6, %v1123_v39, %v1124_v40  ;;  %v4283_v61 = vld [vmem:[%s4975_s22 + $0x34] sm:$0xf]  ;;  %v4308_v1 = vld [vmem:[%s4975_s22 + $0xc] sm:$0xf]  ;;  %v4285_v3 = vld [vmem:[%s4975_s22 + $0x40] sm:$0xf] }
  0x7f   : > { %1162 = vrot.lane.b32.xlu0 %v1080_v58, %s4918_s24  ;;  %v1504_v5 = vshll.u32 %v4308_v1, 16  ;;  %v4284_v7 = vld [vmem:[%s4975_s22 + $0x3c] sm:$0xf]  ;;  %v4311_v8 = vld [vmem:[%s4975_s22 + $0x18] sm:$0xf] }
  0x80   : > { %v4309_v10 = vld [vmem:[%s4975_s22 + $0x10] sm:$0xf]  ;;  %v4287_v11 = vld [vmem:[%s4975_s22 + $0x4c] sm:$0xf]  ;;  %v1525_v14 = vshrl.u32 %v4311_v8, 16  ;;  %v1528_v15 = vshll.u32 %v4311_v8, 16 }
  0x81   : > { %v4286_v17 = vld [vmem:[%s4975_s22 + $0x48] sm:$0xf]  ;;  %v1514_v19 = vshrl.u32 %v4309_v10, 16  ;;  %v4312_v21 = vld [vmem:[%s4975_s22 + $0x1c] sm:$0xf] }
  0x82   : > { %1168 = vrot.lane.b32.xlu1 %v1090_v0, %s4918_s24  ;;  %v4282_v0 = vld [vmem:[%s4975_s22 + $0x30] sm:$0xf]  ;;  %v1527_v24 = vrot.slane %v1525_v14, 4  ;;  %v1530_v25 = vrot.slane %v1528_v15, 5  ;;  %v1534_v30 = vshll.u32 %v4312_v21, 16  ;;  %v1538_v31 = vshrl.u32 %v4312_v21, 16 }
  0x83   : > { %1166 = vrot.lane.b32.xlu0 %v1087_v4, %s4918_s24  ;;  %v1501_v4 = vshrl.u32 %v4308_v1, 16  ;;  %v4310_v34 = vld [vmem:[%s4975_s22 + $0x14] sm:$0x1]  ;;  %v4291_v35 = vld [vmem:[%s4975_s22 + $0x64] sm:$0xf] }
  0x84   : > { %v1531_v37 = vor.u32 %v1530_v25, %v1527_v24  ;;  %v4290_v39 = vld [vmem:[%s4975_s22 + $0x60] sm:$0xf]  ;;  %v1536_v40 = vrot.slane %v1534_v30, 5  ;;  %v1540_v43 = vrot.slane %v1538_v31, 4  ;;  %v4456_v25 = vld [vmem:[%s4975_s22 + $0x28] sm:$0xf] }
  0x85   : > { %v1503_v12 = vrot.slane %v1501_v4, 4 }
  0x86   : > { %1172 = vrot.lane.b32.xlu1 %v1097_v9, %s4918_s24 }
  0x87   : > { %1170 = vrot.lane.b32.xlu0 %v1094_v13, %s4918_s24  ;;  %v1506_v13 = vrot.slane %v1504_v5, 5  ;;  %v4358_v5 = vld [vmem:[%s4975_s22 + $0x14] sm:$0x1] }
  0x88   : > { %v2114_v15 = vrot.slane %v4358_v5, 5 }
  0x89   : > { %v1507_v23 = vor.u32 %v1506_v13, %v1503_v12 }
  0x8a   : > { %1176 = vrot.lane.b32.xlu1 %v1104_v18, %s4918_s24  ;;  %v1510_v18 = vshll.u32 %v4309_v10, 16 }
  0x8b   : > { %1174 = vrot.lane.b32.xlu0 %v1101_v22, %s4918_s24  ;;  %v4289_v22 = vld [vmem:[%s4975_s22 + $0x58] sm:$0xf] }
  0x8c   : > { %v791_v32 = vpop.permute.xlu1 %790  ;;  %v1512_v29 = vrot.slane %v1510_v18, 5  ;;  %v4453_v18 = vld [vmem:[%s4975_s22 + $0x1c] sm:$0xf] }
  0x8d   : > { %885 = vst.msk [vmem:[#allocation2 + $0x8] sm:$0xf] %vm882_vm7, %v791_v32  ;;  %v787_v36 = vpop.permute.xlu0 %786  ;;  %v1516_v32 = vrot.slane %v1514_v19, 4  ;;  %v2605_v30 = vshll.u32 %v4453_v18, 16  ;;  %v2609_v31 = vshrl.u32 %v4453_v18, 16 }
  0x8e   : > { %883 = vst.msk [vmem:[#allocation2] sm:$0xf] %vm882_vm7, %v787_v36  ;;  %1180 = vrot.lane.b32.xlu1 %v1111_v28, %s4918_s24  ;;  %v4288_v28 = vld [vmem:[%s4975_s22 + $0x54] sm:$0xf]  ;;  %v1508_v36 = vrot.slane %v1507_v23, 4 }
  0x8f   : > { %1178 = vrot.lane.b32.xlu0 %v1108_v33, %s4918_s24  ;;  %v4503_v18 = vld [vmem:[%s4975_s22 + $0x24] sm:$0xe] }
  0x90   : > { %v793_v41 = vpop.permute.xlu1 %792 }
  0x91   : > { %886 = vst.msk [vmem:[#allocation2 + $0xc] sm:$0xf] %vm882_vm7, %v793_v41  ;;  %v789_v44 = vpop.permute.xlu0 %788  ;;  %v1517_v41 = vor.u32 %v1516_v32, %v1512_v29 }
  0x92   : > { %884 = vst.msk [vmem:[#allocation2 + $0x4] sm:$0xf] %vm882_vm7, %v789_v44  ;;  %1184 = vrot.lane.b32.xlu1 %v1118_v38, %s4918_s24 }
  0x93   : > { %1182 = vrot.lane.b32.xlu0 %v1115_v42, %s4918_s24  ;;  %v1520_v42 = vshll.u32 %v4310_v34, 16 }
  0x94   : > { %v797_v46 = vpop.permute.xlu1 %796 }
  0x95   : > { %888 = vst.msk [vmem:[#allocation2 + $0x14] sm:$0xf] %vm882_vm7, %v797_v46  ;;  %v795_v48 = vpop.permute.xlu0 %794  ;;  %v1513_v46 = vsel %vm4986_vm2, %v1508_v36, %v1512_v29  ;;  %v2633_v36 = vshrl.u32 %v4456_v25, 16 }
  0x96   : > { %887 = vst.msk [vmem:[#allocation2 + $0x10] sm:$0xf] %vm882_vm7, %v795_v48  ;;  %1188 = vrot.lane.b32.xlu1 %v1125_v45, %s4918_s24  ;;  %v4313_v45 = vld [vmem:[%s4975_s22 + $0x20] sm:$0x1]  ;;  %v4356_v48 = vld [vmem:[%s4975_s22 + $0xc] sm:$0xe] }
  0x97   : > { %1186 = vrot.lane.b32.xlu0 %v1122_v47, %s4918_s24  ;;  %v1532_v47 = vrot.slane %v1531_v37, 4  ;;  %v4420_v37 = vld [vmem:[%s4975_s22 + $0x18] sm:$0xf] }
  0x98   : > { %v801_v50 = vpop.permute.xlu1 %800 }
  0x99   : > { %890 = vst.msk [vmem:[#allocation2 + $0x1c] sm:$0xf] %vm882_vm7, %v801_v50  ;;  %v799_v52 = vpop.permute.xlu0 %798 }
  0x9a   : > { %889 = vst.msk [vmem:[#allocation2 + $0x18] sm:$0xf] %vm882_vm7, %v799_v52  ;;  %1325 = vrot.lane.b32.xlu1 %v4277_v49, %s4919_s25  ;;  %v4357_v49 = vld [vmem:[%s4975_s22 + $0x10] sm:$0xf]  ;;  %v1518_v52 = vrot.slane %v1517_v41, 4  ;;  %v2607_v41 = vrot.slane %v2605_v30, 5 }
  0x9b   : > { %1323 = vrot.lane.b32.xlu0 %v4276_v51, %s4919_s25  ;;  %v4292_v51 = vld [vmem:[%s4975_s22 + $0x6c] sm:$0xf] }
  0x9c   : > { %v805_v54 = vpop.permute.xlu1 %804 }
  0x9d   : > { %892 = vst.msk [vmem:[#allocation2 + $0x24] sm:$0xf] %vm882_vm7, %v805_v54  ;;  %v803_v56 = vpop.permute.xlu0 %802  ;;  %v1541_v54 = vor.u32 %v1540_v43, %v1536_v40 }
  0x9e   : > { %891 = vst.msk [vmem:[#allocation2 + $0x20] sm:$0xf] %vm882_vm7, %v803_v56  ;;  %1329 = vrot.lane.b32.xlu1 %v4279_v53, %s4919_s25  ;;  %v1522_v53 = vrot.slane %v1520_v42, 5  ;;  %v2611_v42 = vrot.slane %v2609_v31, 4  ;;  %v4549_v31 = vrot.slane %v4503_v18, 9 }
  0x9f   : > { %1327 = vrot.lane.b32.xlu0 %v4278_v55, %s4919_s25  ;;  %v1544_v55 = vshll.u32 %v4313_v45, 16  ;;  %v4872_v45 = vld [vmem:[%s6412_s1 + $0x20] ss:$0 sps:$4 sm:$0xff]  }
  0xa0   : > { %v809_v58 = vpop.permute.xlu1 %808  ;;  %4836 = vmatprep.subr.msk.bf16.mxu0 %vm3633_vm9, %v4872_v45  ;;  %4837 = vmatprep.subr.msk.bf16.mxu1 %vm3633_vm9, %v4872_v45 }
  0xa1   : > { %894 = vst.msk [vmem:[#allocation2 + $0x2c] sm:$0xf] %vm882_vm7, %v809_v58  ;;  %v807_v60 = vpop.permute.xlu0 %806  ;;  %v2111_v58 = vrot.slane %v4357_v49, 5  ;;  %v1546_v1 = vrot.slane %v1544_v55, 5  ;;  %v4422_v49 = vld [vmem:[%s4975_s22 + $0x24] sm:$0xf]  ;;  %v2612_v55 = vor.u32 %v2611_v42, %v2607_v41 }
  0xa2   : > { %893 = vst.msk [vmem:[#allocation2 + $0x28] sm:$0xf] %vm882_vm7, %v807_v60  ;;  %1333 = vrot.lane.b32.xlu1 %v4281_v57, %s4919_s25  ;;  %v4404_v57 = vrot.slane %v4356_v48, 9  ;;  %v4359_v60 = vld [vmem:[%s4975_s22 + $0x18] sm:$0xe]  ;;  %v2635_v48 = vrot.slane %v2633_v36, 4 }
  0xa3   : > { %1331 = vrot.lane.b32.xlu0 %v4280_v59, %s4919_s25  ;;  %v1537_v59 = vsel %vm4986_vm2, %v1532_v47, %v1536_v40  ;;  %v2113_v14 = vrot.slane %v2111_v58, 4 }
  0xa4   : > { %v813_v63 = vpop.permute.xlu1 %812 }
  0xa5   : > { %896 = vst.msk [vmem:[#allocation2 + $0x34] sm:$0xf] %vm882_vm7, %v813_v63  ;;  %v811_v2 = vpop.permute.xlu0 %810  ;;  %v1523_v63 = vsel %vm4986_vm2, %v1518_v52, %v1522_v53  ;;  %v3635_v52 = vsel %vm3633_vm9, %v4872_v45, 0 }
  0xa6   : > { %895 = vst.msk [vmem:[#allocation2 + $0x30] sm:$0xf] %vm882_vm7, %v811_v2  ;;  %1337 = vrot.lane.b32.xlu1 %v4283_v61, %s4919_s25  ;;  %v4360_v2 = vld [vmem:[%s4975_s22 + $0x1c] sm:$0xf]  ;;  %4785 = vmatpush3.bf16.msra.mxu0 %v3635_v52 }
  0xa7   : > { %1335 = vrot.lane.b32.xlu0 %v4282_v0, %s4919_s25  ;;  %v1542_v0 = vrot.slane %v1541_v54, 4  ;;  %v2118_v8 = vrot.slane %v4360_v2, 5  ;;  %v4421_v54 = vld [vmem:[%s4975_s22 + $0x1c] sm:$0xf]  ;;  %4831 = vmatpush3.bf16.msra.mxu1 %v3635_v52 }
  0xa8   : > { %v817_v6 = vpop.permute.xlu1 %816 }
  0xa9   : > { %898 = vst.msk [vmem:[#allocation2 + $0x3c] sm:$0xf] %vm882_vm7, %v817_v6  ;;  %v815_v9 = vpop.permute.xlu0 %814  ;;  %v2112_v6 = vsel %vm5130_vm6, %v4404_v57, %v2111_v58  ;;  %v1547_v13 = vsel %vm4986_vm2, %v1542_v0, %v1546_v1  ;;  %v4314_v57 = vld [vmem:[%s4975_s22 + $0x24] sm:$0xf] }
  0xaa   : > { %897 = vst.msk [vmem:[#allocation2 + $0x38] sm:$0xf] %vm882_vm7, %v815_v9  ;;  %1341 = vrot.lane.b32.xlu1 %v4285_v3, %s4919_s25  ;;  %v4452_v3 = vld [vmem:[%s4975_s22 + $0x18] sm:$0xf] }
  0xab   : > { %1339 = vrot.lane.b32.xlu0 %v4284_v7, %s4919_s25  ;;  %v4405_v7 = vrot.slane %v4359_v60, 9  ;;  %v2596_v9 = vshrl.u32 %v4452_v3, 16  ;;  %v2599_v10 = vshll.u32 %v4452_v3, 16  ;;  %v1549_v3 = vshrl.u32 %v4314_v57, 16 }
  0xac   : > { %v821_v16 = vpop.permute.xlu1 %820 }
  0xad   : > { %900 = vst.msk [vmem:[#allocation2 + $0x44] sm:$0xf] %vm882_vm7, %v821_v16  ;;  %v819_v20 = vpop.permute.xlu0 %818  ;;  %v2119_v21 = vsel %vm5130_vm6, %v4405_v7, %v2118_v8  ;;  %v2598_v23 = vrot.slane %v2596_v9, 4  ;;  %v2601_v24 = vrot.slane %v2599_v10, 5  ;;  %v2613_v7 = vrot.slane %v2612_v55, 4 }
  0xae   : > { %899 = vst.msk [vmem:[#allocation2 + $0x40] sm:$0xf] %vm882_vm7, %v819_v20  ;;  %1345 = vrot.lane.b32.xlu1 %v4287_v11, %s4919_s25  ;;  %v4455_v11 = vld [vmem:[%s4975_s22 + $0x24] sm:$0xf]  ;;  %v4317_v9 = vld [vmem:[%s4975_s22 + $0x30] sm:$0xf] }
  0xaf   : > { %1343 = vrot.lane.b32.xlu0 %v4286_v17, %s4919_s25  ;;  %v4361_v17 = vld [vmem:[%s4975_s22 + $0x20] sm:$0x1]  ;;  %v2620_v19 = vshrl.u32 %v4455_v11, 16  ;;  %v2623_v20 = vshll.u32 %v4455_v11, 16 }
  0xb0   : > { %v825_v26 = vpop.permute.xlu1 %824  ;;  %v2121_v29 = vrot.slane %v4361_v17, 5 }
  0xb1   : > { %902 = vst.msk [vmem:[#allocation2 + $0x4c] sm:$0xf] %vm882_vm7, %v825_v26  ;;  %v823_v33 = vpop.permute.xlu0 %822  ;;  %v2625_v34 = vrot.slane %v2623_v20, 5  ;;  %v4502_v20 = vld [vmem:[%s4975_s22 + $0x20] sm:$0x1] }
  0xb2   : > { %901 = vst.msk [vmem:[#allocation2 + $0x48] sm:$0xf] %vm882_vm7, %v823_v33  ;;  %1349 = vrot.lane.b32.xlu1 %v4289_v22, %s4919_s25  ;;  %v2120_v22 = vrot.slane %v2118_v8, 4  ;;  %v2622_v33 = vrot.slane %v2620_v19, 4  ;;  %v4504_v19 = vld [vmem:[%s4975_s22 + $0x28] sm:$0xf] }
  0xb3   : > { %1347 = vrot.lane.b32.xlu0 %v4288_v28, %s4919_s25  ;;  %v2115_v28 = vsel %vm5130_vm6, %v2113_v14, %v2114_v15  ;;  %v4874_v14 = vld [vmem:[%s6412_s1 + $0x10] sm:$0xff]  }
  0xb4   : > { %v829_v38 = vpop.permute.xlu1 %828  ;;  %v2122_v40 = vsel %vm5130_vm6, %v2120_v22, %v2121_v29 }
  0xb5   : > { %904 = vst.msk [vmem:[#allocation2 + $0x54] sm:$0xf] %vm882_vm7, %v829_v38  ;;  %v827_v44 = vpop.permute.xlu0 %826  ;;  %v2602_v38 = vor.u32 %v2601_v24, %v2598_v23  ;;  %v1573_v23 = vshrl.u32 %v4317_v9, 16  ;;  %v1576_v24 = vshll.u32 %v4317_v9, 16 }
  0xb6   : > { %903 = vst.msk [vmem:[#allocation2 + $0x50] sm:$0xf] %vm882_vm7, %v827_v44  ;;  %1353 = vrot.lane.b32.xlu1 %v4291_v35, %s4919_s25  ;;  %v2629_v35 = vshll.u32 %v4456_v25, 16  ;;  %v4454_v44 = vld [vmem:[%s4975_s22 + $0x20] sm:$0x1] }
  0xb7   : > { %1351 = vrot.lane.b32.xlu0 %v4290_v39, %s4919_s25 }
  0xb8   : > { %v833_v50 = vpop.permute.xlu1 %832  ;;  %v5450_v47 = vrot.slane %v2629_v35, 5  ;;  %v3213_v35 = vrot.slane %v4504_v19, 5 }
  0xb9   : > { %906 = vst.msk [vmem:[#allocation2 + $0x5c] sm:$0xf] %vm882_vm7, %v833_v50  ;;  %v831_v56 = vpop.permute.xlu0 %830  ;;  %v2603_v50 = vrot.slane %v2602_v38, 4 }
  0xba   : > { %905 = vst.msk [vmem:[#allocation2 + $0x58] sm:$0xf] %vm882_vm7, %v831_v56  ;;  %1884 = vrot.lane.b32.xlu1 %v1513_v46, %s4920_s26  ;;  %v2626_v46 = vor.u32 %v2625_v34, %v2622_v33  ;;  %v2615_v56 = vshll.u32 %v4454_v44, 16  ;;  %v2636_v0 = vor.u32 %v2635_v48, %v5450_v47  ;;  %v4875_v33 = vld [vmem:[%s6412_s1 + $0x8] sm:$0xff]  }
  0xbb   : > { %1355 = vrot.lane.b32.xlu0 %v4292_v51, %s4919_s25  ;;  %v4457_v51 = vld [vmem:[%s4975_s22 + $0x2c] sm:$0x1]  ;;  %v2608_v2 = vsel %vm4986_vm2, %v2603_v50, %v2607_v41  ;;  %v1578_v41 = vrot.slane %v1576_v24, 5  ;;  %v4876_v50 = vld [vmem:[%s6412_s1] sm:$0xff]  }
  0xbc   : > { %v837_v61 = vpop.permute.xlu1 %836  ;;  %v2627_v60 = vrot.slane %v2626_v46, 4  ;;  %v2639_v1 = vshll.u32 %v4457_v51, 16  ;;  %v2617_v8 = vrot.slane %v2615_v56, 5  ;;  %v4505_v44 = vld [vmem:[%s4975_s22 + $0x2c] sm:$0x1]  ;;  %v3214_v51 = vsel %vm5130_vm6, %v4549_v31, %v3213_v35 }
  0xbd   : > { %908 = vst.msk [vmem:[#allocation2 + $0x64] sm:$0xf] %vm882_vm7, %v837_v61  ;;  %v835_v4 = vpop.permute.xlu0 %834  ;;  %v4500_v61 = vld [vmem:[%s4975_s22 + $0x18] sm:$0xe]  ;;  %v3216_v55 = vrot.slane %v4505_v44, 5 }
  0xbe   : > { %907 = vst.msk [vmem:[#allocation2 + $0x60] sm:$0xf] %vm882_vm7, %v835_v4  ;;  %1888 = vrot.lane.b32.xlu1 %v1537_v59, %s4920_s26  ;;  %v4873_v59 = vld [vmem:[%s6412_s1 + $0x18] sm:$0xff]   ;;  %v1552_v4 = vshll.u32 %v4314_v57, 16  ;;  %v4548_v11 = vrot.slane %v4500_v61, 9  ;;  %v2632_v15 = vsel %vm4986_vm2, %v2627_v60, %v5450_v47  ;;  %v2641_v17 = vrot.slane %v2639_v1, 5 }
  0xbf   : > { %1886 = vrot.lane.b32.xlu0 %v1523_v63, %s4920_s26  ;;  %v4501_v63 = vld [vmem:[%s4975_s22 + $0x1c] sm:$0xf]  ;;  %4786 = vmatprep.subr.bf16.mxu0 %v4873_v59  ;;  %v4462_v44 = vld [vmem:[%s4975_s22 + $0x40] sm:$0xf] }
  0xc0   : > { %v841_v12 = vpop.permute.xlu1 %840  ;;  %4787 = vmatpush3.bf16.msra.mxu0 %v4873_v59  ;;  %4827 = vmatprep.subr.bf16.mxu1 %v4873_v59  ;;  %v1554_v22 = vrot.slane %v1552_v4, 5  ;;  %v4362_v4 = vld [vmem:[%s4975_s22 + $0x24] sm:$0xe] }
  0xc1   : > { %910 = vst.msk [vmem:[#allocation2 + $0x6c] sm:$0xf] %vm882_vm7, %v841_v12  ;;  %v839_v16 = vpop.permute.xlu0 %838  ;;  %v3206_v12 = vrot.slane %v4501_v63, 5  ;;  %4832 = vmatpush3.bf16.msra.mxu1 %v4873_v59  ;;  %4788 = vmatprep.subr.bf16.mxu0 %v4874_v14 }
  0xc2   : > { %909 = vst.msk [vmem:[#allocation2 + $0x68] sm:$0xf] %vm882_vm7, %v839_v16  ;;  %2221 = vrot.lane.b32.xlu1 %v2112_v6, %s4921_s27  ;;  %v4423_v6 = vld [vmem:[%s4975_s22 + $0x28] sm:$0xf]  ;;  %v2637_v16 = vrot.slane %v2636_v0, 4  ;;  %4828 = vmatprep.subr.bf16.mxu1 %v4874_v14 }
  0xc3   : > { %1890 = vrot.lane.b32.xlu0 %v1547_v13, %s4920_s26  ;;  %v4315_v13 = vld [vmem:[%s4975_s22 + $0x28] sm:$0xf]  ;;  %v3207_v34 = vsel %vm5130_vm6, %v4548_v11, %v3206_v12  ;;  %v3208_v36 = vrot.slane %v3206_v12, 4  ;;  %v4319_v0 = vld [vmem:[%s4975_s22 + $0x38] sm:$0x1] }
  0xc4   : > { %v845_v26 = vpop.permute.xlu1 %844  ;;  %v1562_v29 = vshrl.u32 %v4315_v13, 16  ;;  %4789 = vmatpush3.bf16.msra.mxu0 %v4874_v14  ;;  %v2642_v38 = vsel %vm4986_vm2, %v2637_v16, %v2641_v17 }
  0xc5   : > { %912 = vst.msk [vmem:[#allocation2 + $0x74] sm:$0xf] %vm882_vm7, %v845_v26  ;;  %v843_v32 = vpop.permute.xlu0 %842  ;;  %v2618_v26 = vsel %vm4986_vm2, %v2613_v7, %v2617_v8  ;;  %4833 = vmatpush3.bf16.msra.mxu1 %v4874_v14  ;;  %4790 = vmatprep.subr.bf16.mxu0 %v4875_v33  ;;  %v4363_v8 = vld [vmem:[%s4975_s22 + $0x28] sm:$0xf] }
  0xc6   : > { %911 = vst.msk [vmem:[#allocation2 + $0x70] sm:$0xf] %vm882_vm7, %v843_v32  ;;  %2225 = vrot.lane.b32.xlu1 %v2119_v21, %s4921_s27  ;;  %v1551_v21 = vrot.slane %v1549_v3, 4  ;;  %v4318_v32 = vld [vmem:[%s4975_s22 + $0x34] sm:$0xf]  ;;  %v1564_v47 = vrot.slane %v1562_v29, 4  ;;  %4829 = vmatprep.subr.bf16.mxu1 %v4875_v33 }
  0xc7   : > { %2223 = vrot.lane.b32.xlu0 %v2115_v28, %s4921_s27  ;;  %v1558_v28 = vshll.u32 %v4315_v13, 16  ;;  %v1582_v45 = vshll.u32 %v4318_v32, 16  ;;  %v1586_v46 = vshrl.u32 %v4318_v32, 16  ;;  %v4406_v13 = vrot.slane %v4362_v4, 9 }
  0xc8   : > { %v849_v39 = vpop.permute.xlu1 %848  ;;  %4791 = vmatpush3.bf16.msra.mxu0 %v4875_v33  ;;  %v2125_v14 = vrot.slane %v4363_v8, 5 }
  0xc9   : > { %914 = vst.msk [vmem:[#allocation2 + $0x7c] sm:$0xf] %vm882_vm7, %v849_v39  ;;  %v847_v43 = vpop.permute.xlu0 %846  ;;  %v1555_v39 = vor.u32 %v1554_v22, %v1551_v21  ;;  %4834 = vmatpush3.bf16.msra.mxu1 %v4875_v33  ;;  %4792 = vmatprep.subr.bf16.mxu0 %v4876_v50  ;;  %v1588_v61 = vrot.slane %v1586_v46, 4  ;;  %v4458_v21 = vld [vmem:[%s4975_s22 + $0x30] sm:$0xf] }
  0xca   : > { %913 = vst.msk [vmem:[#allocation2 + $0x78] sm:$0xf] %vm882_vm7, %v847_v43  ;;  %2418 = vrot.lane.b32.xlu1 %v4420_v37, %s4922_s30  ;;  %v3209_v37 = vrot.slane %v4502_v20, 5  ;;  %v1560_v43 = vrot.slane %v1558_v28, 5  ;;  %4830 = vmatprep.subr.bf16.mxu1 %v4876_v50  ;;  %v4366_v20 = vld [vmem:[%s4975_s22 + $0x34] sm:$0xf] }
  0xcb   : > { %2227 = vrot.lane.b32.xlu0 %v2122_v40, %s4921_s27  ;;  %v1575_v40 = vrot.slane %v1573_v23, 4  ;;  %v4364_v23 = vld [vmem:[%s4975_s22 + $0x2c] sm:$0x1]  ;;  %v2644_v28 = vshrl.u32 %v4458_v21, 16  ;;  %v2647_v29 = vshll.u32 %v4458_v21, 16  ;;  %v2127_v33 = vrot.slane %v2125_v14, 4 }
  0xcc   : > { %v1129_v53 = vpop.permute.xlu1 %1128  ;;  %v3210_v52 = vsel %vm5130_vm6, %v3208_v36, %v3209_v37  ;;  %v1565_v59 = vor.u32 %v1564_v47, %v1560_v43  ;;  %4793 = vmatpush3.bf16.msra.mxu0 %v4876_v50  ;;  %v4367_v36 = vld [vmem:[%s4975_s22 + $0x38] sm:$0x1]  ;;  %v4459_v37 = vld [vmem:[%s4975_s22 + $0x34] sm:$0xf]  ;;  %v4427_v21 = vld [vmem:[%s4975_s22 + $0x40] sm:$0xf] }
  0xcd   : > { %1224 = vst.msk [vmem:[#allocation2 + $0x4] sm:$0xf] %vm1222_vm8, %v1129_v53  ;;  %v1127_v58 = vpop.permute.xlu0 %1126  ;;  %v1556_v53 = vrot.slane %v1555_v39, 4  ;;  %v1579_v56 = vor.u32 %v1578_v41, %v1575_v40  ;;  %4835 = vmatpush3.bf16.msra.mxu1 %v4876_v50  ;;  %v2135_v47 = vrot.slane %v4367_v36, 5 }
  0xce   : > { %1223 = vst.msk [vmem:[#allocation2] sm:$0xf] %vm1222_vm8, %v1127_v58  ;;  %2422 = vrot.lane.b32.xlu1 %v4422_v49, %s4922_s30  ;;  %v4316_v49 = vld [vmem:[%s4975_s22 + $0x2c] sm:$0x1]  ;;  %v1584_v58 = vrot.slane %v1582_v45, 5 }
  0xcf   : > { %2420 = vrot.lane.b32.xlu0 %v4421_v54, %s4922_s30  ;;  %v3215_v54 = vrot.slane %v3213_v35, 4  ;;  %v1568_v60 = vshll.u32 %v4316_v49, 16  ;;  %v1561_v1 = vsel %vm4986_vm2, %v1556_v53, %v1560_v43  ;;  %v1580_v3 = vrot.slane %v1579_v56, 4 }
  0xd0   : > { %v1133_v5 = vpop.permute.xlu1 %1132  ;;  %v1589_v9 = vor.u32 %v1588_v61, %v1584_v58  ;;  %v2649_v43 = vrot.slane %v2647_v29, 5  ;;  %v2657_v49 = vshrl.u32 %v4459_v37, 16  ;;  %v2677_v53 = vshll.u32 %v4462_v44, 16  ;;  %v4321_v29 = vld [vmem:[%s4975_s22 + $0x40] sm:$0xf] }
  0xd1   : > { %1226 = vst.msk [vmem:[#allocation2 + $0xc] sm:$0xf] %vm1222_vm8, %v1133_v5  ;;  %v1131_v10 = vpop.permute.xlu0 %1130  ;;  %v1570_v7 = vrot.slane %v1568_v60, 5  ;;  %v1585_v12 = vsel %vm4986_vm2, %v1580_v3, %v1584_v58  ;;  %v4426_v3 = vld [vmem:[%s4975_s22 + $0x3c] sm:$0xf] }
  0xd2   : > { %1225 = vst.msk [vmem:[#allocation2 + $0x8] sm:$0xf] %vm1222_vm8, %v1131_v10  ;;  %2979 = vrot.lane.b32.xlu1 %v2608_v2, %s4923_s9  ;;  %v3217_v2 = vsel %vm5130_vm6, %v3215_v54, %v3216_v55  ;;  %v1592_v10 = vshll.u32 %v4319_v0, 16  ;;  %v1590_v18 = vrot.slane %v1589_v9, 4  ;;  %v2681_v54 = vshrl.u32 %v4462_v44, 16 }
  0xd3   : > { %2424 = vrot.lane.b32.xlu0 %v4423_v6, %s4922_s30  ;;  %v1566_v6 = vrot.slane %v1565_v59, 4  ;;  %v4424_v55 = vld [vmem:[%s4975_s22 + $0x30] sm:$0xf]  ;;  %v2659_v60 = vrot.slane %v2657_v49, 4 }
  0xd4   : > { %v1137_v25 = vpop.permute.xlu1 %1136  ;;  %v1594_v19 = vrot.slane %v1592_v10, 5  ;;  %v4320_v10 = vld [vmem:[%s4975_s22 + $0x3c] sm:$0xf] }
  0xd5   : > { %1228 = vst.msk [vmem:[#allocation2 + $0x14] sm:$0xf] %vm1222_vm8, %v1137_v25  ;;  %v1135_v30 = vpop.permute.xlu0 %1134  ;;  %v1571_v17 = vsel %vm4986_vm2, %v1566_v6, %v1570_v7  ;;  %v2126_v25 = vsel %vm5130_vm6, %v4406_v13, %v2125_v14  ;;  %v4425_v7 = vld [vmem:[%s4975_s22 + $0x34] sm:$0xf]  ;;  %v4506_v13 = vld [vmem:[%s4975_s22 + $0x30] sm:$0xe] }
  0xd6   : > { %1227 = vst.msk [vmem:[#allocation2 + $0x10] sm:$0xf] %vm1222_vm8, %v1135_v30  ;;  %2983 = vrot.lane.b32.xlu1 %v2632_v15, %s4923_s9  ;;  %v4365_v15 = vld [vmem:[%s4975_s22 + $0x30] sm:$0xe]  ;;  %v4461_v30 = vld [vmem:[%s4975_s22 + $0x3c] sm:$0xf]  ;;  %v1595_v32 = vsel %vm4986_vm2, %v1590_v18, %v1594_v19 }
  0xd7   : > { %2981 = vrot.lane.b32.xlu0 %v2618_v26, %s4923_s9  ;;  %v4407_v24 = vrot.slane %v4365_v15, 9  ;;  %v2132_v26 = vrot.slane %v4366_v20, 5  ;;  %v2671_v39 = vshll.u32 %v4461_v30, 16  ;;  %v1597_v18 = vshrl.u32 %v4320_v10, 16 }
  0xd8   : > { %v1141_v42 = vpop.permute.xlu1 %1140  ;;  %v1600_v19 = vshll.u32 %v4320_v10, 16 }
  0xd9   : > { %1230 = vst.msk [vmem:[#allocation2 + $0x1c] sm:$0xf] %vm1222_vm8, %v1141_v42  ;;  %v1139_v48 = vpop.permute.xlu0 %1138  ;;  %v2133_v40 = vsel %vm5130_vm6, %v4407_v24, %v2132_v26  ;;  %v2134_v41 = vrot.slane %v2132_v26, 4  ;;  %v2646_v42 = vrot.slane %v2644_v28, 4  ;;  %v4323_v24 = vld [vmem:[%s4975_s22 + $0x48] sm:$0xf] }
  0xda   : > { %1229 = vst.msk [vmem:[#allocation2 + $0x18] sm:$0xf] %vm1222_vm8, %v1139_v48  ;;  %3316 = vrot.lane.b32.xlu1 %v3207_v34, %s4924_s14  ;;  %v2128_v34 = vrot.slane %v4364_v23, 5  ;;  %v2653_v48 = vshll.u32 %v4459_v37, 16  ;;  %v4550_v26 = vrot.slane %v4506_v13, 9  ;;  %v1599_v36 = vrot.slane %v1597_v18, 4 }
  0xdb   : > { %2985 = vrot.lane.b32.xlu0 %v2642_v38, %s4923_s9  ;;  %v2668_v38 = vshrl.u32 %v4461_v30, 16  ;;  %v2650_v56 = vor.u32 %v2649_v43, %v2646_v42  ;;  %v2136_v58 = vsel %vm5130_vm6, %v2134_v41, %v2135_v47  ;;  %v4509_v28 = vld [vmem:[%s4975_s22 + $0x3c] sm:$0xe]  ;;  %v1602_v37 = vrot.slane %v1600_v19, 5 }
  0xdc   : > { %v1145_v57 = vpop.permute.xlu1 %1144  ;;  %v2129_v46 = vsel %vm5130_vm6, %v2127_v33, %v2128_v34  ;;  %v2655_v59 = vrot.slane %v2653_v48, 5  ;;  %v4510_v34 = vld [vmem:[%s4975_s22 + $0x40] sm:$0xf]  ;;  %v1606_v42 = vshll.u32 %v4321_v29, 16  ;;  %v1610_v43 = vshrl.u32 %v4321_v29, 16 }
  0xdd   : > { %1232 = vst.msk [vmem:[#allocation2 + $0x24] sm:$0xf] %vm1222_vm8, %v1145_v57  ;;  %v1143_v63 = vpop.permute.xlu0 %1142  ;;  %v2651_v4 = vrot.slane %v2650_v56, 4  ;;  %v3227_v48 = vrot.slane %v4510_v34, 5  ;;  %v4464_v34 = vld [vmem:[%s4975_s22 + $0x48] sm:$0xf] }
  0xde   : > { %1231 = vst.msk [vmem:[#allocation2 + $0x20] sm:$0xf] %vm1222_vm8, %v1143_v63  ;;  %3320 = vrot.lane.b32.xlu1 %v3214_v51, %s4924_s14  ;;  %v2670_v51 = vrot.slane %v2668_v38, 4  ;;  %v4460_v63 = vld [vmem:[%s4975_s22 + $0x38] sm:$0x1]  ;;  %v2660_v8 = vor.u32 %v2659_v60, %v2655_v59  ;;  %v1621_v38 = vshrl.u32 %v4323_v24, 16 }
  0xdf   : > { %3318 = vrot.lane.b32.xlu0 %v3210_v52, %s4924_s14  ;;  %v2673_v52 = vrot.slane %v2671_v39, 5  ;;  %v2663_v9 = vshll.u32 %v4460_v63, 16  ;;  %v1624_v39 = vshll.u32 %v4323_v24, 16  ;;  %v1608_v56 = vrot.slane %v1606_v42, 5  ;;  %v4322_v63 = vld [vmem:[%s4975_s22 + $0x44] sm:$0x1] }
  0xe0   : > { %v1149_v5 = vpop.permute.xlu1 %1148  ;;  %v1612_v60 = vrot.slane %v1610_v43, 4  ;;  %v4467_v42 = vld [vmem:[%s4975_s22 + $0x54] sm:$0xf] }
  0xe1   : > { %1234 = vst.msk [vmem:[#allocation2 + $0x2c] sm:$0xf] %vm1222_vm8, %v1149_v5  ;;  %v1147_v11 = vpop.permute.xlu0 %1146  ;;  %v2674_v0 = vor.u32 %v2673_v52, %v2670_v51  ;;  %v4463_v5 = vld [vmem:[%s4975_s22 + $0x44] sm:$0x1]  ;;  %v2665_v23 = vrot.slane %v2663_v9, 5  ;;  %v1603_v52 = vor.u32 %v1602_v37, %v1599_v36  ;;  %v1616_v9 = vshll.u32 %v4322_v63, 16 }
  0xe2   : > { %1233 = vst.msk [vmem:[#allocation2 + $0x28] sm:$0xf] %vm1222_vm8, %v1147_v11  ;;  %1892 = vrot.lane.b32.xlu1 %v1561_v1, %s4920_s26  ;;  %v2679_v1 = vrot.slane %v2677_v53, 5  ;;  %v2687_v15 = vshll.u32 %v4463_v5, 16  ;;  %v1623_v53 = vrot.slane %v1621_v38, 4 }
  0xe3   : > { %3322 = vrot.lane.b32.xlu0 %v3217_v2, %s4924_s14  ;;  %v2683_v2 = vrot.slane %v2681_v54, 4  ;;  %v1626_v54 = vrot.slane %v1624_v39, 5  ;;  %v4370_v36 = vld [vmem:[%s4975_s22 + $0x44] sm:$0x1] }
  0xe4   : > { %v1153_v16 = vpop.permute.xlu1 %1152  ;;  %v2689_v33 = vrot.slane %v2687_v15, 5 }
  0xe5   : > { %1236 = vst.msk [vmem:[#allocation2 + $0x34] sm:$0xf] %vm1222_vm8, %v1153_v16  ;;  %v1151_v22 = vpop.permute.xlu0 %1150  ;;  %v2684_v14 = vor.u32 %v2683_v2, %v2679_v1  ;;  %v2656_v16 = vsel %vm4986_vm2, %v2651_v4, %v2655_v59  ;;  %v1604_v2 = vrot.slane %v1603_v52, 4  ;;  %v1627_v5 = vor.u32 %v1626_v54, %v1623_v53 }
  0xe6   : > { %1235 = vst.msk [vmem:[#allocation2 + $0x30] sm:$0xf] %vm1222_vm8, %v1151_v22  ;;  %1896 = vrot.lane.b32.xlu1 %v1585_v12, %s4920_s26  ;;  %v2675_v12 = vrot.slane %v2674_v0, 4  ;;  %v2661_v22 = vrot.slane %v2660_v8, 4  ;;  %v1613_v8 = vor.u32 %v1612_v60, %v1608_v56 }
  0xe7   : > { %1894 = vrot.lane.b32.xlu0 %v1571_v17, %s4920_s26  ;;  %v4507_v17 = vld [vmem:[%s4975_s22 + $0x34] sm:$0xf]  ;;  %v1609_v13 = vsel %vm4986_vm2, %v1604_v2, %v1608_v56  ;;  %v1628_v15 = vrot.slane %v1627_v5, 4  ;;  %v4468_v56 = vld [vmem:[%s4975_s22 + $0x58] sm:$0xf] }
  0xe8   : > { %v1157_v31 = vpop.permute.xlu1 %1156  ;;  %v2680_v30 = vsel %vm4986_vm2, %v2675_v12, %v2679_v1  ;;  %v2666_v41 = vsel %vm4986_vm2, %v2661_v22, %v2665_v23  ;;  %v4325_v12 = vld [vmem:[%s4975_s22 + $0x50] sm:$0x1]  ;;  %v1614_v19 = vrot.slane %v1613_v8, 4  ;;  %v2725_v2 = vshll.u32 %v4468_v56, 16 }
  0xe9   : > { %1238 = vst.msk [vmem:[#allocation2 + $0x3c] sm:$0xf] %vm1222_vm8, %v1157_v31  ;;  %v1155_v35 = vpop.permute.xlu0 %1154  ;;  %v3220_v31 = vrot.slane %v4507_v17, 5  ;;  %v4369_v17 = vld [vmem:[%s4975_s22 + $0x40] sm:$0xf]  ;;  %v1640_v22 = vshll.u32 %v4325_v12, 16 }
  0xea   : > { %1237 = vst.msk [vmem:[#allocation2 + $0x38] sm:$0xf] %vm1222_vm8, %v1155_v35  ;;  %2229 = vrot.lane.b32.xlu1 %v2126_v25, %s4921_s27  ;;  %v4508_v35 = vld [vmem:[%s4975_s22 + $0x38] sm:$0x1] }
  0xeb   : > { %1898 = vrot.lane.b32.xlu0 %v1595_v32, %s4920_s26  ;;  %v2685_v32 = vrot.slane %v2684_v14, 4  ;;  %v3221_v47 = vsel %vm5130_vm6, %v4550_v26, %v3220_v31  ;;  %v3222_v49 = vrot.slane %v3220_v31, 4 }
  0xec   : > { %v1161_v45 = vpop.permute.xlu1 %1160 }
  0xed   : > { %1240 = vst.msk [vmem:[#allocation2 + $0x44] sm:$0xf] %vm1222_vm8, %v1161_v45  ;;  %v1159_v50 = vpop.permute.xlu0 %1158  ;;  %v4551_v45 = vrot.slane %v4509_v28, 9  ;;  %v2690_v51 = vsel %vm4986_vm2, %v2685_v32, %v2689_v33  ;;  %v4371_v28 = vld [vmem:[%s4975_s22 + $0x48] sm:$0xe]  ;;  %v1642_v32 = vrot.slane %v1640_v22, 5 }
  0xee   : > { %1239 = vst.msk [vmem:[#allocation2 + $0x40] sm:$0xf] %vm1222_vm8, %v1159_v50  ;;  %2233 = vrot.lane.b32.xlu1 %v2133_v40, %s4921_s27  ;;  %v3223_v50 = vrot.slane %v4508_v35, 5  ;;  %v4372_v33 = vld [vmem:[%s4975_s22 + $0x4c] sm:$0xf]  ;;  %v4409_v38 = vrot.slane %v4371_v28, 9 }
  0xef   : > { %2231 = vrot.lane.b32.xlu0 %v2129_v46, %s4921_s27  ;;  %v4324_v46 = vld [vmem:[%s4975_s22 + $0x4c] sm:$0xf]  ;;  %v3228_v0 = vsel %vm5130_vm6, %v4551_v45, %v3227_v48  ;;  %v2146_v39 = vrot.slane %v4372_v33, 5  ;;  %v4326_v22 = vld [vmem:[%s4975_s22 + $0x54] sm:$0xf] }
  0xf0   : > { %v1165_v57 = vpop.permute.xlu1 %1164  ;;  %v1634_v59 = vshrl.u32 %v4324_v46, 16  ;;  %v3224_v1 = vsel %vm5130_vm6, %v3222_v49, %v3223_v50  ;;  %v4465_v49 = vld [vmem:[%s4975_s22 + $0x4c] sm:$0xf]  ;;  %v2716_v50 = vshrl.u32 %v4467_v42, 16 }
  0xf1   : > { %1242 = vst.msk [vmem:[#allocation2 + $0x4c] sm:$0xf] %vm1222_vm8, %v1165_v57  ;;  %v1163_v61 = vpop.permute.xlu0 %1162  ;;  %v4511_v57 = vld [vmem:[%s4975_s22 + $0x44] sm:$0x1]  ;;  %v2147_v52 = vsel %vm5130_vm6, %v4409_v38, %v2146_v39  ;;  %v2701_v60 = vshll.u32 %v4465_v49, 16 }
  0xf2   : > { %1241 = vst.msk [vmem:[#allocation2 + $0x48] sm:$0xf] %vm1222_vm8, %v1163_v61  ;;  %2426 = vrot.lane.b32.xlu1 %v4424_v55, %s4922_s30  ;;  %v3230_v4 = vrot.slane %v4511_v57, 5  ;;  %v1636_v10 = vrot.slane %v1634_v59, 4  ;;  %v2148_v59 = vrot.slane %v2146_v39, 4 }
  0xf3   : > { %2235 = vrot.lane.b32.xlu0 %v2136_v58, %s4921_s27  ;;  %v1630_v58 = vshll.u32 %v4324_v46, 16  ;;  %v2142_v46 = vrot.slane %v4370_v36, 5  ;;  %v2703_v8 = vrot.slane %v2701_v60, 5 }
  0xf4   : > { %v1169_v6 = vpop.permute.xlu1 %1168 }
  0xf5   : > { %1244 = vst.msk [vmem:[#allocation2 + $0x54] sm:$0xf] %vm1222_vm8, %v1169_v6  ;;  %v1167_v11 = vpop.permute.xlu0 %1166 }
  0xf6   : > { %1243 = vst.msk [vmem:[#allocation2 + $0x50] sm:$0xf] %vm1222_vm8, %v1167_v11  ;;  %2430 = vrot.lane.b32.xlu1 %v4426_v3, %s4922_s30  ;;  %v3229_v3 = vrot.slane %v3227_v48, 4 }
  0xf7   : > { %2428 = vrot.lane.b32.xlu0 %v4425_v7, %s4922_s30  ;;  %v1632_v7 = vrot.slane %v1630_v58, 5 }
  0xf8   : > { %v1173_v20 = vpop.permute.xlu1 %1172  ;;  %v3231_v14 = vsel %vm5130_vm6, %v3229_v3, %v3230_v4  ;;  %v2729_v3 = vshrl.u32 %v4468_v56, 16  ;;  %v4428_v4 = vld [vmem:[%s4975_s22 + $0x48] sm:$0xf] }
  0xf9   : > { %1246 = vst.msk [vmem:[#allocation2 + $0x5c] sm:$0xf] %vm1222_vm8, %v1173_v20  ;;  %v1171_v25 = vpop.permute.xlu0 %1170  ;;  %v1618_v20 = vrot.slane %v1616_v9, 5  ;;  %v1633_v26 = vsel %vm4986_vm2, %v1628_v15, %v1632_v7  ;;  %v4430_v15 = vld [vmem:[%s4975_s22 + $0x54] sm:$0xf] }
  0xfa   : > { %1245 = vst.msk [vmem:[#allocation2 + $0x58] sm:$0xf] %vm1222_vm8, %v1171_v25  ;;  %2987 = vrot.lane.b32.xlu1 %v2656_v16, %s4923_s9  ;;  %v4368_v16 = vld [vmem:[%s4975_s22 + $0x3c] sm:$0xe]  ;;  %v2139_v25 = vrot.slane %v4369_v17, 5 }
  0xfb   : > { %2432 = vrot.lane.b32.xlu0 %v4427_v21, %s4922_s30  ;;  %v1637_v21 = vor.u32 %v1636_v10, %v1632_v7  ;;  %v4408_v24 = vrot.slane %v4368_v16, 9  ;;  %v4469_v17 = vld [vmem:[%s4975_s22 + $0x5c] sm:$0x1] }
  0xfc   : > { %v1177_v40 = vpop.permute.xlu1 %1176  ;;  %v2141_v45 = vrot.slane %v2139_v25, 4 }
  0xfd   : > { %1248 = vst.msk [vmem:[#allocation2 + $0x64] sm:$0xf] %vm1222_vm8, %v1177_v40  ;;  %v1175_v44 = vpop.permute.xlu0 %1174  ;;  %v1638_v31 = vrot.slane %v1637_v21, 4  ;;  %v2140_v37 = vsel %vm5130_vm6, %v4408_v24, %v2139_v25  ;;  %v2692_v40 = vshrl.u32 %v4464_v34, 16  ;;  %v4512_v25 = vld [vmem:[%s4975_s22 + $0x48] sm:$0xe] }
  0xfe   : > { %1247 = vst.msk [vmem:[#allocation2 + $0x60] sm:$0xf] %vm1222_vm8, %v1175_v44  ;;  %2991 = vrot.lane.b32.xlu1 %v2680_v30, %s4923_s9  ;;  %v1619_v30 = vsel %vm4986_vm2, %v1614_v19, %v1618_v20  ;;  %v2143_v58 = vsel %vm5130_vm6, %v2141_v45, %v2142_v46  ;;  %v4429_v19 = vld [vmem:[%s4975_s22 + $0x4c] sm:$0xf]  ;;  %v4552_v39 = vrot.slane %v4512_v25, 9 }
  0xff   : > { %2989 = vrot.lane.b32.xlu0 %v2666_v41, %s4923_s9  ;;  %v2695_v41 = vshll.u32 %v4464_v34, 16  ;;  %v1643_v44 = vsel %vm4986_vm2, %v1638_v31, %v1642_v32  ;;  %v2694_v54 = vrot.slane %v2692_v40, 4  ;;  %v1645_v31 = vshrl.u32 %v4326_v22, 16  ;;  %v4431_v34 = vld [vmem:[%s4975_s22 + $0x58] sm:$0xf] }
 0x100   : > { %v1181_v55 = vpop.permute.xlu1 %1180  ;;  %v1648_v32 = vshll.u32 %v4326_v22, 16  ;;  %v4515_v45 = vld [vmem:[%s4975_s22 + $0x54] sm:$0xe]  ;;  %v4516_v46 = vld [vmem:[%s4975_s22 + $0x58] sm:$0xf] }
 0x101   : > { %1250 = vst.msk [vmem:[#allocation2 + $0x6c] sm:$0xf] %vm1222_vm8, %v1181_v55  ;;  %v1179_v61 = vpop.permute.xlu0 %1178  ;;  %v2697_v55 = vrot.slane %v2695_v41, 5  ;;  %v4327_v41 = vld [vmem:[%s4975_s22 + $0x58] sm:$0xf]  ;;  %v3241_v60 = vrot.slane %v4516_v46, 5 }
 0x102   : > { %1249 = vst.msk [vmem:[#allocation2 + $0x68] sm:$0xf] %vm1222_vm8, %v1179_v61  ;;  %3324 = vrot.lane.b32.xlu1 %v3221_v47, %s4924_s14  ;;  %v4373_v47 = vld [vmem:[%s4975_s22 + $0x50] sm:$0x1]  ;;  %v2705_v61 = vshrl.u32 %v4465_v49, 16  ;;  %v1650_v49 = vrot.slane %v1648_v32, 5 }
 0x103   : > { %2993 = vrot.lane.b32.xlu0 %v2690_v51, %s4923_s9  ;;  %v2719_v51 = vshll.u32 %v4467_v42, 16  ;;  %v2149_v53 = vrot.slane %v4373_v47, 5  ;;  %v2698_v5 = vor.u32 %v2697_v55, %v2694_v54  ;;  %v4514_v47 = vld [vmem:[%s4975_s22 + $0x50] sm:$0x1]  ;;  %v1654_v54 = vshll.u32 %v4327_v41, 16 }
 0x104   : > { %v1185_v6 = vpop.permute.xlu1 %1184  ;;  %v2707_v9 = vrot.slane %v2705_v61, 4  ;;  %v1658_v55 = vshrl.u32 %v4327_v41, 16  ;;  %v4378_v41 = vld [vmem:[%s4975_s22 + $0x64] sm:$0xf]  ;;  %v4470_v46 = vld [vmem:[%s4975_s22 + $0x60] sm:$0xf] }
 0x105   : > { %1252 = vst.msk [vmem:[#allocation2 + $0x74] sm:$0xf] %vm1222_vm8, %v1185_v6  ;;  %v1183_v11 = vpop.permute.xlu0 %1182  ;;  %v2150_v7 = vsel %vm5130_vm6, %v2148_v59, %v2149_v53  ;;  %v2699_v16 = vrot.slane %v2698_v5, 4  ;;  %v4553_v59 = vrot.slane %v4515_v45, 9  ;;  %v1656_v5 = vrot.slane %v1654_v54, 5 }
 0x106   : > { %1251 = vst.msk [vmem:[#allocation2 + $0x70] sm:$0xf] %vm1222_vm8, %v1183_v11  ;;  %3328 = vrot.lane.b32.xlu1 %v3228_v0, %s4924_s14  ;;  %v2718_v0 = vrot.slane %v2716_v50, 4  ;;  %v4466_v11 = vld [vmem:[%s4975_s22 + $0x50] sm:$0x1]  ;;  %v2708_v20 = vor.u32 %v2707_v9, %v2703_v8  ;;  %v1660_v9 = vrot.slane %v1658_v55, 4 }
 0x107   : > { %3326 = vrot.lane.b32.xlu0 %v3224_v1, %s4924_s14  ;;  %v2721_v1 = vrot.slane %v2719_v51, 5  ;;  %v2711_v21 = vshll.u32 %v4466_v11, 16  ;;  %v4328_v11 = vld [vmem:[%s4975_s22 + $0x5c] sm:$0x1]  ;;  %v2743_v54 = vshll.u32 %v4470_v46, 16 }
 0x108   : > { %v1189_v18 = vpop.permute.xlu1 %1188 }
 0x109   : > { %1254 = vst.msk [vmem:[#allocation2 + $0x7c] sm:$0xf] %vm1222_vm8, %v1189_v18  ;;  %v1187_v23 = vpop.permute.xlu0 %1186  ;;  %v2722_v12 = vor.u32 %v2721_v1, %v2718_v0  ;;  %v2713_v36 = vrot.slane %v2711_v21, 5  ;;  %v1664_v21 = vshll.u32 %v4328_v11, 16  ;;  %v4474_v11 = vld [vmem:[%s4975_s22 + $0x70] sm:$0xf] }
 0x10a   : > { %1253 = vst.msk [vmem:[#allocation2 + $0x78] sm:$0xf] %vm1222_vm8, %v1187_v23  ;;  %1900 = vrot.lane.b32.xlu1 %v1609_v13, %s4920_s26  ;;  %v2727_v13 = vrot.slane %v2725_v2, 5 }
 0x10b   : > { %3330 = vrot.lane.b32.xlu0 %v3231_v14, %s4924_s14  ;;  %v2731_v14 = vrot.slane %v2729_v3, 4  ;;  %v2723_v24 = vrot.slane %v2722_v12, 4  ;;  %v3242_v12 = vsel %vm5130_vm6, %v4553_v59, %v3241_v60  ;;  %v1666_v32 = vrot.slane %v1664_v21, 5  ;;  %v4473_v59 = vld [vmem:[%s4975_s22 + $0x6c] sm:$0xf] }
 0x10c   : > { %v1326_v29 = vpop.permute.xlu1 %1325 }
 0x10d   : > { %1421 = vst.msk [vmem:[#allocation2 + $0x4] sm:$0xf] %vm1419_vm10, %v1326_v29  ;;  %v1324_v35 = vpop.permute.xlu0 %1323  ;;  %v2732_v28 = vor.u32 %v2731_v14, %v2727_v13  ;;  %v2735_v29 = vshll.u32 %v4469_v17, 16  ;;  %v2728_v42 = vsel %vm4986_vm2, %v2723_v24, %v2727_v13  ;;  %v4331_v24 = vld [vmem:[%s4975_s22 + $0x68] sm:$0x1] }
 0x10e   : > { %1420 = vst.msk [vmem:[#allocation2] sm:$0xf] %vm1419_vm10, %v1324_v35  ;;  %1904 = vrot.lane.b32.xlu1 %v1633_v26, %s4920_s26  ;;  %v4513_v26 = vld [vmem:[%s4975_s22 + $0x4c] sm:$0xf]  ;;  %v2709_v35 = vrot.slane %v2708_v20, 4  ;;  %v1661_v20 = vor.u32 %v1660_v9, %v1656_v5 }
 0x10f   : > { %1902 = vrot.lane.b32.xlu0 %v1619_v30, %s4920_s26  ;;  %v2704_v30 = vsel %vm4986_vm2, %v2699_v16, %v2703_v8  ;;  %v3234_v40 = vrot.slane %v4513_v26, 5 }
 0x110   : > { %v1330_v43 = vpop.permute.xlu1 %1329  ;;  %v2714_v53 = vsel %vm4986_vm2, %v2709_v35, %v2713_v36  ;;  %v1688_v35 = vshll.u32 %v4331_v24, 16  ;;  %v4434_v24 = vld [vmem:[%s4975_s22 + $0x6c] sm:$0xf] }
 0x111   : > { %1423 = vst.msk [vmem:[#allocation2 + $0xc] sm:$0xf] %vm1419_vm10, %v1330_v43  ;;  %v1328_v48 = vpop.permute.xlu0 %1327  ;;  %v2733_v43 = vrot.slane %v2732_v28, 4  ;;  %v3236_v61 = vrot.slane %v3234_v40, 4 }
 0x112   : > { %1422 = vst.msk [vmem:[#allocation2 + $0x8] sm:$0xf] %vm1419_vm10, %v1328_v48  ;;  %2237 = vrot.lane.b32.xlu1 %v2140_v37, %s4921_s27  ;;  %v4329_v37 = vld [vmem:[%s4975_s22 + $0x60] sm:$0xf]  ;;  %v1647_v48 = vrot.slane %v1645_v31, 4  ;;  %v1662_v31 = vrot.slane %v1661_v20, 4 }
 0x113   : > { %1906 = vrot.lane.b32.xlu0 %v1643_v44, %s4920_s26  ;;  %v2737_v44 = vrot.slane %v2735_v29, 5  ;;  %v1669_v50 = vshrl.u32 %v4329_v37, 16  ;;  %v1672_v51 = vshll.u32 %v4329_v37, 16  ;;  %v4374_v29 = vld [vmem:[%s4975_s22 + $0x54] sm:$0xe]  ;;  %v1690_v45 = vrot.slane %v1688_v35, 5 }
 0x114   : > { %v1334_v57 = vpop.permute.xlu1 %1333  ;;  %v1651_v1 = vor.u32 %v1650_v49, %v1647_v48  ;;  %v4376_v48 = vld [vmem:[%s4975_s22 + $0x5c] sm:$0x1]  ;;  %v2777_v20 = vshrl.u32 %v4474_v11, 16  ;;  %v4475_v35 = vld [vmem:[%s4975_s22 + $0x74] sm:$0x1] }
 0x115   : > { %1425 = vst.msk [vmem:[#allocation2 + $0x14] sm:$0xf] %vm1419_vm10, %v1334_v57  ;;  %v1332_v63 = vpop.permute.xlu0 %1331  ;;  %v3235_v57 = vsel %vm5130_vm6, %v4552_v39, %v3234_v40  ;;  %v2738_v0 = vsel %vm4986_vm2, %v2733_v43, %v2737_v44  ;;  %v1671_v2 = vrot.slane %v1669_v50, 4  ;;  %v1674_v3 = vrot.slane %v1672_v51, 5  ;;  %v4377_v40 = vld [vmem:[%s4975_s22 + $0x60] sm:$0xe] }
 0x116   : > { %1424 = vst.msk [vmem:[#allocation2 + $0x10] sm:$0xf] %vm1419_vm10, %v1332_v63  ;;  %2241 = vrot.lane.b32.xlu1 %v2147_v52, %s4921_s27  ;;  %v3237_v63 = vrot.slane %v4514_v47, 5  ;;  %v1652_v14 = vrot.slane %v1651_v1, 4  ;;  %v1667_v43 = vsel %vm4986_vm2, %v1662_v31, %v1666_v32  ;;  %v4411_v49 = vrot.slane %v4377_v40, 9 }
 0x117   : > { %2239 = vrot.lane.b32.xlu0 %v2143_v58, %s4921_s27  ;;  %v4330_v58 = vld [vmem:[%s4975_s22 + $0x64] sm:$0xf]  ;;  %v1675_v17 = vor.u32 %v1674_v3, %v1671_v2  ;;  %v2160_v50 = vrot.slane %v4378_v41, 5  ;;  %v2745_v3 = vrot.slane %v2743_v54, 5  ;;  %v4435_v41 = vld [vmem:[%s4975_s22 + $0x70] sm:$0xf] }
 0x118   : > { %v1338_v6 = vpop.permute.xlu1 %1337  ;;  %v1682_v8 = vshrl.u32 %v4330_v58, 16  ;;  %v3238_v13 = vsel %vm5130_vm6, %v3236_v61, %v3237_v63  ;;  %v1657_v25 = vsel %vm4986_vm2, %v1652_v14, %v1656_v5  ;;  %v4471_v61 = vld [vmem:[%s4975_s22 + $0x64] sm:$0xf]  ;;  %v2767_v5 = vshll.u32 %v4473_v59, 16 }
 0x119   : > { %1427 = vst.msk [vmem:[#allocation2 + $0x1c] sm:$0xf] %vm1419_vm10, %v1338_v6  ;;  %v1336_v10 = vpop.permute.xlu0 %1335  ;;  %v4517_v6 = vld [vmem:[%s4975_s22 + $0x5c] sm:$0x1]  ;;  %v1676_v28 = vrot.slane %v1675_v17, 4  ;;  %v2161_v63 = vsel %vm5130_vm6, %v4411_v49, %v2160_v50  ;;  %v2753_v9 = vshrl.u32 %v4471_v61, 16 }
 0x11a   : > { %1426 = vst.msk [vmem:[#allocation2 + $0x18] sm:$0xf] %vm1419_vm10, %v1336_v10  ;;  %2434 = vrot.lane.b32.xlu1 %v4428_v4, %s4922_s30  ;;  %v3244_v16 = vrot.slane %v4517_v6, 5  ;;  %v1684_v22 = vrot.slane %v1682_v8, 4  ;;  %v2749_v8 = vshll.u32 %v4471_v61, 16 }
 0x11b   : > { %2243 = vrot.lane.b32.xlu0 %v2150_v7, %s4921_s27  ;;  %v1678_v7 = vshll.u32 %v4330_v58, 16  ;;  %v2156_v58 = vrot.slane %v4376_v48, 5  ;;  %v2755_v21 = vrot.slane %v2753_v9, 4  ;;  %v4336_v9 = vld [vmem:[%s4975_s22 + $0x7c] sm:$0xf] }
 0x11c   : > { %v1342_v18 = vpop.permute.xlu1 %1341 }
 0x11d   : > { %1429 = vst.msk [vmem:[#allocation2 + $0x24] sm:$0xf] %vm1419_vm10, %v1342_v18  ;;  %v1340_v23 = vpop.permute.xlu0 %1339 }
 0x11e   : > { %1428 = vst.msk [vmem:[#allocation2 + $0x20] sm:$0xf] %vm1419_vm10, %v1340_v23  ;;  %2438 = vrot.lane.b32.xlu1 %v4430_v15, %s4922_s30  ;;  %v3243_v15 = vrot.slane %v3241_v60, 4 }
 0x11f   : > { %2436 = vrot.lane.b32.xlu0 %v4429_v19, %s4922_s30  ;;  %v1680_v19 = vrot.slane %v1678_v7, 5 }
 0x120   : > { %v1346_v33 = vpop.permute.xlu1 %1345  ;;  %v3245_v26 = vsel %vm5130_vm6, %v3243_v15, %v3244_v16  ;;  %v2769_v16 = vrot.slane %v2767_v5, 5 }
 0x121   : > { %1431 = vst.msk [vmem:[#allocation2 + $0x2c] sm:$0xf] %vm1419_vm10, %v1346_v33  ;;  %v1344_v38 = vpop.permute.xlu0 %1343  ;;  %v4375_v33 = vld [vmem:[%s4975_s22 + $0x58] sm:$0xf]  ;;  %v1681_v37 = vsel %vm4986_vm2, %v1676_v28, %v1680_v19 }
 0x122   : > { %1430 = vst.msk [vmem:[#allocation2 + $0x28] sm:$0xf] %vm1419_vm10, %v1344_v38  ;;  %2995 = vrot.lane.b32.xlu1 %v2704_v30, %s4923_s9  ;;  %v4410_v38 = vrot.slane %v4374_v29, 9  ;;  %v2153_v39 = vrot.slane %v4375_v33, 5  ;;  %v4433_v29 = vld [vmem:[%s4975_s22 + $0x64] sm:$0xf] }
 0x123   : > { %2440 = vrot.lane.b32.xlu0 %v4431_v34, %s4922_s30  ;;  %v1685_v34 = vor.u32 %v1684_v22, %v1680_v19  ;;  %v2773_v19 = vshll.u32 %v4474_v11, 16  ;;  %v2779_v33 = vrot.slane %v2777_v20, 4  ;;  %v4335_v11 = vld [vmem:[%s4975_s22 + $0x78] sm:$0xf]  ;;  %v1730_v20 = vshrl.u32 %v4336_v9, 16 }
 0x124   : > { %v1350_v52 = vpop.permute.xlu1 %1349  ;;  %v2154_v51 = vsel %vm5130_vm6, %v4410_v38, %v2153_v39  ;;  %v4518_v38 = vld [vmem:[%s4975_s22 + $0x60] sm:$0xe] }
 0x125   : > { %1433 = vst.msk [vmem:[#allocation2 + $0x34] sm:$0xf] %vm1419_vm10, %v1350_v52  ;;  %v1348_v56 = vpop.permute.xlu0 %1347  ;;  %v1686_v44 = vrot.slane %v1685_v34, 4  ;;  %v4379_v52 = vld [vmem:[%s4975_s22 + $0x68] sm:$0x1] }
 0x126   : > { %1432 = vst.msk [vmem:[#allocation2 + $0x30] sm:$0xf] %vm1419_vm10, %v1348_v56  ;;  %2999 = vrot.lane.b32.xlu1 %v2728_v42, %s4923_s9  ;;  %v2163_v1 = vrot.slane %v4379_v52, 5  ;;  %v4520_v52 = vld [vmem:[%s4975_s22 + $0x68] sm:$0x1] }
 0x127   : > { %2997 = vrot.lane.b32.xlu0 %v2714_v53, %s4923_s9  ;;  %v2740_v53 = vshrl.u32 %v4470_v46, 16  ;;  %v1691_v56 = vsel %vm4986_vm2, %v1686_v44, %v1690_v45  ;;  %v2783_v45 = vshll.u32 %v4475_v35, 16 }
 0x128   : > { %v1354_v4 = vpop.permute.xlu1 %1353 }
 0x129   : > { %1435 = vst.msk [vmem:[#allocation2 + $0x3c] sm:$0xf] %vm1419_vm10, %v1354_v4  ;;  %v1352_v10 = vpop.permute.xlu0 %1351  ;;  %v2742_v2 = vrot.slane %v2740_v53, 4  ;;  %v2764_v4 = vshrl.u32 %v4473_v59, 16  ;;  %v4332_v59 = vld [vmem:[%s4975_s22 + $0x6c] sm:$0xf] }
 0x12a   : > { %1434 = vst.msk [vmem:[#allocation2 + $0x38] sm:$0xf] %vm1419_vm10, %v1352_v10  ;;  %3332 = vrot.lane.b32.xlu1 %v3235_v57, %s4924_s14  ;;  %v2155_v57 = vrot.slane %v2153_v39, 4  ;;  %v4519_v39 = vld [vmem:[%s4975_s22 + $0x64] sm:$0xf] }
 0x12b   : > { %3001 = vrot.lane.b32.xlu0 %v2738_v0, %s4923_s9  ;;  %v2162_v0 = vrot.slane %v2160_v50, 4  ;;  %v2746_v14 = vor.u32 %v2745_v3, %v2742_v2  ;;  %v2766_v15 = vrot.slane %v2764_v4, 4  ;;  %v3248_v48 = vrot.slane %v4519_v39, 5  ;;  %v4521_v50 = vld [vmem:[%s4975_s22 + $0x6c] sm:$0xe] }
 0x12c   : > { %v1885_v18 = vpop.permute.xlu1 %1884  ;;  %v2157_v7 = vsel %vm5130_vm6, %v2155_v57, %v2156_v58  ;;  %v4333_v57 = vld [vmem:[%s4975_s22 + $0x70] sm:$0xf]  ;;  %v4523_v2 = vld [vmem:[%s4975_s22 + $0x74] sm:$0x1] }
 0x12d   : > { %1981 = vst.msk [vmem:[#allocation2] sm:$0xf] %vm1980_vm11, %v1885_v18  ;;  %v1356_v23 = vpop.permute.xlu0 %1355  ;;  %v2751_v18 = vrot.slane %v2749_v8, 5  ;;  %v1702_v3 = vshll.u32 %v4333_v57, 16  ;;  %v1706_v4 = vshrl.u32 %v4333_v57, 16  ;;  %v1696_v8 = vshll.u32 %v4332_v59, 16 }
 0x12e   : > { %1436 = vst.msk [vmem:[#allocation2 + $0x40] sm:$0xf] %vm1419_vm10, %v1356_v23  ;;  %3336 = vrot.lane.b32.xlu1 %v3242_v12, %s4924_s14  ;;  %v4432_v12 = vld [vmem:[%s4975_s22 + $0x60] sm:$0xf]  ;;  %v4472_v23 = vld [vmem:[%s4975_s22 + $0x68] sm:$0x1] }
 0x12f   : > { %3334 = vrot.lane.b32.xlu0 %v3238_v13, %s4924_s14  ;;  %v2164_v13 = vsel %vm5130_vm6, %v2162_v0, %v2163_v1  ;;  %v2756_v31 = vor.u32 %v2755_v21, %v2751_v18  ;;  %v2759_v32 = vshll.u32 %v4472_v23, 16  ;;  %v3251_v0 = vrot.slane %v4520_v52, 5  ;;  %v4384_v57 = vld [vmem:[%s4975_s22 + $0x7c] sm:$0xf] }
 0x130   : > { %v1889_v30 = vpop.permute.xlu1 %1888  ;;  %v1698_v23 = vrot.slane %v1696_v8, 5 }
 0x131   : > { %1983 = vst.msk [vmem:[#allocation2 + $0x8] sm:$0xf] %vm1980_vm11, %v1889_v30  ;;  %v1887_v36 = vpop.permute.xlu0 %1886  ;;  %v2775_v30 = vrot.slane %v2773_v19, 5  ;;  %v1726_v19 = vshll.u32 %v4336_v9, 16 }
 0x132   : > { %1982 = vst.msk [vmem:[#allocation2 + $0x4] sm:$0xf] %vm1980_vm11, %v1887_v36  ;;  %1908 = vrot.lane.b32.xlu1 %v1657_v25, %s4920_s26  ;;  %v2747_v25 = vrot.slane %v2746_v14, 4 }
 0x133   : > { %3338 = vrot.lane.b32.xlu0 %v3245_v26, %s4924_s14  ;;  %v2770_v26 = vor.u32 %v2769_v16, %v2766_v15  ;;  %v2780_v44 = vor.u32 %v2779_v33, %v2775_v30  ;;  %v3258_v15 = vrot.slane %v4523_v2, 5  ;;  %v4334_v16 = vld [vmem:[%s4975_s22 + $0x74] sm:$0x1] }
 0x134   : > { %v2222_v42 = vpop.permute.xlu1 %2221  ;;  %v2752_v36 = vsel %vm4986_vm2, %v2747_v25, %v2751_v18  ;;  %v1708_v18 = vrot.slane %v1706_v4, 4  ;;  %v1720_v25 = vshll.u32 %v4335_v11, 16 }
 0x135   : > { %2318 = vst.msk [vmem:[#allocation2] sm:$0xf] %vm2317_vm12, %v2222_v42  ;;  %v1891_v47 = vpop.permute.xlu0 %1890  ;;  %v2757_v42 = vrot.slane %v2756_v31, 4  ;;  %v5820_v31 = vrot.slane %v1726_v19, 5 }
 0x136   : > { %1984 = vst.msk [vmem:[#allocation2 + $0xc] sm:$0xf] %vm1980_vm11, %v1891_v47  ;;  %1912 = vrot.lane.b32.xlu1 %v1681_v37, %s4920_s26  ;;  %v2771_v37 = vrot.slane %v2770_v26, 4  ;;  %v4554_v47 = vrot.slane %v4518_v38, 9  ;;  %v1722_v38 = vrot.slane %v1720_v25, 5 }
 0x137   : > { %1910 = vrot.lane.b32.xlu0 %v1667_v43, %s4920_s26  ;;  %v2761_v43 = vrot.slane %v2759_v32, 5  ;;  %v1732_v32 = vrot.slane %v1730_v20, 4  ;;  %v4479_v25 = vld [vmem:[%s4975_s22 + $0x84] sm:$0xf] }
 0x138   : > { %v2226_v55 = vpop.permute.xlu1 %2225  ;;  %v2776_v49 = vsel %vm4986_vm2, %v2771_v37, %v2775_v30  ;;  %v3249_v1 = vsel %vm5130_vm6, %v4554_v47, %v3248_v48  ;;  %v1712_v30 = vshll.u32 %v4334_v16, 16  ;;  %v4294_v47 = vld [vmem:[%s4975_s22 + $0x78] sm:$0xf] }
 0x139   : > { %2320 = vst.msk [vmem:[#allocation2 + $0x8] sm:$0xf] %vm2317_vm12, %v2226_v55  ;;  %v2224_v60 = vpop.permute.xlu0 %2223  ;;  %v2762_v54 = vsel %vm4986_vm2, %v2757_v42, %v2761_v43  ;;  %v2781_v55 = vrot.slane %v2780_v44, 4  ;;  %v1733_v44 = vor.u32 %v1732_v32, %v5820_v31 }
 0x13a   : > { %2319 = vst.msk [vmem:[#allocation2 + $0x4] sm:$0xf] %vm2317_vm12, %v2224_v60  ;;  %2245 = vrot.lane.b32.xlu1 %v2154_v51, %s4921_s27  ;;  %v4522_v51 = vld [vmem:[%s4975_s22 + $0x70] sm:$0xf]  ;;  %v4555_v60 = vrot.slane %v4521_v50, 9  ;;  %v1714_v43 = vrot.slane %v1712_v30, 5 }
 0x13b   : > { %1914 = vrot.lane.b32.xlu0 %v1691_v56, %s4920_s26  ;;  %v2785_v56 = vrot.slane %v2783_v45, 5  ;;  %v3255_v61 = vrot.slane %v4522_v51, 5  ;;  %v4381_v50 = vld [vmem:[%s4975_s22 + $0x70] sm:$0xf] }
 0x13c   : > { %v2419_v6 = vpop.permute.xlu1 %2418 }
 0x13d   : > { %2515 = vst.msk [vmem:[#allocation2] sm:$0xf] %vm2514_vm13, %v2419_v6  ;;  %v2228_v10 = vpop.permute.xlu0 %2227  ;;  %v2786_v6 = vsel %vm4986_vm2, %v2781_v55, %v2785_v56  ;;  %v3257_v14 = vrot.slane %v3255_v61, 4  ;;  %v2167_v56 = vrot.slane %v4381_v50, 5 }
 0x13e   : > { %2321 = vst.msk [vmem:[#allocation2 + $0xc] sm:$0xf] %vm2317_vm12, %v2228_v10  ;;  %2249 = vrot.lane.b32.xlu1 %v2161_v63, %s4921_s27  ;;  %v3250_v63 = vrot.slane %v3248_v48, 4 }
 0x13f   : > { %2247 = vrot.lane.b32.xlu0 %v2157_v7, %s4921_s27  ;;  %v1693_v7 = vshrl.u32 %v4332_v59, 16 }
 0x140   : > { %v2423_v17 = vpop.permute.xlu1 %2422 }
 0x141   : > { %2517 = vst.msk [vmem:[#allocation2 + $0x8] sm:$0xf] %vm2514_vm13, %v2423_v17  ;;  %v2421_v22 = vpop.permute.xlu0 %2420  ;;  %v5812_v17 = vrot.slane %v1702_v3, 5  ;;  %v2169_v3 = vrot.slane %v2167_v56, 4 }
 0x142   : > { %2516 = vst.msk [vmem:[#allocation2 + $0x4] sm:$0xf] %vm2514_vm13, %v2421_v22  ;;  %2442 = vrot.lane.b32.xlu1 %v4432_v12, %s4922_s30  ;;  %v3256_v12 = vsel %vm5130_vm6, %v4555_v60, %v3255_v61  ;;  %v1695_v22 = vrot.slane %v1693_v7, 4  ;;  %v4382_v61 = vld [vmem:[%s4975_s22 + $0x74] sm:$0x1] }
 0x143   : > { %2251 = vrot.lane.b32.xlu0 %v2164_v13, %s4921_s27  ;;  %v3252_v13 = vsel %vm5130_vm6, %v3250_v63, %v3251_v0  ;;  %v4380_v0 = vld [vmem:[%s4975_s22 + $0x6c] sm:$0xe]  ;;  %v2170_v4 = vrot.slane %v4382_v61, 5  ;;  %v4525_v61 = vld [vmem:[%s4975_s22 + $0x7c] sm:$0xf] }
 0x144   : > { %v2980_v28 = vpop.permute.xlu1 %2979  ;;  %v1699_v35 = vor.u32 %v1698_v23, %v1695_v22  ;;  %v4412_v9 = vrot.slane %v4380_v0, 9  ;;  %v4480_v23 = vld [vmem:[%s4975_s22 + $0x88] sm:$0xf] }
 0x145   : > { %3076 = vst.msk [vmem:[#allocation2] sm:$0xf] %vm3075_vm14, %v2980_v28  ;;  %v2425_v34 = vpop.permute.xlu0 %2424  ;;  %v4293_v28 = vld [vmem:[%s4975_s22 + $0x70] sm:$0xf]  ;;  %v2171_v16 = vsel %vm5130_vm6, %v2169_v3, %v2170_v4  ;;  %v2825_v32 = vshrl.u32 %v4480_v23, 16  ;;  %v3262_v3 = vrot.slane %v4525_v61, 5 }
 0x146   : > { %2518 = vst.msk [vmem:[#allocation2 + $0xc] sm:$0xf] %vm2514_vm13, %v2425_v34  ;;  %2446 = vrot.lane.b32.xlu1 %v4434_v24, %s4922_s30  ;;  %v1717_v24 = vshrl.u32 %v4335_v11, 16  ;;  %v3259_v34 = vsel %vm5130_vm6, %v3257_v14, %v3258_v15  ;;  %v1700_v48 = vrot.slane %v1699_v35, 4  ;;  %v2168_v20 = vsel %vm5130_vm6, %v4412_v9, %v2167_v56  ;;  %v4528_v4 = vld [vmem:[%s4975_s22 + $0x88] sm:$0xf] }
 0x147   : > { %2444 = vrot.lane.b32.xlu0 %v4433_v29, %s4922_s30  ;;  %v1709_v29 = vor.u32 %v1708_v18, %v5812_v17 }
 0x148   : > { %v2984_v40 = vpop.permute.xlu1 %2983  ;;  %v1719_v37 = vrot.slane %v1717_v24, 4  ;;  %v1705_v59 = vsel %vm4986_vm2, %v1700_v48, %v5812_v17  ;;  %v4481_v48 = vld [vmem:[%s4975_s22 + $0x8c] sm:$0x1] }
 0x149   : > { %3078 = vst.msk [vmem:[#allocation2 + $0x8] sm:$0xf] %vm3075_vm14, %v2984_v40  ;;  %v2982_v46 = vpop.permute.xlu0 %2981  ;;  %v1710_v42 = vrot.slane %v1709_v29, 4  ;;  %v2831_v56 = vshll.u32 %v4481_v48, 16 }
 0x14a   : > { %3077 = vst.msk [vmem:[#allocation2 + $0x4] sm:$0xf] %vm3075_vm14, %v2982_v46  ;;  %3003 = vrot.lane.b32.xlu1 %v2752_v36, %s4923_s9  ;;  %v4337_v36 = vld [vmem:[%s4975_s22 + $0x80] sm:$0x1] }
 0x14b   : > { %2448 = vrot.lane.b32.xlu0 %v4435_v41, %s4922_s30  ;;  %v4295_v41 = vld [vmem:[%s4975_s22 + $0x7c] sm:$0xf]  ;;  %v1736_v45 = vshll.u32 %v4337_v36, 16 }
 0x14c   : > { %v3317_v53 = vpop.permute.xlu1 %3316 }
 0x14d   : > { %3413 = vst.msk [vmem:[#allocation2] sm:$0xf] %vm3412_vm15, %v3317_v53  ;;  %v2986_v58 = vpop.permute.xlu0 %2985  ;;  %v1715_v53 = vsel %vm4986_vm2, %v1710_v42, %v1714_v43  ;;  %v1738_v55 = vrot.slane %v1736_v45, 5 }
 0x14e   : > { %3079 = vst.msk [vmem:[#allocation2 + $0xc] sm:$0xf] %vm3075_vm14, %v2986_v58  ;;  %3007 = vrot.lane.b32.xlu1 %v2776_v49, %s4923_s9  ;;  %v1723_v49 = vor.u32 %v1722_v38, %v1719_v37  ;;  %v2812_v37 = vshrl.u32 %v4479_v25, 16  ;;  %v2815_v38 = vshll.u32 %v4479_v25, 16 }
 0x14f   : > { %3005 = vrot.lane.b32.xlu0 %v2762_v54, %s4923_s9  ;;  %v1734_v54 = vrot.slane %v1733_v44, 4  ;;  %v2827_v44 = vrot.slane %v2825_v32, 4 }
 0x150   : > { %v3321_v5 = vpop.permute.xlu1 %3320  ;;  %v1724_v60 = vrot.slane %v1723_v49, 4  ;;  %v2814_v49 = vrot.slane %v2812_v37, 4  ;;  %v2817_v50 = vrot.slane %v2815_v38, 5  ;;  %v4341_v37 = vld [vmem:[%s4975_s22 + $0x90] sm:$0xf] }
 0x151   : > { %3415 = vst.msk [vmem:[#allocation2 + $0x8] sm:$0xf] %vm3412_vm15, %v3321_v5  ;;  %v3319_v10 = vpop.permute.xlu0 %3318  ;;  %v1739_v2 = vsel %vm4986_vm2, %v1734_v54, %v1738_v55  ;;  %v4385_v5 = vld [vmem:[%s4975_s22 + $0x80] sm:$0x1]  ;;  %v1765_v48 = vshrl.u32 %v4341_v37, 16 }
 0x152   : > { %3414 = vst.msk [vmem:[#allocation2 + $0x4] sm:$0xf] %vm3412_vm15, %v3319_v10  ;;  %3340 = vrot.lane.b32.xlu1 %v3249_v1, %s4924_s14  ;;  %v2174_v1 = vrot.slane %v4384_v57, 5  ;;  %v1729_v8 = vsel %vm4986_vm2, %v1724_v60, %v5820_v31  ;;  %v4477_v10 = vld [vmem:[%s4975_s22 + $0x7c] sm:$0xf]  ;;  %v2177_v14 = vrot.slane %v4385_v5, 5  ;;  %v2818_v60 = vor.u32 %v2817_v50, %v2814_v49 }
 0x153   : > { %3009 = vrot.lane.b32.xlu0 %v2786_v6, %s4923_s9  ;;  %v4383_v6 = vld [vmem:[%s4975_s22 + $0x78] sm:$0xe]  ;;  %v2797_v17 = vshll.u32 %v4477_v10, 16  ;;  %v2801_v18 = vshrl.u32 %v4477_v10, 16  ;;  %v2821_v31 = vshll.u32 %v4480_v23, 16  ;;  %v1768_v49 = vshll.u32 %v4341_v37, 16 }
 0x154   : > { %v1893_v21 = vpop.permute.xlu1 %1892  ;;  %v4413_v15 = vrot.slane %v4383_v6, 9  ;;  %v4524_v10 = vld [vmem:[%s4975_s22 + $0x78] sm:$0xe]  ;;  %v1767_v61 = vrot.slane %v1765_v48, 4  ;;  %v4485_v48 = vld [vmem:[%s4975_s22 + $0x9c] sm:$0xf] }
 0x155   : > { %1985 = vst.msk [vmem:[#allocation2 + $0x10] sm:$0xf] %vm1980_vm11, %v1893_v21  ;;  %v3323_v26 = vpop.permute.xlu0 %3322  ;;  %v2799_v29 = vrot.slane %v2797_v17, 5  ;;  %v2803_v30 = vrot.slane %v2801_v18, 4  ;;  %v2823_v43 = vrot.slane %v2821_v31, 5 }
 0x156   : > { %3416 = vst.msk [vmem:[#allocation2 + $0xc] sm:$0xf] %vm3412_vm15, %v3323_v26  ;;  %3344 = vrot.lane.b32.xlu1 %v3256_v12, %s4924_s14  ;;  %v4476_v12 = vld [vmem:[%s4975_s22 + $0x78] sm:$0xf] }
 0x157   : > { %3342 = vrot.lane.b32.xlu0 %v3252_v13, %s4924_s14  ;;  %v2176_v13 = vrot.slane %v2174_v1, 4  ;;  %v2788_v21 = vshrl.u32 %v4476_v12, 16  ;;  %v2791_v22 = vshll.u32 %v4476_v12, 16  ;;  %v2828_v55 = vor.u32 %v2827_v44, %v2823_v43 }
 0x158   : > { %v1897_v33 = vpop.permute.xlu1 %1896 }
 0x159   : > { %1987 = vst.msk [vmem:[#allocation2 + $0x18] sm:$0xf] %vm1980_vm11, %v1897_v33  ;;  %v1895_v39 = vpop.permute.xlu0 %1894  ;;  %v4877_v40 = vld [vmem:[#allocation2] sm:$0xff]   ;;  %v2178_v26 = vsel %vm5130_vm6, %v2176_v13, %v2177_v14  ;;  %v2790_v35 = vrot.slane %v2788_v21, 4  ;;  %v2793_v36 = vrot.slane %v2791_v22, 5  ;;  %v3264_v13 = vrot.slane %v3262_v3, 4 }
 0x15a   : > { %1986 = vst.msk [vmem:[#allocation2 + $0x14] sm:$0xf] %vm1980_vm11, %v1895_v39  ;;  %1357 = vrot.lane.b32.xlu1 %v4293_v28, %s4919_s25  ;;  %4794 = vmatprep.mubr.msk.bf16.mxu0 %vm3584_vm0, %v4877_v40  ;;  %v2175_v28 = vsel %vm5130_vm6, %v4413_v15, %v2174_v1  ;;  %v4437_v40 = vld [vmem:[%s4975_s22 + $0x7c] sm:$0xf]  ;;  %v2829_v1 = vrot.slane %v2828_v55, 4 }
 0x15b   : > { %3346 = vrot.lane.b32.xlu0 %v3259_v34, %s4924_s14  ;;  %v4478_v34 = vld [vmem:[%s4975_s22 + $0x80] sm:$0x1]  ;;  %v4529_v15 = vld [vmem:[%s4975_s22 + $0x8c] sm:$0x1]  ;;  %v4338_v22 = vld [vmem:[%s4975_s22 + $0x84] sm:$0xf] }
 0x15c   : > { %v2230_v46 = vpop.permute.xlu1 %2229  ;;  %v2807_v42 = vshll.u32 %v4478_v34, 16  ;;  %v1741_v32 = vshrl.u32 %v4338_v22, 16  ;;  %v4342_v34 = vld [vmem:[%s4975_s22 + $0x94] sm:$0xf] }
 0x15d   : > { %2322 = vst.msk [vmem:[#allocation2 + $0x10] sm:$0xf] %vm2317_vm12, %v2230_v46  ;;  %v1899_v51 = vpop.permute.xlu0 %1898  ;;  %v4878_v52 = vld [vmem:[#allocation2 + $0x8] sm:$0xff]   ;;  %v4436_v46 = vld [vmem:[%s4975_s22 + $0x78] sm:$0xf] }
 0x15e   : > { %1988 = vst.msk [vmem:[#allocation2 + $0x1c] sm:$0xf] %vm1980_vm11, %v1899_v51  ;;  %1361 = vrot.lane.b32.xlu1 %v4295_v41, %s4919_s25  ;;  %4795 = vmatmul.mubr.msk.bf16.vlgmr.msra.gmra.mxu0 %vm3584_vm0, %v4878_v52  ;;  %v2804_v41 = vor.u32 %v2803_v30, %v2799_v29  ;;  %v4439_v52 = vld [vmem:[%s4975_s22 + $0x88] sm:$0xf]  ;;  %v2809_v54 = vrot.slane %v2807_v42, 5  ;;  %v1774_v42 = vshll.u32 %v4342_v34, 16 }
 0x15f   : > { %1359 = vrot.lane.b32.xlu0 %v4294_v47, %s4919_s25  ;;  %v2794_v47 = vor.u32 %v2793_v36, %v2790_v35 }
 0x160   : > { %v2234_v58 = vpop.permute.xlu1 %2233  ;;  %v1776_v55 = vrot.slane %v1774_v42, 5 }
 0x161   : > { %2324 = vst.msk [vmem:[#allocation2 + $0x18] sm:$0xf] %vm2317_vm12, %v2234_v58  ;;  %v2232_v63 = vpop.permute.xlu0 %2231  ;;  %v4438_v58 = vld [vmem:[%s4975_s22 + $0x84] sm:$0xf] }
 0x162   : > { %2323 = vst.msk [vmem:[#allocation2 + $0x14] sm:$0xf] %vm2317_vm12, %v2232_v63  ;;  %1918 = vrot.lane.b32.xlu1 %v1715_v53, %s4920_s26  ;;  %v2805_v53 = vrot.slane %v2804_v41, 4 }
 0x163   : > { %1916 = vrot.lane.b32.xlu0 %v1705_v59, %s4920_s26  ;;  %v2795_v59 = vrot.slane %v2794_v47, 4 }
 0x164   : > { %v2427_v7 = vpop.permute.xlu1 %2426  ;;  %v2810_v0 = vsel %vm4986_vm2, %v2805_v53, %v2809_v54 }
 0x165   : > { %2519 = vst.msk [vmem:[#allocation2 + $0x10] sm:$0xf] %vm2514_vm13, %v2427_v7  ;;  %v2236_v11 = vpop.permute.xlu0 %2235  ;;  %v2800_v6 = vsel %vm4986_vm2, %v2795_v59, %v2799_v29  ;;  %v2819_v7 = vrot.slane %v2818_v60, 4  ;;  %v4343_v60 = vld [vmem:[%s4975_s22 + $0x98] sm:$0x1] }
 0x166   : > { %2325 = vst.msk [vmem:[#allocation2 + $0x1c] sm:$0xf] %vm2317_vm12, %v2236_v11  ;;  %1922 = vrot.lane.b32.xlu1 %v1739_v2, %s4920_s26  ;;  %v2833_v2 = vrot.slane %v2831_v56, 5  ;;  %v3269_v11 = vrot.slane %v4528_v4, 5 }
 0x167   : > { %1920 = vrot.lane.b32.xlu0 %v1729_v8, %s4920_s26  ;;  %v4526_v8 = vld [vmem:[%s4975_s22 + $0x80] sm:$0x1]  ;;  %v2824_v18 = vsel %vm4986_vm2, %v2819_v7, %v2823_v43  ;;  %v1778_v43 = vshrl.u32 %v4342_v34, 16  ;;  %v4298_v7 = vld [vmem:[%s4975_s22 + $0x90] sm:$0xf] }
 0x168   : > { %v2431_v19 = vpop.permute.xlu1 %2430  ;;  %v2834_v12 = vsel %vm4986_vm2, %v2829_v1, %v2833_v2  ;;  %v3265_v14 = vrot.slane %v4526_v8, 5  ;;  %v3271_v23 = vrot.slane %v3269_v11, 4  ;;  %v4299_v1 = vld [vmem:[%s4975_s22 + $0x94] sm:$0xf] }
 0x169   : > { %2521 = vst.msk [vmem:[#allocation2 + $0x18] sm:$0xf] %vm2514_vm13, %v2431_v19  ;;  %v2429_v24 = vpop.permute.xlu0 %2428  ;;  %v4556_v19 = vrot.slane %v4524_v10, 9  ;;  %v1780_v56 = vrot.slane %v1778_v43, 4  ;;  %v4387_v10 = vld [vmem:[%s4975_s22 + $0x88] sm:$0xf] }
 0x16a   : > { %2520 = vst.msk [vmem:[#allocation2 + $0x14] sm:$0xf] %vm2514_vm13, %v2429_v24  ;;  %2255 = vrot.lane.b32.xlu1 %v2171_v16, %s4921_s27  ;;  %v4527_v16 = vld [vmem:[%s4975_s22 + $0x84] sm:$0xe]  ;;  %v3272_v24 = vrot.slane %v4529_v15, 5  ;;  %v2181_v15 = vrot.slane %v4387_v10, 5 }
 0x16b   : > { %2253 = vrot.lane.b32.xlu0 %v2168_v20, %s4921_s27  ;;  %v4339_v20 = vld [vmem:[%s4975_s22 + $0x88] sm:$0xf]  ;;  %v4557_v25 = vrot.slane %v4527_v16, 9  ;;  %v3263_v31 = vsel %vm5130_vm6, %v4556_v19, %v3262_v3  ;;  %v1781_v4 = vor.u32 %v1780_v56, %v1776_v55  ;;  %v4390_v16 = vld [vmem:[%s4975_s22 + $0x94] sm:$0xf] }
 0x16c   : > { %v2988_v33 = vpop.permute.xlu1 %2987  ;;  %v1754_v29 = vshrl.u32 %v4339_v20, 16  ;;  %v3273_v38 = vsel %vm5130_vm6, %v3271_v23, %v3272_v24  ;;  %v2188_v23 = vrot.slane %v4390_v16, 5  ;;  %v4484_v56 = vld [vmem:[%s4975_s22 + $0x98] sm:$0x1] }
 0x16d   : > { %3080 = vst.msk [vmem:[#allocation2 + $0x10] sm:$0xf] %vm3075_vm14, %v2988_v33  ;;  %v2433_v39 = vpop.permute.xlu0 %2432  ;;  %v1744_v33 = vshll.u32 %v4338_v22, 16  ;;  %v4386_v22 = vld [vmem:[%s4975_s22 + $0x84] sm:$0xe] }
 0x16e   : > { %2522 = vst.msk [vmem:[#allocation2 + $0x1c] sm:$0xf] %vm2514_vm13, %v2433_v39  ;;  %2259 = vrot.lane.b32.xlu1 %v2178_v26, %s4921_s27  ;;  %v3266_v26 = vsel %vm5130_vm6, %v3264_v13, %v3265_v14  ;;  %v3270_v39 = vsel %vm5130_vm6, %v4557_v25, %v3269_v11  ;;  %v1756_v41 = vrot.slane %v1754_v29, 4  ;;  %v1782_v13 = vrot.slane %v1781_v4, 4  ;;  %v4389_v29 = vld [vmem:[%s4975_s22 + $0x90] sm:$0xe] }
 0x16f   : > { %2257 = vrot.lane.b32.xlu0 %v2175_v28, %s4921_s27  ;;  %v1750_v28 = vshll.u32 %v4339_v20, 16  ;;  %v1746_v47 = vrot.slane %v1744_v33, 5  ;;  %v4388_v20 = vld [vmem:[%s4975_s22 + $0x8c] sm:$0x1]  ;;  %v2183_v25 = vrot.slane %v2181_v15, 4 }
 0x170   : > { %v2992_v45 = vpop.permute.xlu1 %2991  ;;  %v4483_v33 = vld [vmem:[%s4975_s22 + $0x94] sm:$0xf] }
 0x171   : > { %3082 = vst.msk [vmem:[#allocation2 + $0x18] sm:$0xf] %vm3075_vm14, %v2992_v45  ;;  %v2990_v51 = vpop.permute.xlu0 %2989  ;;  %v4340_v45 = vld [vmem:[%s4975_s22 + $0x8c] sm:$0x1] }
 0x172   : > { %3081 = vst.msk [vmem:[#allocation2 + $0x14] sm:$0xf] %vm3075_vm14, %v2990_v51  ;;  %2452 = vrot.lane.b32.xlu1 %v4437_v40, %s4922_s30  ;;  %v5935_v40 = vrot.slane %v1750_v28, 5  ;;  %v1760_v54 = vshll.u32 %v4340_v45, 16  ;;  %v4391_v28 = vld [vmem:[%s4975_s22 + $0x98] sm:$0x1] }
 0x173   : > { %2450 = vrot.lane.b32.xlu0 %v4436_v46, %s4922_s30  ;;  %v1743_v46 = vrot.slane %v1741_v32, 4  ;;  %v4414_v32 = vrot.slane %v4386_v22, 9  ;;  %v2191_v37 = vrot.slane %v4391_v28, 5 }
 0x174   : > { %v3325_v57 = vpop.permute.xlu1 %3324  ;;  %v1757_v53 = vor.u32 %v1756_v41, %v5935_v40  ;;  %v1762_v3 = vrot.slane %v1760_v54, 5  ;;  %v2849_v41 = vshrl.u32 %v4483_v33, 16 }
 0x175   : > { %3417 = vst.msk [vmem:[#allocation2 + $0x10] sm:$0xf] %vm3412_vm15, %v3325_v57  ;;  %v2994_v63 = vpop.permute.xlu0 %2993  ;;  %v1747_v59 = vor.u32 %v1746_v47, %v1743_v46  ;;  %v2182_v43 = vsel %vm5130_vm6, %v4414_v32, %v2181_v15  ;;  %v4486_v46 = vld [vmem:[%s4975_s22 + $0xa0] sm:$0xf] }
 0x176   : > { %3083 = vst.msk [vmem:[#allocation2 + $0x1c] sm:$0xf] %vm3075_vm14, %v2994_v63  ;;  %2456 = vrot.lane.b32.xlu1 %v4439_v52, %s4922_s30  ;;  %v4297_v52 = vld [vmem:[%s4975_s22 + $0x88] sm:$0xf]  ;;  %v1770_v63 = vrot.slane %v1768_v49, 5  ;;  %v1758_v2 = vrot.slane %v1757_v53, 4 }
 0x177   : > { %2454 = vrot.lane.b32.xlu0 %v4438_v58, %s4922_s30  ;;  %v4296_v58 = vld [vmem:[%s4975_s22 + $0x84] sm:$0xf]  ;;  %v1748_v8 = vrot.slane %v1747_v59, 4  ;;  %v2869_v53 = vshll.u32 %v4486_v46, 16  ;;  %v2873_v54 = vshrl.u32 %v4486_v46, 16  ;;  %v2860_v59 = vshrl.u32 %v4485_v48, 16 }
 0x178   : > { %v3329_v5 = vpop.permute.xlu1 %3328 }
 0x179   : > { %3419 = vst.msk [vmem:[#allocation2 + $0x18] sm:$0xf] %vm3412_vm15, %v3329_v5  ;;  %v3327_v9 = vpop.permute.xlu0 %3326  ;;  %v1784_v5 = vshll.u32 %v4343_v60, 16  ;;  %v2863_v60 = vshll.u32 %v4485_v48, 16 }
 0x17a   : > { %3418 = vst.msk [vmem:[#allocation2 + $0x14] sm:$0xf] %vm3412_vm15, %v3327_v9  ;;  %3013 = vrot.lane.b32.xlu1 %v2810_v0, %s4923_s9  ;;  %v1771_v9 = vor.u32 %v1770_v63, %v1767_v61  ;;  %v4441_v63 = vld [vmem:[%s4975_s22 + $0x94] sm:$0xf] }
 0x17b   : > { %3011 = vrot.lane.b32.xlu0 %v2800_v6, %s4923_s9  ;;  %v1786_v14 = vrot.slane %v1784_v5, 5  ;;  %v4440_v5 = vld [vmem:[%s4975_s22 + $0x90] sm:$0xf] }
 0x17c   : > { %v1901_v17 = vpop.permute.xlu1 %1900  ;;  %v1772_v19 = vrot.slane %v1771_v9, 4  ;;  %v2865_v9 = vrot.slane %v2863_v60, 5  ;;  %v4347_v60 = vld [vmem:[%s4975_s22 + $0xa8] sm:$0xf] }
 0x17d   : > { %1989 = vst.msk [vmem:[#allocation2 + $0x20] sm:$0xf] %vm1980_vm11, %v1901_v17  ;;  %v3331_v21 = vpop.permute.xlu0 %3330  ;;  %v1787_v24 = vsel %vm4986_vm2, %v1782_v13, %v1786_v14 }
 0x17e   : > { %3420 = vst.msk [vmem:[#allocation2 + $0x1c] sm:$0xf] %vm3412_vm15, %v3331_v21  ;;  %3017 = vrot.lane.b32.xlu1 %v2834_v12, %s4923_s9  ;;  %v1763_v12 = vsel %vm4986_vm2, %v1758_v2, %v1762_v3  ;;  %v6002_v2 = vrot.slane %v2869_v53, 5  ;;  %v2875_v3 = vrot.slane %v2873_v54, 4 }
 0x17f   : > { %3015 = vrot.lane.b32.xlu0 %v2824_v18, %s4923_s9  ;;  %v1753_v18 = vsel %vm4986_vm2, %v1748_v8, %v5935_v40  ;;  %v2845_v40 = vshll.u32 %v4483_v33, 16  ;;  %v2862_v8 = vrot.slane %v2860_v59, 4 }
 0x180   : > { %v1905_v30 = vpop.permute.xlu1 %1904  ;;  %v2876_v15 = vor.u32 %v2875_v3, %v6002_v2 }
 0x181   : > { %1991 = vst.msk [vmem:[#allocation2 + $0x28] sm:$0xf] %vm1980_vm11, %v1905_v30  ;;  %v1903_v35 = vpop.permute.xlu0 %1902  ;;  %v4879_v36 = vld [vmem:[#allocation2 + $0x10] sm:$0xff]  }
 0x182   : > { %1990 = vst.msk [vmem:[#allocation2 + $0x24] sm:$0xf] %vm1980_vm11, %v1903_v35  ;;  %3350 = vrot.lane.b32.xlu1 %v3266_v26, %s4924_s14  ;;  %4798 = vmatprep.mubr.msk.bf16.mxu0 %vm3584_vm0, %v4879_v36  ;;  %v2184_v26 = vrot.slane %v4388_v20, 5  ;;  %v4482_v35 = vld [vmem:[%s4975_s22 + $0x90] sm:$0xf]  ;;  %v2190_v36 = vrot.slane %v2188_v23, 4 }
 0x183   : > { %3348 = vrot.lane.b32.xlu0 %v3263_v31, %s4924_s14  ;;  %v1777_v31 = vsel %vm4986_vm2, %v1772_v19, %v1776_v55  ;;  %v2839_v45 = vshll.u32 %v4482_v35, 16  ;;  %v2866_v19 = vor.u32 %v2865_v9, %v2862_v8  ;;  %v4531_v20 = vld [vmem:[%s4975_s22 + $0x94] sm:$0xf]  ;;  %v1813_v8 = vshrl.u32 %v4347_v60, 16 }
 0x184   : > { %v2238_v44 = vpop.permute.xlu1 %2237  ;;  %v2192_v49 = vsel %vm5130_vm6, %v2190_v36, %v2191_v37  ;;  %v1816_v9 = vshll.u32 %v4347_v60, 16 }
 0x185   : > { %2326 = vst.msk [vmem:[#allocation2 + $0x20] sm:$0xf] %vm2317_vm12, %v2238_v44  ;;  %v1907_v50 = vpop.permute.xlu0 %1906  ;;  %v4880_v51 = vld [vmem:[#allocation2 + $0x18] sm:$0xff]   ;;  %v2836_v44 = vshrl.u32 %v4482_v35, 16 }
 0x186   : > { %1992 = vst.msk [vmem:[#allocation2 + $0x2c] sm:$0xf] %vm1980_vm11, %v1907_v50  ;;  %3354 = vrot.lane.b32.xlu1 %v3273_v38, %s4924_s14  ;;  %4799 = vmatmul.mubr.msk.bf16.gmra.mxu0 %vm3584_vm0, %v4880_v51  ;;  %v4415_v38 = vrot.slane %v4389_v29, 9  ;;  %v2847_v51 = vrot.slane %v2845_v40, 5  ;;  %v4533_v40 = vld [vmem:[%s4975_s22 + $0x9c] sm:$0xe] }
 0x187   : > { %3352 = vrot.lane.b32.xlu0 %v3270_v39, %s4924_s14  ;;  %v2185_v39 = vsel %vm5130_vm6, %v2183_v25, %v2184_v26  ;;  %v3276_v25 = vrot.slane %v4531_v20, 5  ;;  %v4534_v26 = vld [vmem:[%s4975_s22 + $0xa0] sm:$0xf]  ;;  %v1815_v20 = vrot.slane %v1813_v8, 4 }
 0x188   : > { %v2242_v57 = vpop.permute.xlu1 %2241  ;;  %v2189_v50 = vsel %vm5130_vm6, %v4415_v38, %v2188_v23  ;;  %v2877_v23 = vrot.slane %v2876_v15, 4  ;;  %v3283_v35 = vrot.slane %v4534_v26, 5 }
 0x189   : > { %2328 = vst.msk [vmem:[#allocation2 + $0x28] sm:$0xf] %vm2317_vm12, %v2242_v57  ;;  %v2240_v0 = vpop.permute.xlu0 %2239  ;;  %v2838_v57 = vrot.slane %v2836_v44, 4  ;;  %v3278_v37 = vrot.slane %v3276_v25, 4  ;;  %v4345_v44 = vld [vmem:[%s4975_s22 + $0xa0] sm:$0xf] }
 0x18a   : > { %2327 = vst.msk [vmem:[#allocation2 + $0x24] sm:$0xf] %vm2317_vm12, %v2240_v0  ;;  %1365 = vrot.lane.b32.xlu1 %v4297_v52, %s4919_s25  ;;  %v2851_v52 = vrot.slane %v2849_v41, 4  ;;  %v3285_v48 = vrot.slane %v3283_v35, 4  ;;  %v1802_v53 = vshrl.u32 %v4345_v44, 16 }
 0x18b   : > { %1363 = vrot.lane.b32.xlu0 %v4296_v58, %s4919_s25  ;;  %v2841_v58 = vrot.slane %v2839_v45, 5 }
 0x18c   : > { %v2435_v6 = vpop.permute.xlu1 %2434  ;;  %v2852_v0 = vor.u32 %v2851_v52, %v2847_v51  ;;  %v1798_v52 = vshll.u32 %v4345_v44, 16 }
 0x18d   : > { %2523 = vst.msk [vmem:[#allocation2 + $0x20] sm:$0xf] %vm2514_vm13, %v2435_v6  ;;  %v2244_v11 = vpop.permute.xlu0 %2243  ;;  %v2842_v6 = vor.u32 %v2841_v58, %v2838_v57  ;;  %v4348_v58 = vld [vmem:[%s4975_s22 + $0xac] sm:$0xf] }
 0x18e   : > { %2329 = vst.msk [vmem:[#allocation2 + $0x2c] sm:$0xf] %vm2317_vm12, %v2244_v11  ;;  %1369 = vrot.lane.b32.xlu1 %v4299_v1, %s4919_s25  ;;  %v2855_v1 = vshll.u32 %v4484_v56, 16  ;;  %v4443_v11 = vld [vmem:[%s4975_s22 + $0xa0] sm:$0xf]  ;;  %v2853_v13 = vrot.slane %v2852_v0, 4 }
 0x18f   : > { %1367 = vrot.lane.b32.xlu0 %v4298_v7, %s4919_s25  ;;  %v4487_v7 = vld [vmem:[%s4975_s22 + $0xa4] sm:$0x1]  ;;  %v1800_v0 = vrot.slane %v1798_v52, 5  ;;  %v1826_v3 = vshrl.u32 %v4348_v58, 16 }
 0x190   : > { %v2439_v17 = vpop.permute.xlu1 %2438  ;;  %v2857_v14 = vrot.slane %v2855_v1, 5  ;;  %v2879_v16 = vshll.u32 %v4487_v7, 16  ;;  %v1804_v1 = vrot.slane %v1802_v53, 4 }
 0x191   : > { %2525 = vst.msk [vmem:[#allocation2 + $0x28] sm:$0xf] %vm2514_vm13, %v2439_v17  ;;  %v2437_v21 = vpop.permute.xlu0 %2436  ;;  %v1828_v15 = vrot.slane %v1826_v3, 4 }
 0x192   : > { %2524 = vst.msk [vmem:[#allocation2 + $0x24] sm:$0xf] %vm2514_vm13, %v2437_v21  ;;  %1926 = vrot.lane.b32.xlu1 %v1763_v12, %s4920_s26  ;;  %v4442_v12 = vld [vmem:[%s4975_s22 + $0x9c] sm:$0xf]  ;;  %v2858_v22 = vsel %vm4986_vm2, %v2853_v13, %v2857_v14 }
 0x193   : > { %1924 = vrot.lane.b32.xlu0 %v1753_v18, %s4920_s26  ;;  %v2843_v18 = vrot.slane %v2842_v6, 4 }
 0x194   : > { %v2996_v30 = vpop.permute.xlu1 %2995 }
 0x195   : > { %3084 = vst.msk [vmem:[#allocation2 + $0x20] sm:$0xf] %vm3075_vm14, %v2996_v30  ;;  %v2441_v34 = vpop.permute.xlu0 %2440  ;;  %v2848_v29 = vsel %vm4986_vm2, %v2843_v18, %v2847_v51  ;;  %v2867_v30 = vrot.slane %v2866_v19, 4  ;;  %v4349_v19 = vld [vmem:[%s4975_s22 + $0xb0] sm:$0x1] }
 0x196   : > { %2526 = vst.msk [vmem:[#allocation2 + $0x2c] sm:$0xf] %vm2514_vm13, %v2441_v34  ;;  %1930 = vrot.lane.b32.xlu1 %v1787_v24, %s4920_s26  ;;  %v2881_v24 = vrot.slane %v2879_v16, 5  ;;  %v4530_v34 = vld [vmem:[%s4975_s22 + $0x90] sm:$0xe] }
 0x197   : > { %1928 = vrot.lane.b32.xlu0 %v1777_v31, %s4920_s26  ;;  %v4532_v31 = vld [vmem:[%s4975_s22 + $0x98] sm:$0x1] }
 0x198   : > { %v3000_v42 = vpop.permute.xlu1 %2999  ;;  %v2882_v36 = vsel %vm4986_vm2, %v2877_v23, %v2881_v24  ;;  %v3279_v38 = vrot.slane %v4532_v31, 5  ;;  %v4303_v23 = vld [vmem:[%s4975_s22 + $0xac] sm:$0xf] }
 0x199   : > { %3086 = vst.msk [vmem:[#allocation2 + $0x28] sm:$0xf] %vm3075_vm14, %v3000_v42  ;;  %v2998_v47 = vpop.permute.xlu0 %2997  ;;  %v2872_v42 = vsel %vm4986_vm2, %v2867_v30, %v6002_v2  ;;  %v1822_v2 = vshll.u32 %v4348_v58, 16  ;;  %v4302_v30 = vld [vmem:[%s4975_s22 + $0xa8] sm:$0xf] }
 0x19a   : > { %3085 = vst.msk [vmem:[#allocation2 + $0x24] sm:$0xf] %vm3075_vm14, %v2998_v47  ;;  %2263 = vrot.lane.b32.xlu1 %v2185_v39, %s4921_s27  ;;  %v4535_v39 = vld [vmem:[%s4975_s22 + $0xa4] sm:$0x1]  ;;  %v4344_v47 = vld [vmem:[%s4975_s22 + $0x9c] sm:$0xf]  ;;  %v3280_v51 = vsel %vm5130_vm6, %v3278_v37, %v3279_v38 }
 0x19b   : > { %2261 = vrot.lane.b32.xlu0 %v2182_v43, %s4921_s27  ;;  %v4558_v43 = vrot.slane %v4530_v34, 9  ;;  %v1789_v56 = vshrl.u32 %v4344_v47, 16  ;;  %v1792_v57 = vshll.u32 %v4344_v47, 16  ;;  %v1824_v14 = vrot.slane %v1822_v2, 5 }
 0x19c   : > { %v3333_v55 = vpop.permute.xlu1 %3332 }
 0x19d   : > { %3421 = vst.msk [vmem:[#allocation2 + $0x20] sm:$0xf] %vm3412_vm15, %v3333_v55  ;;  %v3002_v61 = vpop.permute.xlu0 %3001  ;;  %v3277_v55 = vsel %vm5130_vm6, %v4558_v43, %v3276_v25  ;;  %v1791_v6 = vrot.slane %v1789_v56, 4  ;;  %v1794_v7 = vrot.slane %v1792_v57, 5  ;;  %v1829_v26 = vor.u32 %v1828_v15, %v1824_v14  ;;  %v4394_v43 = vld [vmem:[%s4975_s22 + $0xa4] sm:$0x1] }
 0x19e   : > { %3087 = vst.msk [vmem:[#allocation2 + $0x2c] sm:$0xf] %vm3075_vm14, %v3002_v61  ;;  %2267 = vrot.lane.b32.xlu1 %v2192_v49, %s4921_s27  ;;  %v3286_v49 = vrot.slane %v4535_v39, 5  ;;  %v4396_v39 = vld [vmem:[%s4975_s22 + $0xac] sm:$0xf] }
 0x19f   : > { %2265 = vrot.lane.b32.xlu0 %v2189_v50, %s4921_s27  ;;  %v4559_v50 = vrot.slane %v4533_v40, 9  ;;  %v1795_v18 = vor.u32 %v1794_v7, %v1791_v6  ;;  %v4488_v57 = vld [vmem:[%s4975_s22 + $0xa8] sm:$0xf]  ;;  %v4491_v7 = vld [vmem:[%s4975_s22 + $0xb4] sm:$0xf] }
 0x1a0   : > { %v3337_v4 = vpop.permute.xlu1 %3336  ;;  %v3287_v61 = vsel %vm5130_vm6, %v3285_v48, %v3286_v49  ;;  %v2198_v49 = vrot.slane %v4394_v43, 5  ;;  %v2884_v3 = vshrl.u32 %v4488_v57, 16 }
 0x1a1   : > { %3423 = vst.msk [vmem:[#allocation2 + $0x28] sm:$0xf] %vm3412_vm15, %v3337_v4  ;;  %v3335_v10 = vpop.permute.xlu0 %3334  ;;  %v1796_v31 = vrot.slane %v1795_v18, 4  ;;  %v2908_v18 = vshrl.u32 %v4491_v7, 16 }
 0x1a2   : > { %3422 = vst.msk [vmem:[#allocation2 + $0x24] sm:$0xf] %vm3412_vm15, %v3335_v10  ;;  %2460 = vrot.lane.b32.xlu1 %v4441_v63, %s4922_s30  ;;  %v3284_v63 = vsel %vm5130_vm6, %v4559_v50, %v3283_v35  ;;  %v4397_v50 = vld [vmem:[%s4975_s22 + $0xb0] sm:$0x1] }
 0x1a3   : > { %2458 = vrot.lane.b32.xlu0 %v4440_v5, %s4922_s30  ;;  %v4346_v5 = vld [vmem:[%s4975_s22 + $0xa4] sm:$0x1] }
 0x1a4   : > { %v1909_v17 = vpop.permute.xlu1 %1908  ;;  %v1808_v13 = vshll.u32 %v4346_v5, 16  ;;  %v4492_v5 = vld [vmem:[%s4975_s22 + $0xb8] sm:$0xf] }
 0x1a5   : > { %1993 = vst.msk [vmem:[#allocation2 + $0x30] sm:$0xf] %vm1980_vm11, %v1909_v17  ;;  %v3339_v21 = vpop.permute.xlu0 %3338  ;;  %v4300_v17 = vld [vmem:[%s4975_s22 + $0x9c] sm:$0xf] }
 0x1a6   : > { %3424 = vst.msk [vmem:[#allocation2 + $0x2c] sm:$0xf] %vm3412_vm15, %v3339_v21  ;;  %2464 = vrot.lane.b32.xlu1 %v4443_v11, %s4922_s30  ;;  %v4301_v11 = vld [vmem:[%s4975_s22 + $0xa0] sm:$0xf]  ;;  %v1818_v21 = vrot.slane %v1816_v9, 5  ;;  %v1810_v25 = vrot.slane %v1808_v13, 5 }
 0x1a7   : > { %2462 = vrot.lane.b32.xlu0 %v4442_v12, %s4922_s30  ;;  %v1805_v12 = vor.u32 %v1804_v1, %v1800_v0  ;;  %v2917_v13 = vshll.u32 %v4492_v5, 16 }
 0x1a8   : > { %v1913_v28 = vpop.permute.xlu1 %1912 }
 0x1a9   : > { %1995 = vst.msk [vmem:[#allocation2 + $0x38] sm:$0xf] %vm1980_vm11, %v1913_v28  ;;  %v1911_v32 = vpop.permute.xlu0 %1910  ;;  %v4881_v33 = vld [vmem:[#allocation2 + $0x20] sm:$0xff]   ;;  %v1806_v24 = vrot.slane %v1805_v12, 4  ;;  %v1832_v28 = vshll.u32 %v4349_v19, 16  ;;  %v2911_v19 = vshll.u32 %v4491_v7, 16 }
 0x1aa   : > { %1994 = vst.msk [vmem:[#allocation2 + $0x34] sm:$0xf] %vm1980_vm11, %v1911_v32  ;;  %3021 = vrot.lane.b32.xlu1 %v2858_v22, %s4923_s9  ;;  %4802 = vmatprep.mubr.msk.bf16.mxu0 %vm3584_vm0, %v4881_v33  ;;  %v1819_v32 = vor.u32 %v1818_v21, %v1815_v20  ;;  %v4393_v33 = vld [vmem:[%s4975_s22 + $0xa0] sm:$0xf]  ;;  %v4445_v21 = vld [vmem:[%s4975_s22 + $0xac] sm:$0xf] }
 0x1ab   : > { %3019 = vrot.lane.b32.xlu0 %v2848_v29, %s4923_s9  ;;  %v1811_v35 = vsel %vm4986_vm2, %v1806_v24, %v1810_v25  ;;  %v1834_v37 = vrot.slane %v1832_v28, 5  ;;  %v2195_v38 = vrot.slane %v4393_v33, 5  ;;  %v6124_v25 = vrot.slane %v2917_v13, 5 }
 0x1ac   : > { %v2246_v41 = vpop.permute.xlu1 %2245 }
 0x1ad   : > { %2330 = vst.msk [vmem:[#allocation2 + $0x30] sm:$0xf] %vm2317_vm12, %v2246_v41  ;;  %v1915_v45 = vpop.permute.xlu0 %1914  ;;  %v4882_v46 = vld [vmem:[#allocation2 + $0x28] sm:$0xff]   ;;  %v1801_v41 = vsel %vm4986_vm2, %v1796_v31, %v1800_v0  ;;  %v2197_v48 = vrot.slane %v2195_v38, 4  ;;  %v2910_v31 = vrot.slane %v2908_v18, 4 }
 0x1ae   : > { %1996 = vst.msk [vmem:[#allocation2 + $0x3c] sm:$0xf] %vm1980_vm11, %v1915_v45  ;;  %3025 = vrot.lane.b32.xlu1 %v2882_v36, %s4923_s9  ;;  %4803 = vmatmul.mubr.msk.bf16.gmra.mxu0 %vm3584_vm0, %v4882_v46  ;;  %v1830_v36 = vrot.slane %v1829_v26, 4  ;;  %v4392_v45 = vld [vmem:[%s4975_s22 + $0x9c] sm:$0xe]  ;;  %v2202_v46 = vrot.slane %v4396_v39, 5 }
 0x1af   : > { %3023 = vrot.lane.b32.xlu0 %v2872_v42, %s4923_s9  ;;  %v1820_v42 = vrot.slane %v1819_v32, 4  ;;  %v2913_v32 = vrot.slane %v2911_v19, 5  ;;  %v4353_v19 = vld [vmem:[%s4975_s22 + $0xc0] sm:$0xf] }
 0x1b0   : > { %v2250_v54 = vpop.permute.xlu1 %2249  ;;  %v1835_v47 = vsel %vm4986_vm2, %v1830_v36, %v1834_v37  ;;  %v2204_v58 = vrot.slane %v2202_v46, 4 }
 0x1b1   : > { %2332 = vst.msk [vmem:[#allocation2 + $0x38] sm:$0xf] %vm2317_vm12, %v2250_v54  ;;  %v2248_v59 = vpop.permute.xlu0 %2247  ;;  %v1825_v53 = vsel %vm4986_vm2, %v1820_v42, %v1824_v14  ;;  %v4416_v54 = vrot.slane %v4392_v45, 9  ;;  %v2921_v14 = vshrl.u32 %v4492_v5, 16  ;;  %v2914_v43 = vor.u32 %v2913_v32, %v2910_v31 }
 0x1b2   : > { %2331 = vst.msk [vmem:[#allocation2 + $0x34] sm:$0xf] %vm2317_vm12, %v2248_v59  ;;  %3358 = vrot.lane.b32.xlu1 %v3280_v51, %s4924_s14  ;;  %v4395_v51 = vld [vmem:[%s4975_s22 + $0xa8] sm:$0xe]  ;;  %v2205_v59 = vrot.slane %v4397_v50, 5  ;;  %v1861_v31 = vshrl.u32 %v4353_v19, 16 }
 0x1b3   : > { %3356 = vrot.lane.b32.xlu0 %v3277_v55, %s4924_s14  ;;  %v4489_v55 = vld [vmem:[%s4975_s22 + $0xac] sm:$0xf]  ;;  %v4417_v60 = vrot.slane %v4395_v51, 9  ;;  %v2196_v2 = vsel %vm5130_vm6, %v4416_v54, %v2195_v38  ;;  %v2923_v26 = vrot.slane %v2921_v14, 4  ;;  %v4540_v51 = vld [vmem:[%s4975_s22 + $0xb8] sm:$0xf] }
 0x1b4   : > { %v2443_v4 = vpop.permute.xlu1 %2442  ;;  %v2897_v0 = vshrl.u32 %v4489_v55, 16  ;;  %v2206_v8 = vsel %vm5130_vm6, %v2204_v58, %v2205_v59  ;;  %v2915_v54 = vrot.slane %v2914_v43, 4  ;;  %v3297_v58 = vrot.slane %v4540_v51, 5 }
 0x1b5   : > { %2527 = vst.msk [vmem:[#allocation2 + $0x30] sm:$0xf] %vm2514_vm13, %v2443_v4  ;;  %v2252_v10 = vpop.permute.xlu0 %2251  ;;  %v2887_v4 = vshll.u32 %v4488_v57, 16  ;;  %v2203_v9 = vsel %vm5130_vm6, %v4417_v60, %v2202_v46  ;;  %v2924_v38 = vor.u32 %v2923_v26, %v6124_v25  ;;  %v4536_v57 = vld [vmem:[%s4975_s22 + $0xa8] sm:$0xe]  ;;  %v1864_v32 = vshll.u32 %v4353_v19, 16 }
 0x1b6   : > { %2333 = vst.msk [vmem:[#allocation2 + $0x3c] sm:$0xf] %vm2317_vm12, %v2252_v10  ;;  %3362 = vrot.lane.b32.xlu1 %v3287_v61, %s4924_s14  ;;  %v2199_v61 = vsel %vm5130_vm6, %v2197_v48, %v2198_v49  ;;  %v4490_v10 = vld [vmem:[%s4975_s22 + $0xb0] sm:$0x1]  ;;  %v2899_v12 = vrot.slane %v2897_v0, 4  ;;  %v3299_v7 = vrot.slane %v3297_v58, 4 }
 0x1b7   : > { %3360 = vrot.lane.b32.xlu0 %v3284_v63, %s4924_s14  ;;  %v2893_v63 = vshll.u32 %v4489_v55, 16  ;;  %v2903_v24 = vshll.u32 %v4490_v10, 16  ;;  %v2925_v48 = vrot.slane %v2924_v38, 4  ;;  %v4538_v55 = vld [vmem:[%s4975_s22 + $0xb0] sm:$0x1]  ;;  %v1863_v43 = vrot.slane %v1861_v31, 4 }
 0x1b8   : > { %v2447_v16 = vpop.permute.xlu1 %2446  ;;  %v4539_v0 = vld [vmem:[%s4975_s22 + $0xb4] sm:$0xe] }
 0x1b9   : > { %2529 = vst.msk [vmem:[#allocation2 + $0x38] sm:$0xf] %vm2514_vm13, %v2447_v16  ;;  %v2445_v22 = vpop.permute.xlu0 %2444  ;;  %v2886_v16 = vrot.slane %v2884_v3, 4  ;;  %v2905_v37 = vrot.slane %v2903_v24, 5  ;;  %v4560_v3 = vrot.slane %v4536_v57, 9 }
 0x1ba   : > { %2528 = vst.msk [vmem:[#allocation2 + $0x34] sm:$0xf] %vm2514_vm13, %v2445_v22  ;;  %1373 = vrot.lane.b32.xlu1 %v4301_v11, %s4919_s25  ;;  %v6115_v11 = vrot.slane %v2893_v63, 5  ;;  %v4444_v22 = vld [vmem:[%s4975_s22 + $0xa8] sm:$0xf] }
 0x1bb   : > { %1371 = vrot.lane.b32.xlu0 %v4300_v17, %s4919_s25  ;;  %v2889_v17 = vrot.slane %v2887_v4, 5  ;;  %v4541_v63 = vld [vmem:[%s4975_s22 + $0xbc] sm:$0x1]  ;;  %v4351_v4 = vld [vmem:[%s4975_s22 + $0xb8] sm:$0xf] }
 0x1bc   : > { %v3004_v29 = vpop.permute.xlu1 %3003 }
 0x1bd   : > { %3088 = vst.msk [vmem:[#allocation2 + $0x30] sm:$0xf] %vm3075_vm14, %v3004_v29  ;;  %v2449_v34 = vpop.permute.xlu0 %2448  ;;  %v2890_v29 = vor.u32 %v2889_v17, %v2886_v16  ;;  %v4354_v17 = vld [vmem:[%s4975_s22 + $0xc4] sm:$0xf] }
 0x1be   : > { %2530 = vst.msk [vmem:[#allocation2 + $0x3c] sm:$0xf] %vm2514_vm13, %v2449_v34  ;;  %1377 = vrot.lane.b32.xlu1 %v4303_v23, %s4919_s25  ;;  %v2900_v23 = vor.u32 %v2899_v12, %v6115_v11  ;;  %v1850_v12 = vshrl.u32 %v4351_v4, 16  ;;  %v1870_v24 = vshll.u32 %v4354_v17, 16 }
 0x1bf   : > { %1375 = vrot.lane.b32.xlu0 %v4302_v30, %s4919_s25  ;;  %v4493_v30 = vld [vmem:[%s4975_s22 + $0xbc] sm:$0x1]  ;;  %v2891_v42 = vrot.slane %v2890_v29, 4 }
 0x1c0   : > { %v3008_v40 = vpop.permute.xlu1 %3007  ;;  %v2901_v36 = vrot.slane %v2900_v23, 4  ;;  %v2927_v39 = vshll.u32 %v4493_v30, 16  ;;  %v1852_v23 = vrot.slane %v1850_v12, 4 }
 0x1c1   : > { %3090 = vst.msk [vmem:[#allocation2 + $0x38] sm:$0xf] %vm3075_vm14, %v3008_v40  ;;  %v3006_v44 = vpop.permute.xlu0 %3005 }
 0x1c2   : > { %3089 = vst.msk [vmem:[#allocation2 + $0x34] sm:$0xf] %vm3075_vm14, %v3006_v44  ;;  %1934 = vrot.lane.b32.xlu1 %v1811_v35, %s4920_s26  ;;  %v4447_v35 = vld [vmem:[%s4975_s22 + $0xb8] sm:$0xf]  ;;  %v4537_v44 = vld [vmem:[%s4975_s22 + $0xac] sm:$0xf] }
 0x1c3   : > { %1932 = vrot.lane.b32.xlu0 %v1801_v41, %s4920_s26  ;;  %v4446_v41 = vld [vmem:[%s4975_s22 + $0xb4] sm:$0xf]  ;;  %v2929_v49 = vrot.slane %v2927_v39, 5  ;;  %v3290_v50 = vrot.slane %v4537_v44, 5  ;;  %v1866_v44 = vrot.slane %v1864_v32, 5 }
 0x1c4   : > { %v3341_v52 = vpop.permute.xlu1 %3340 }
 0x1c5   : > { %3425 = vst.msk [vmem:[#allocation2 + $0x30] sm:$0xf] %vm3412_vm15, %v3341_v52  ;;  %v3010_v56 = vpop.permute.xlu0 %3009  ;;  %v2930_v59 = vsel %vm4986_vm2, %v2925_v48, %v2929_v49  ;;  %v3292_v60 = vrot.slane %v3290_v50, 4  ;;  %v3291_v14 = vsel %vm5130_vm6, %v4560_v3, %v3290_v50 }
 0x1c6   : > { %3091 = vst.msk [vmem:[#allocation2 + $0x3c] sm:$0xf] %vm3075_vm14, %v3010_v56  ;;  %1938 = vrot.lane.b32.xlu1 %v1835_v47, %s4920_s26  ;;  %v2906_v47 = vsel %vm4986_vm2, %v2901_v36, %v2905_v37  ;;  %v1872_v37 = vrot.slane %v1870_v24, 5 }
 0x1c7   : > { %1936 = vrot.lane.b32.xlu0 %v1825_v53, %s4920_s26  ;;  %v2896_v53 = vsel %vm4986_vm2, %v2891_v42, %v6115_v11  ;;  %v1846_v11 = vshll.u32 %v4351_v4, 16  ;;  %v4355_v42 = vld [vmem:[%s4975_s22 + $0xc8] sm:$0x1]  ;;  %v4398_v4 = vld [vmem:[%s4975_s22 + $0xb4] sm:$0xe] }
 0x1c8   : > { %v3345_v1 = vpop.permute.xlu1 %3344  ;;  %v1880_v50 = vshll.u32 %v4355_v42, 16 }
 0x1c9   : > { %3427 = vst.msk [vmem:[#allocation2 + $0x38] sm:$0xf] %vm3412_vm15, %v3345_v1  ;;  %v3343_v6 = vpop.permute.xlu0 %3342 }
 0x1ca   : > { %3426 = vst.msk [vmem:[#allocation2 + $0x34] sm:$0xf] %vm3412_vm15, %v3343_v6  ;;  %2271 = vrot.lane.b32.xlu1 %v2199_v61, %s4921_s27  ;;  %v3293_v61 = vrot.slane %v4538_v55, 5  ;;  %v4350_v6 = vld [vmem:[%s4975_s22 + $0xb4] sm:$0xf] }
 0x1cb   : > { %2269 = vrot.lane.b32.xlu0 %v2196_v2, %s4921_s27  ;;  %v2920_v2 = vsel %vm4986_vm2, %v2915_v54, %v6124_v25  ;;  %v1840_v16 = vshll.u32 %v4350_v6, 16  ;;  %v1874_v25 = vshrl.u32 %v4354_v17, 16  ;;  %v1867_v54 = vor.u32 %v1866_v44, %v1863_v43  ;;  %v4399_v55 = vld [vmem:[%s4975_s22 + $0xb8] sm:$0xf] }
 0x1cc   : > { %v1358_v15 = vpop.permute.xlu1 %1357  ;;  %v3294_v10 = vsel %vm5130_vm6, %v3292_v60, %v3293_v61  ;;  %v2209_v60 = vrot.slane %v4399_v55, 5  ;;  %v4402_v61 = vld [vmem:[%s4975_s22 + $0xc4] sm:$0xf] }
 0x1cd   : > { %1437 = vst.msk [vmem:[#allocation2 + $0x44] sm:$0xf] %vm1419_vm10, %v1358_v15  ;;  %v3347_v20 = vpop.permute.xlu0 %3346  ;;  %v1837_v15 = vshrl.u32 %v4350_v6, 16  ;;  %v1842_v30 = vrot.slane %v1840_v16, 5  ;;  %v1876_v38 = vrot.slane %v1874_v25, 4 }
 0x1ce   : > { %3428 = vst.msk [vmem:[#allocation2 + $0x3c] sm:$0xf] %vm3412_vm15, %v3347_v20  ;;  %2275 = vrot.lane.b32.xlu1 %v2206_v8, %s4921_s27  ;;  %v3300_v8 = vrot.slane %v4541_v63, 5  ;;  %v4494_v16 = vld [vmem:[%s4975_s22 + $0xc0] sm:$0xf] }
 0x1cf   : > { %2273 = vrot.lane.b32.xlu0 %v2203_v9, %s4921_s27  ;;  %v4561_v9 = vrot.slane %v4539_v0, 9  ;;  %v1839_v29 = vrot.slane %v1837_v15, 4  ;;  %v1877_v49 = vor.u32 %v1876_v38, %v1872_v37  ;;  %v2932_v25 = vshrl.u32 %v4494_v16, 16 }
 0x1d0   : > { %v1362_v28 = vpop.permute.xlu1 %1361  ;;  %v3301_v20 = vsel %vm5130_vm6, %v3299_v7, %v3300_v8  ;;  %v2211_v7 = vrot.slane %v2209_v60, 4 }
 0x1d1   : > { %1439 = vst.msk [vmem:[#allocation2 + $0x4c] sm:$0xf] %vm1419_vm10, %v1362_v28  ;;  %v1360_v33 = vpop.permute.xlu0 %1359  ;;  %v4883_v34 = vld [vmem:[#allocation2 + $0x30] sm:$0xff]   ;;  %v4352_v28 = vld [vmem:[%s4975_s22 + $0xbc] sm:$0x1] }
 0x1d2   : > { %1438 = vst.msk [vmem:[#allocation2 + $0x48] sm:$0xf] %vm1419_vm10, %v1360_v33  ;;  %2468 = vrot.lane.b32.xlu1 %v4445_v21, %s4922_s30  ;;  %4806 = vmatprep.mubr.msk.bf16.mxu0 %vm3584_vm0, %v4883_v34  ;;  %v3298_v21 = vsel %vm5130_vm6, %v4561_v9, %v3297_v58  ;;  %v4305_v34 = vld [vmem:[%s4975_s22 + $0xb8] sm:$0xf]  ;;  %v1856_v36 = vshll.u32 %v4352_v28, 16  ;;  %v1878_v58 = vrot.slane %v1877_v49, 4 }
 0x1d3   : > { %2466 = vrot.lane.b32.xlu0 %v4444_v22, %s4922_s30  ;;  %v1848_v22 = vrot.slane %v1846_v11, 5  ;;  %v4403_v9 = vld [vmem:[%s4975_s22 + $0xc8] sm:$0x1]  ;;  %v4498_v28 = vld [vmem:[%s4975_s22 + $0xd0] sm:$0xf] }
 0x1d4   : > { %v1919_v40 = vpop.permute.xlu1 %1918  ;;  %v1858_v48 = vrot.slane %v1856_v36, 5  ;;  %v2965_v36 = vshll.u32 %v4498_v28, 16 }
 0x1d5   : > { %1998 = vst.msk [vmem:[#allocation2 + $0x44] sm:$0xf] %vm1980_vm11, %v1919_v40  ;;  %v1917_v45 = vpop.permute.xlu0 %1916  ;;  %v4884_v46 = vld [vmem:[#allocation2 + $0x38] sm:$0xff]   ;;  %v4304_v40 = vld [vmem:[%s4975_s22 + $0xb4] sm:$0xf] }
 0x1d6   : > { %1997 = vst.msk [vmem:[#allocation2 + $0x40] sm:$0xf] %vm1980_vm11, %v1917_v45  ;;  %2472 = vrot.lane.b32.xlu1 %v4447_v35, %s4922_s30  ;;  %4807 = vmatmul.mubr.msk.bf16.gmra.mxu0 %vm3584_vm0, %v4884_v46  ;;  %v1853_v35 = vor.u32 %v1852_v23, %v1848_v22  ;;  %v4307_v46 = vld [vmem:[%s4975_s22 + $0xc4] sm:$0xf]  ;;  %v2967_v49 = vrot.slane %v2965_v36, 5 }
 0x1d7   : > { %2470 = vrot.lane.b32.xlu0 %v4446_v41, %s4922_s30  ;;  %v1843_v41 = vor.u32 %v1842_v30, %v1839_v29  ;;  %v4497_v30 = vld [vmem:[%s4975_s22 + $0xcc] sm:$0xf] }
 0x1d8   : > { %v1923_v52 = vpop.permute.xlu1 %1922  ;;  %v2959_v42 = vshll.u32 %v4497_v30, 16 }
 0x1d9   : > { %2000 = vst.msk [vmem:[#allocation2 + $0x4c] sm:$0xf] %vm1980_vm11, %v1923_v52  ;;  %v1921_v56 = vpop.permute.xlu0 %1920  ;;  %v4306_v52 = vld [vmem:[%s4975_s22 + $0xc0] sm:$0xf] }
 0x1da   : > { %1999 = vst.msk [vmem:[#allocation2 + $0x48] sm:$0xf] %vm1980_vm11, %v1921_v56  ;;  %3029 = vrot.lane.b32.xlu1 %v2906_v47, %s4923_s9  ;;  %v1854_v47 = vrot.slane %v1853_v35, 4  ;;  %v2961_v55 = vrot.slane %v2959_v42, 5 }
 0x1db   : > { %3027 = vrot.lane.b32.xlu0 %v2896_v53, %s4923_s9  ;;  %v1844_v53 = vrot.slane %v1843_v41, 4  ;;  %v2956_v41 = vshrl.u32 %v4497_v30, 16 }
 0x1dc   : > { %v2256_v1 = vpop.permute.xlu1 %2255  ;;  %v1859_v57 = vsel %vm4986_vm2, %v1854_v47, %v1858_v48 }
 0x1dd   : > { %2335 = vst.msk [vmem:[#allocation2 + $0x44] sm:$0xf] %vm2317_vm12, %v2256_v1  ;;  %v2254_v5 = vpop.permute.xlu0 %2253  ;;  %v1849_v0 = vsel %vm4986_vm2, %v1844_v53, %v1848_v22  ;;  %v1868_v1 = vrot.slane %v1867_v54, 4  ;;  %v4499_v53 = vld [vmem:[%s4975_s22 + $0xd4] sm:$0x1]  ;;  %v2958_v54 = vrot.slane %v2956_v41, 4 }
 0x1de   : > { %2334 = vst.msk [vmem:[#allocation2 + $0x40] sm:$0xf] %vm2317_vm12, %v2254_v5  ;;  %3033 = vrot.lane.b32.xlu1 %v2930_v59, %s4923_s9  ;;  %v1882_v59 = vrot.slane %v1880_v50, 5  ;;  %v2216_v5 = vrot.slane %v4402_v61, 5 }
 0x1df   : > { %3031 = vrot.lane.b32.xlu0 %v2920_v2, %s4923_s9  ;;  %v4400_v2 = vld [vmem:[%s4975_s22 + $0xbc] sm:$0x1]  ;;  %v1873_v12 = vsel %vm4986_vm2, %v1868_v1, %v1872_v37  ;;  %v2969_v37 = vshrl.u32 %v4498_v28, 16  ;;  %v4450_v1 = vld [vmem:[%s4975_s22 + $0xcc] sm:$0xf] }
 0x1e0   : > { %v2260_v13 = vpop.permute.xlu1 %2259  ;;  %v1883_v6 = vsel %vm4986_vm2, %v1878_v58, %v1882_v59  ;;  %v2212_v8 = vrot.slane %v4400_v2, 5  ;;  %v2218_v17 = vrot.slane %v2216_v5, 4  ;;  %v4451_v58 = vld [vmem:[%s4975_s22 + $0xd0] sm:$0xf] }
 0x1e1   : > { %2337 = vst.msk [vmem:[#allocation2 + $0x4c] sm:$0xf] %vm2317_vm12, %v2260_v13  ;;  %v2258_v18 = vpop.permute.xlu0 %2257  ;;  %v4418_v13 = vrot.slane %v4398_v4, 9  ;;  %v2971_v50 = vrot.slane %v2969_v37, 4  ;;  %v4543_v4 = vld [vmem:[%s4975_s22 + $0xc4] sm:$0xf] }
 0x1e2   : > { %2336 = vst.msk [vmem:[#allocation2 + $0x48] sm:$0xf] %vm2317_vm12, %v2258_v18  ;;  %3366 = vrot.lane.b32.xlu1 %v3294_v10, %s4924_s14  ;;  %v4401_v10 = vld [vmem:[%s4975_s22 + $0xc0] sm:$0xe]  ;;  %v2219_v18 = vrot.slane %v4403_v9, 5  ;;  %v3304_v9 = vrot.slane %v4543_v4, 5 }
 0x1e3   : > { %3364 = vrot.lane.b32.xlu0 %v3291_v14, %s4924_s14  ;;  %v4495_v14 = vld [vmem:[%s4975_s22 + $0xc4] sm:$0xf]  ;;  %v4419_v19 = vrot.slane %v4401_v10, 9  ;;  %v2210_v24 = vsel %vm5130_vm6, %v4418_v13, %v2209_v60  ;;  %v2972_v61 = vor.u32 %v2971_v50, %v2967_v49  ;;  %v4544_v13 = vld [vmem:[%s4975_s22 + $0xc8] sm:$0x1] }
 0x1e4   : > { %v2453_v26 = vpop.permute.xlu1 %2452  ;;  %v2945_v22 = vshrl.u32 %v4495_v14, 16  ;;  %v2220_v31 = vsel %vm5130_vm6, %v2218_v17, %v2219_v18  ;;  %v3306_v18 = vrot.slane %v3304_v9, 4 }
 0x1e5   : > { %2532 = vst.msk [vmem:[#allocation2 + $0x44] sm:$0xf] %vm2514_vm13, %v2453_v26  ;;  %v2451_v33 = vpop.permute.xlu0 %2450  ;;  %v2935_v26 = vshll.u32 %v4494_v16, 16  ;;  %v2217_v32 = vsel %vm5130_vm6, %v4419_v19, %v2216_v5  ;;  %v4542_v16 = vld [vmem:[%s4975_s22 + $0xc0] sm:$0xe]  ;;  %v3307_v19 = vrot.slane %v4544_v13, 5 }
 0x1e6   : > { %2531 = vst.msk [vmem:[#allocation2 + $0x40] sm:$0xf] %vm2514_vm13, %v2451_v33  ;;  %3370 = vrot.lane.b32.xlu1 %v3301_v20, %s4924_s14  ;;  %v2213_v20 = vsel %vm5130_vm6, %v2211_v7, %v2212_v8  ;;  %v4496_v33 = vld [vmem:[%s4975_s22 + $0xc8] sm:$0x1]  ;;  %v2947_v35 = vrot.slane %v2945_v22, 4  ;;  %v2973_v7 = vrot.slane %v2972_v61, 4 }
 0x1e7   : > { %3368 = vrot.lane.b32.xlu0 %v3298_v21, %s4924_s14  ;;  %v2941_v21 = vshll.u32 %v4495_v14, 16  ;;  %v2951_v48 = vshll.u32 %v4496_v33, 16  ;;  %v4546_v14 = vld [vmem:[%s4975_s22 + $0xd0] sm:$0xf]  ;;  %v3308_v28 = vsel %vm5130_vm6, %v3306_v18, %v3307_v19 }
 0x1e8   : > { %v2457_v39 = vpop.permute.xlu1 %2456 }
 0x1e9   : > { %2534 = vst.msk [vmem:[#allocation2 + $0x4c] sm:$0xf] %vm2514_vm13, %v2457_v39  ;;  %v2455_v45 = vpop.permute.xlu0 %2454  ;;  %v2934_v39 = vrot.slane %v2932_v25, 4  ;;  %v2953_v60 = vrot.slane %v2951_v48, 5 }
 0x1ea   : > { %2533 = vst.msk [vmem:[#allocation2 + $0x48] sm:$0xf] %vm2514_vm13, %v2455_v45  ;;  %1381 = vrot.lane.b32.xlu1 %v4305_v34, %s4919_s25  ;;  %v6237_v34 = vrot.slane %v2941_v21, 5  ;;  %v4449_v45 = vld [vmem:[%s4975_s22 + $0xc4] sm:$0xf] }
 0x1eb   : > { %1379 = vrot.lane.b32.xlu0 %v4304_v40, %s4919_s25  ;;  %v2937_v40 = vrot.slane %v2935_v26, 5  ;;  %v4545_v26 = vld [vmem:[%s4975_s22 + $0xcc] sm:$0xe] }
 0x1ec   : > { %v3014_v51 = vpop.permute.xlu1 %3013  ;;  %v2948_v47 = vor.u32 %v2947_v35, %v6237_v34 }
 0x1ed   : > { %3093 = vst.msk [vmem:[#allocation2 + $0x44] sm:$0xf] %vm3075_vm14, %v3014_v51  ;;  %v3012_v56 = vpop.permute.xlu0 %3011 }
 0x1ee   : > { %3092 = vst.msk [vmem:[#allocation2 + $0x40] sm:$0xf] %vm3075_vm14, %v3012_v56  ;;  %1385 = vrot.lane.b32.xlu1 %v4307_v46, %s4919_s25  ;;  %v4448_v46 = vld [vmem:[%s4975_s22 + $0xc0] sm:$0xf]  ;;  %v2949_v59 = vrot.slane %v2948_v47, 4 }
 0x1ef   : > { %1383 = vrot.lane.b32.xlu0 %v4306_v52, %s4919_s25  ;;  %v2938_v52 = vor.u32 %v2937_v40, %v2934_v39  ;;  %s6382_s25 = scalar_lea.vmem %s6414_s3, %s6425_s15 }
 0x1f0   : > { %v3018_v63 = vpop.permute.xlu1 %3017 }
 0x1f1   : > { %3095 = vst.msk [vmem:[#allocation2 + $0x4c] sm:$0xf] %vm3075_vm14, %v3018_v63  ;;  %v3016_v3 = vpop.permute.xlu0 %3015  ;;  %v2975_v63 = vshll.u32 %v4499_v53, 16  ;;  %v2939_v2 = vrot.slane %v2938_v52, 4 }
 0x1f2   : > { %3094 = vst.msk [vmem:[#allocation2 + $0x48] sm:$0xf] %vm3075_vm14, %v3016_v3  ;;  %1942 = vrot.lane.b32.xlu1 %v1859_v57, %s4920_s26  ;;  %v2962_v3 = vor.u32 %v2961_v55, %v2958_v54 }
 0x1f3   : > { %1940 = vrot.lane.b32.xlu0 %v1849_v0, %s4920_s26  ;;  %v2977_v8 = vrot.slane %v2975_v63, 5 }
 0x1f4   : > { %v3351_v11 = vpop.permute.xlu1 %3350 }
 0x1f5   : > { %3430 = vst.msk [vmem:[#allocation2 + $0x44] sm:$0xf] %vm3412_vm15, %v3351_v11  ;;  %v3349_v15 = vpop.permute.xlu0 %3348  ;;  %v2944_v11 = vsel %vm4986_vm2, %v2939_v2, %v6237_v34  ;;  %v2978_v17 = vsel %vm4986_vm2, %v2973_v7, %v2977_v8 }
 0x1f6   : > { %3429 = vst.msk [vmem:[#allocation2 + $0x40] sm:$0xf] %vm3412_vm15, %v3349_v15  ;;  %1946 = vrot.lane.b32.xlu1 %v1883_v6, %s4920_s26  ;;  %v2954_v6 = vsel %vm4986_vm2, %v2949_v59, %v2953_v60 }
 0x1f7   : > { %1944 = vrot.lane.b32.xlu0 %v1873_v12, %s4920_s26  ;;  %v2963_v12 = vrot.slane %v2962_v3, 4 }
 0x1f8   : > { %v3355_v23 = vpop.permute.xlu1 %3354 }
 0x1f9   : > { %3432 = vst.msk [vmem:[#allocation2 + $0x4c] sm:$0xf] %vm3412_vm15, %v3355_v23  ;;  %v3353_v29 = vpop.permute.xlu0 %3352  ;;  %v2968_v22 = vsel %vm4986_vm2, %v2963_v12, %v2967_v49  ;;  %v4562_v23 = vrot.slane %v4542_v16, 9 }
 0x1fa   : > { %3431 = vst.msk [vmem:[#allocation2 + $0x48] sm:$0xf] %vm3412_vm15, %v3353_v29  ;;  %2279 = vrot.lane.b32.xlu1 %v2213_v20, %s4921_s27  ;;  %v3311_v20 = vrot.slane %v4546_v14, 5 }
 0x1fb   : > { %2277 = vrot.lane.b32.xlu0 %v2210_v24, %s4921_s27  ;;  %v4547_v24 = vld [vmem:[%s4975_s22 + $0xd4] sm:$0x1]  ;;  %v3305_v27 = vsel %vm5130_vm6, %v4562_v23, %v3304_v9  ;;  %s6308_s22 = scalar_lea.vmem %s6413_s2, %s4635_s19 }
 0x1fc   : > { %v1366_v38 = vpop.permute.xlu1 %1365  ;;  %v3313_v29 = vrot.slane %v3311_v20, 4  ;;  %v3314_v30 = vrot.slane %v4547_v24, 5 }
 0x1fd   : > { %1441 = vst.msk [vmem:[#allocation2 + $0x54] sm:$0xf] %vm1419_vm10, %v1366_v38  ;;  %v1364_v43 = vpop.permute.xlu0 %1363  ;;  %v4885_v44 = vld [vmem:[#allocation2 + $0x40] sm:$0xff]  }
 0x1fe   : > { %1440 = vst.msk [vmem:[#allocation2 + $0x50] sm:$0xf] %vm1419_vm10, %v1364_v43  ;;  %2283 = vrot.lane.b32.xlu1 %v2220_v31, %s4921_s27  ;;  %4810 = vmatprep.mubr.msk.bf16.mxu1 %vm3584_vm0, %v4885_v44  ;;  %v3315_v34 = vsel %vm5130_vm6, %v3313_v29, %v3314_v30 }
 0x1ff   : > { %2281 = vrot.lane.b32.xlu0 %v2217_v32, %s4921_s27  ;;  %v4563_v32 = vrot.slane %v4545_v26, 9 }
 0x200   : > { %v1370_v51 = vpop.permute.xlu1 %1369 }
 0x201   : > { %1443 = vst.msk [vmem:[#allocation2 + $0x5c] sm:$0xf] %vm1419_vm10, %v1370_v51  ;;  %v1368_v56 = vpop.permute.xlu0 %1367  ;;  %v4886_v57 = vld [vmem:[#allocation2 + $0x48] sm:$0xff]   ;;  %v3312_v36 = vsel %vm5130_vm6, %v4563_v32, %v3311_v20 }
 0x202   : > { %1442 = vst.msk [vmem:[#allocation2 + $0x58] sm:$0xf] %vm1419_vm10, %v1368_v56  ;;  %2476 = vrot.lane.b32.xlu1 %v4449_v45, %s4922_s30  ;;  %4811 = vmatmul.mubr.msk.bf16.vlgmr.msra.gmra.mxu1 %vm3584_vm0, %v4886_v57 }
 0x203   : > { %2474 = vrot.lane.b32.xlu0 %v4448_v46, %s4922_s30 }
 0x204   : > { %v1927_v0 = vpop.permute.xlu1 %1926 }
 0x205   : > { %2002 = vst.msk [vmem:[#allocation2 + $0x54] sm:$0xf] %vm1980_vm11, %v1927_v0  ;;  %v1925_v5 = vpop.permute.xlu0 %1924 }
 0x206   : > { %2001 = vst.msk [vmem:[#allocation2 + $0x50] sm:$0xf] %vm1980_vm11, %v1925_v5  ;;  %2480 = vrot.lane.b32.xlu1 %v4451_v58, %s4922_s30 }
 0x207   : > { %2478 = vrot.lane.b32.xlu0 %v4450_v1, %s4922_s30 }
 0x208   : > { %v1931_v10 = vpop.permute.xlu1 %1930 }
 0x209   : > { %2004 = vst.msk [vmem:[#allocation2 + $0x5c] sm:$0xf] %vm1980_vm11, %v1931_v10  ;;  %v1929_v15 = vpop.permute.xlu0 %1928 }
 0x20a   : > { %2003 = vst.msk [vmem:[#allocation2 + $0x58] sm:$0xf] %vm1980_vm11, %v1929_v15  ;;  %3037 = vrot.lane.b32.xlu1 %v2954_v6, %s4923_s9 }
 0x20b   : > { %3035 = vrot.lane.b32.xlu0 %v2944_v11, %s4923_s9 }
 0x20c   : > { %v2264_v21 = vpop.permute.xlu1 %2263 }
 0x20d   : > { %2339 = vst.msk [vmem:[#allocation2 + $0x54] sm:$0xf] %vm2317_vm12, %v2264_v21  ;;  %v2262_v25 = vpop.permute.xlu0 %2261 }
 0x20e   : > { %2338 = vst.msk [vmem:[#allocation2 + $0x50] sm:$0xf] %vm2317_vm12, %v2262_v25  ;;  %3041 = vrot.lane.b32.xlu1 %v2978_v17, %s4923_s9 }
 0x20f   : > { %3039 = vrot.lane.b32.xlu0 %v2968_v22, %s4923_s9 }
 0x210   : > { %v2268_v31 = vpop.permute.xlu1 %2267 }
 0x211   : > { %2341 = vst.msk [vmem:[#allocation2 + $0x5c] sm:$0xf] %vm2317_vm12, %v2268_v31  ;;  %v2266_v33 = vpop.permute.xlu0 %2265 }
 0x212   : > { %2340 = vst.msk [vmem:[#allocation2 + $0x58] sm:$0xf] %vm2317_vm12, %v2266_v33  ;;  %3374 = vrot.lane.b32.xlu1 %v3308_v28, %s4924_s14 }
 0x213   : > { %3372 = vrot.lane.b32.xlu0 %v3305_v27, %s4924_s14 }
 0x214   : > { %v2461_v35 = vpop.permute.xlu1 %2460 }
 0x215   : > { %2536 = vst.msk [vmem:[#allocation2 + $0x54] sm:$0xf] %vm2514_vm13, %v2461_v35  ;;  %v2459_v37 = vpop.permute.xlu0 %2458 }
 0x216   : > { %2535 = vst.msk [vmem:[#allocation2 + $0x50] sm:$0xf] %vm2514_vm13, %v2459_v37  ;;  %3378 = vrot.lane.b32.xlu1 %v3315_v34, %s4924_s14 }
 0x217   : > { %3376 = vrot.lane.b32.xlu0 %v3312_v36, %s4924_s14 }
 0x218   : > { %v2465_v38 = vpop.permute.xlu1 %2464 }
 0x219   : > { %2538 = vst.msk [vmem:[#allocation2 + $0x5c] sm:$0xf] %vm2514_vm13, %v2465_v38  ;;  %v2463_v39 = vpop.permute.xlu0 %2462 }
 0x21a   : > { %2537 = vst.msk [vmem:[#allocation2 + $0x58] sm:$0xf] %vm2514_vm13, %v2463_v39 }
 0x21c   : > { %v3022_v40 = vpop.permute.xlu1 %3021 }
 0x21d   : > { %3097 = vst.msk [vmem:[#allocation2 + $0x54] sm:$0xf] %vm3075_vm14, %v3022_v40  ;;  %v3020_v62 = vpop.permute.xlu0 %3019 }
 0x21e   : > { %3096 = vst.msk [vmem:[#allocation2 + $0x50] sm:$0xf] %vm3075_vm14, %v3020_v62  ;;  %v4796_v41 = vpop.f32.mrf.mxu0 }
 0x21f   : > { %v4007_v54 = vmul.f32 %v4796_v41, %v4796_v41 }
 0x220   : > { %v3026_v42 = vpop.permute.xlu1 %3025  ;;  %v3671_v44 = vpop.f32.mrf.mxu0 }
 0x221   : > { %3099 = vst.msk [vmem:[#allocation2 + $0x5c] sm:$0xf] %vm3075_vm14, %v3026_v42  ;;  %v3024_v43 = vpop.permute.xlu0 %3023  ;;  %v4005_v50 = vmul.f32 %v3671_v44, %v3671_v44 }
 0x222   : > { %3098 = vst.msk [vmem:[#allocation2 + $0x58] sm:$0xf] %vm3075_vm14, %v3024_v43  ;;  %v4797_v45 = vpop.f32.mrf.mxu0 }
 0x223   : > { %v4676_v46 = vpack.c.bf16 %v4797_v45, %v4796_v41  ;;  %v4008_v59 = vmul.f32 %v4797_v45, %v4797_v45 }
 0x224   : > { %v3359_v47 = vpop.permute.xlu1 %3358  ;;  %v3674_v49 = vpop.f32.mrf.mxu0 }
 0x225   : > { %3434 = vst.msk [vmem:[#allocation2 + $0x54] sm:$0xf] %vm3412_vm15, %v3359_v47  ;;  %v3357_v48 = vpop.permute.xlu0 %3356  ;;  %4748 = vst [vmem:[%s6308_s22 + $0x8] sm:$0xff] %v4676_v46   ;;  %v4671_v51 = vpack.c.bf16 %v3674_v49, %v3671_v44  ;;  %v3965_v52 = vadd.f32 %v3674_v49, %v3671_v44  ;;  %v4006_v53 = vmul.f32 %v3674_v49, %v3674_v49 }
 0x226   : > { %3433 = vst.msk [vmem:[#allocation2 + $0x50] sm:$0xf] %vm3412_vm15, %v3357_v48 }
 0x227   : > { %4672 = vst [vmem:[%s6308_s22] sm:$0xff] %v4671_v51   ;;  %v3966_v55 = vadd.f32 %v4796_v41, %v3965_v52  ;;  %v4037_v56 = vadd.f32 %v4006_v53, %v4005_v50 }
 0x228   : > { %v3363_v57 = vpop.permute.xlu1 %3362 }
 0x229   : > { %3436 = vst.msk [vmem:[#allocation2 + $0x5c] sm:$0xf] %vm3412_vm15, %v3363_v57  ;;  %v3361_v58 = vpop.permute.xlu0 %3360  ;;  %v4038_v60 = vadd.f32 %v4037_v56, %v4007_v54  ;;  %v3967_v61 = vadd.f32 %v4797_v45, %v3966_v55 }
 0x22a   : > { %3435 = vst.msk [vmem:[#allocation2 + $0x58] sm:$0xf] %vm3412_vm15, %v3361_v58 }
 0x22b   : > { %v4039_v0 = vadd.f32 %v4038_v60, %v4008_v59 }
 0x22c   : > { %v1374_v63 = vpop.permute.xlu1 %1373 }
 0x22d   : > { %1445 = vst.msk [vmem:[#allocation2 + $0x64] sm:$0xf] %vm1419_vm10, %v1374_v63  ;;  %v1372_v1 = vpop.permute.xlu0 %1371  ;;  %v4887_v2 = vld [vmem:[#allocation2 + $0x50] sm:$0xff]  }
 0x22e   : > { %1444 = vst.msk [vmem:[#allocation2 + $0x60] sm:$0xf] %vm1419_vm10, %v1372_v1  ;;  %4814 = vmatprep.mubr.msk.bf16.mxu1 %vm3584_vm0, %v4887_v2 }
 0x230   : > { %v1378_v3 = vpop.permute.xlu1 %1377 }
 0x231   : > { %1447 = vst.msk [vmem:[#allocation2 + $0x6c] sm:$0xf] %vm1419_vm10, %v1378_v3  ;;  %v1376_v4 = vpop.permute.xlu0 %1375  ;;  %v4888_v5 = vld [vmem:[#allocation2 + $0x58] sm:$0xff]  }
 0x232   : > { %1446 = vst.msk [vmem:[#allocation2 + $0x68] sm:$0xf] %vm1419_vm10, %v1376_v4  ;;  %4815 = vmatmul.mubr.msk.bf16.gmra.mxu1 %vm3584_vm0, %v4888_v5 }
 0x234   : > { %v1935_v6 = vpop.permute.xlu1 %1934 }
 0x235   : > { %2006 = vst.msk [vmem:[#allocation2 + $0x64] sm:$0xf] %vm1980_vm11, %v1935_v6  ;;  %v1933_v7 = vpop.permute.xlu0 %1932 }
 0x236   : > { %2005 = vst.msk [vmem:[#allocation2 + $0x60] sm:$0xf] %vm1980_vm11, %v1933_v7 }
 0x238   : > { %v1939_v8 = vpop.permute.xlu1 %1938 }
 0x239   : > { %2008 = vst.msk [vmem:[#allocation2 + $0x6c] sm:$0xf] %vm1980_vm11, %v1939_v8  ;;  %v1937_v9 = vpop.permute.xlu0 %1936 }
 0x23a   : > { %2007 = vst.msk [vmem:[#allocation2 + $0x68] sm:$0xf] %vm1980_vm11, %v1937_v9 }
 0x23c   : > { %v2272_v10 = vpop.permute.xlu1 %2271 }
 0x23d   : > { %2343 = vst.msk [vmem:[#allocation2 + $0x64] sm:$0xf] %vm2317_vm12, %v2272_v10  ;;  %v2270_v11 = vpop.permute.xlu0 %2269 }
 0x23e   : > { %2342 = vst.msk [vmem:[#allocation2 + $0x60] sm:$0xf] %vm2317_vm12, %v2270_v11 }
 0x240   : > { %v2276_v12 = vpop.permute.xlu1 %2275 }
 0x241   : > { %2345 = vst.msk [vmem:[#allocation2 + $0x6c] sm:$0xf] %vm2317_vm12, %v2276_v12  ;;  %v2274_v13 = vpop.permute.xlu0 %2273 }
 0x242   : > { %2344 = vst.msk [vmem:[#allocation2 + $0x68] sm:$0xf] %vm2317_vm12, %v2274_v13 }
 0x244   : > { %v2469_v14 = vpop.permute.xlu1 %2468 }
 0x245   : > { %2540 = vst.msk [vmem:[#allocation2 + $0x64] sm:$0xf] %vm2514_vm13, %v2469_v14  ;;  %v2467_v15 = vpop.permute.xlu0 %2466 }
 0x246   : > { %2539 = vst.msk [vmem:[#allocation2 + $0x60] sm:$0xf] %vm2514_vm13, %v2467_v15  ;;  %v4800_v16 = vpop.f32.mrf.mxu0 }
 0x247   : > { %v4011_v27 = vmul.f32 %v4800_v16, %v4800_v16 }
 0x248   : > { %v2473_v17 = vpop.permute.xlu1 %2472  ;;  %v3687_v19 = vpop.f32.mrf.mxu0 }
 0x249   : > { %2542 = vst.msk [vmem:[#allocation2 + $0x6c] sm:$0xf] %vm2514_vm13, %v2473_v17  ;;  %v2471_v18 = vpop.permute.xlu0 %2470  ;;  %v3968_v20 = vadd.f32 %v3967_v61, %v3687_v19  ;;  %v4009_v21 = vmul.f32 %v3687_v19, %v3687_v19 }
 0x24a   : > { %2541 = vst.msk [vmem:[#allocation2 + $0x68] sm:$0xf] %vm2514_vm13, %v2471_v18  ;;  %v4801_v22 = vpop.f32.mrf.mxu0 }
 0x24b   : > { %v4040_v23 = vadd.f32 %v4039_v0, %v4009_v21  ;;  %v4686_v24 = vpack.c.bf16 %v4801_v22, %v4800_v16  ;;  %v4012_v36 = vmul.f32 %v4801_v22, %v4801_v22 }
 0x24c   : > { %v3030_v25 = vpop.permute.xlu1 %3029  ;;  %v3690_v28 = vpop.f32.mrf.mxu0 }
 0x24d   : > { %3101 = vst.msk [vmem:[#allocation2 + $0x64] sm:$0xf] %vm3075_vm14, %v3030_v25  ;;  %v3028_v26 = vpop.permute.xlu0 %3027  ;;  %4750 = vst [vmem:[%s6308_s22 + $0x18] sm:$0xff] %v4686_v24   ;;  %v4681_v29 = vpack.c.bf16 %v3690_v28, %v3687_v19  ;;  %v3969_v30 = vadd.f32 %v3968_v20, %v3690_v28  ;;  %v4010_v31 = vmul.f32 %v3690_v28, %v3690_v28 }
 0x24e   : > { %3100 = vst.msk [vmem:[#allocation2 + $0x60] sm:$0xf] %vm3075_vm14, %v3028_v26 }
 0x24f   : > { %4749 = vst [vmem:[%s6308_s22 + $0x10] sm:$0xff] %v4681_v29   ;;  %v3970_v32 = vadd.f32 %v4800_v16, %v3969_v30  ;;  %v4041_v33 = vadd.f32 %v4040_v23, %v4010_v31 }
 0x250   : > { %v3034_v34 = vpop.permute.xlu1 %3033 }
 0x251   : > { %3103 = vst.msk [vmem:[#allocation2 + $0x6c] sm:$0xf] %vm3075_vm14, %v3034_v34  ;;  %v3032_v35 = vpop.permute.xlu0 %3031  ;;  %v4042_v37 = vadd.f32 %v4041_v33, %v4011_v27  ;;  %v3971_v38 = vadd.f32 %v4801_v22, %v3970_v32 }
 0x252   : > { %3102 = vst.msk [vmem:[#allocation2 + $0x68] sm:$0xf] %vm3075_vm14, %v3032_v35 }
 0x253   : > { %v4043_v40 = vadd.f32 %v4042_v37, %v4012_v36 }
 0x254   : > { %v3367_v39 = vpop.permute.xlu1 %3366 }
 0x255   : > { %3438 = vst.msk [vmem:[#allocation2 + $0x64] sm:$0xf] %vm3412_vm15, %v3367_v39  ;;  %v3365_v62 = vpop.permute.xlu0 %3364 }
 0x256   : > { %3437 = vst.msk [vmem:[#allocation2 + $0x60] sm:$0xf] %vm3412_vm15, %v3365_v62 }
 0x258   : > { %v3371_v41 = vpop.permute.xlu1 %3370 }
 0x259   : > { %3440 = vst.msk [vmem:[#allocation2 + $0x6c] sm:$0xf] %vm3412_vm15, %v3371_v41  ;;  %v3369_v42 = vpop.permute.xlu0 %3368 }
 0x25a   : > { %3439 = vst.msk [vmem:[#allocation2 + $0x68] sm:$0xf] %vm3412_vm15, %v3369_v42 }
 0x25c   : > { %v1382_v43 = vpop.permute.xlu1 %1381 }
 0x25d   : > { %1449 = vst.msk [vmem:[#allocation2 + $0x74] sm:$0xf] %vm1419_vm10, %v1382_v43  ;;  %v1380_v44 = vpop.permute.xlu0 %1379  ;;  %v4889_v45 = vld [vmem:[#allocation2 + $0x60] sm:$0xff]  }
 0x25e   : > { %1448 = vst.msk [vmem:[#allocation2 + $0x70] sm:$0xf] %vm1419_vm10, %v1380_v44  ;;  %4818 = vmatprep.mubr.msk.bf16.mxu1 %vm3584_vm0, %v4889_v45 }
 0x260   : > { %v1386_v46 = vpop.permute.xlu1 %1385 }
 0x261   : > { %1451 = vst.msk [vmem:[#allocation2 + $0x7c] sm:$0xf] %vm1419_vm10, %v1386_v46  ;;  %v1384_v47 = vpop.permute.xlu0 %1383  ;;  %v4890_v48 = vld [vmem:[#allocation2 + $0x68] sm:$0xff]  }
 0x262   : > { %1450 = vst.msk [vmem:[#allocation2 + $0x78] sm:$0xf] %vm1419_vm10, %v1384_v47  ;;  %4819 = vmatmul.mubr.msk.bf16.gmra.mxu1 %vm3584_vm0, %v4890_v48 }
 0x264   : > { %v1943_v49 = vpop.permute.xlu1 %1942 }
 0x265   : > { %2010 = vst.msk [vmem:[#allocation2 + $0x74] sm:$0xf] %vm1980_vm11, %v1943_v49  ;;  %v1941_v50 = vpop.permute.xlu0 %1940 }
 0x266   : > { %2009 = vst.msk [vmem:[#allocation2 + $0x70] sm:$0xf] %vm1980_vm11, %v1941_v50 }
 0x268   : > { %v1947_v51 = vpop.permute.xlu1 %1946 }
 0x269   : > { %2012 = vst.msk [vmem:[#allocation2 + $0x7c] sm:$0xf] %vm1980_vm11, %v1947_v51  ;;  %v1945_v52 = vpop.permute.xlu0 %1944 }
 0x26a   : > { %2011 = vst.msk [vmem:[#allocation2 + $0x78] sm:$0xf] %vm1980_vm11, %v1945_v52 }
 0x26c   : > { %v2280_v53 = vpop.permute.xlu1 %2279 }
 0x26d   : > { %2347 = vst.msk [vmem:[#allocation2 + $0x74] sm:$0xf] %vm2317_vm12, %v2280_v53  ;;  %v2278_v54 = vpop.permute.xlu0 %2277 }
 0x26e   : > { %2346 = vst.msk [vmem:[#allocation2 + $0x70] sm:$0xf] %vm2317_vm12, %v2278_v54  ;;  %v4804_v55 = vpop.f32.mrf.mxu0 }
 0x26f   : > { %v4015_v7 = vmul.f32 %v4804_v55, %v4804_v55 }
 0x270   : > { %v2284_v56 = vpop.permute.xlu1 %2283  ;;  %v3703_v58 = vpop.f32.mrf.mxu0 }
 0x271   : > { %2349 = vst.msk [vmem:[#allocation2 + $0x7c] sm:$0xf] %vm2317_vm12, %v2284_v56  ;;  %v2282_v57 = vpop.permute.xlu0 %2281  ;;  %v3972_v59 = vadd.f32 %v3971_v38, %v3703_v58  ;;  %v4013_v60 = vmul.f32 %v3703_v58, %v3703_v58 }
 0x272   : > { %2348 = vst.msk [vmem:[#allocation2 + $0x78] sm:$0xf] %vm2317_vm12, %v2282_v57  ;;  %v4805_v61 = vpop.f32.mrf.mxu0 }
 0x273   : > { %v4044_v63 = vadd.f32 %v4043_v40, %v4013_v60  ;;  %v4696_v0 = vpack.c.bf16 %v4805_v61, %v4804_v55  ;;  %v4016_v12 = vmul.f32 %v4805_v61, %v4805_v61 }
 0x274   : > { %v2477_v1 = vpop.permute.xlu1 %2476  ;;  %v3706_v3 = vpop.f32.mrf.mxu0 }
 0x275   : > { %2544 = vst.msk [vmem:[#allocation2 + $0x74] sm:$0xf] %vm2514_vm13, %v2477_v1  ;;  %v2475_v2 = vpop.permute.xlu0 %2474  ;;  %4752 = vst [vmem:[%s6308_s22 + $0x28] sm:$0xff] %v4696_v0   ;;  %v4691_v4 = vpack.c.bf16 %v3706_v3, %v3703_v58  ;;  %v3973_v5 = vadd.f32 %v3972_v59, %v3706_v3  ;;  %v4014_v6 = vmul.f32 %v3706_v3, %v3706_v3 }
 0x276   : > { %2543 = vst.msk [vmem:[#allocation2 + $0x70] sm:$0xf] %vm2514_vm13, %v2475_v2 }
 0x277   : > { %4751 = vst [vmem:[%s6308_s22 + $0x20] sm:$0xff] %v4691_v4   ;;  %v3974_v8 = vadd.f32 %v4804_v55, %v3973_v5  ;;  %v4045_v9 = vadd.f32 %v4044_v63, %v4014_v6 }
 0x278   : > { %v2481_v10 = vpop.permute.xlu1 %2480 }
 0x279   : > { %2546 = vst.msk [vmem:[#allocation2 + $0x7c] sm:$0xf] %vm2514_vm13, %v2481_v10  ;;  %v2479_v11 = vpop.permute.xlu0 %2478  ;;  %v4046_v13 = vadd.f32 %v4045_v9, %v4015_v7  ;;  %v3975_v14 = vadd.f32 %v4805_v61, %v3974_v8  ;;  %v4925_v61 = vmov 0.0  }
 0x27a   : > { %2545 = vst.msk [vmem:[#allocation2 + $0x78] sm:$0xf] %vm2514_vm13, %v2479_v11  ;;  %3962 = vst [vmem:[%s6382_s25] sm:$0x1] %v4925_v61 }
 0x27b   : > { %v4047_v16 = vadd.f32 %v4046_v13, %v4016_v12  ;;  %3963 = vst [vmem:[%s6388_s28] sm:$0x1] %v4925_v61 }
 0x27c   : > { %v3038_v15 = vpop.permute.xlu1 %3037 }
 0x27d   : > { %3105 = vst.msk [vmem:[#allocation2 + $0x74] sm:$0xf] %vm3075_vm14, %v3038_v15  ;;  %v3036_v17 = vpop.permute.xlu0 %3035 }
 0x27e   : > { %3104 = vst.msk [vmem:[#allocation2 + $0x70] sm:$0xf] %vm3075_vm14, %v3036_v17 }
 0x280   : > { %v3042_v18 = vpop.permute.xlu1 %3041 }
 0x281   : > { %3107 = vst.msk [vmem:[#allocation2 + $0x7c] sm:$0xf] %vm3075_vm14, %v3042_v18  ;;  %v3040_v19 = vpop.permute.xlu0 %3039  ;;  %v3964_v61 = vld [vmem:[%s6382_s25] sm:$0x1] }
 0x282   : > { %3106 = vst.msk [vmem:[#allocation2 + $0x78] sm:$0xf] %vm3075_vm14, %v3040_v19 }
 0x284   : > { %v3375_v20 = vpop.permute.xlu1 %3374 }
 0x285   : > { %3442 = vst.msk [vmem:[#allocation2 + $0x74] sm:$0xf] %vm3412_vm15, %v3375_v20  ;;  %v3373_v21 = vpop.permute.xlu0 %3372 }
 0x286   : > { %3441 = vst.msk [vmem:[#allocation2 + $0x70] sm:$0xf] %vm3412_vm15, %v3373_v21 }
 0x288   : > { %v3379_v22 = vpop.permute.xlu1 %3378 }
 0x289   : > { %3444 = vst.msk [vmem:[#allocation2 + $0x7c] sm:$0xf] %vm3412_vm15, %v3379_v22  ;;  %v3377_v23 = vpop.permute.xlu0 %3376 }
 0x28a   : > { %3443 = vst.msk [vmem:[#allocation2 + $0x78] sm:$0xf] %vm3412_vm15, %v3377_v23 }
 0x28d   : > { %v4891_v24 = vld [vmem:[#allocation2 + $0x70] sm:$0xff]  }
 0x28e   : > { %4822 = vmatprep.mubr.msk.bf16.mxu1 %vm3584_vm0, %v4891_v24 }
 0x291   : > { %v4892_v25 = vld [vmem:[#allocation2 + $0x78] sm:$0xff]  }
 0x292   : > { %4823 = vmatmul.mubr.msk.bf16.gmra.mxu1 %vm3584_vm0, %v4892_v25 }
 0x296   : > { %v4808_v26 = vpop.f32.mrf.mxu0 }
 0x297   : > { %v4019_v37 = vmul.f32 %v4808_v26, %v4808_v26 }
 0x298   : > { %v3719_v28 = vpop.f32.mrf.mxu0 }
 0x299   : > { %v3976_v29 = vadd.f32 %v3975_v14, %v3719_v28  ;;  %v4017_v30 = vmul.f32 %v3719_v28, %v3719_v28 }
 0x29a   : > { %v4809_v31 = vpop.f32.mrf.mxu0 }
 0x29b   : > { %v4048_v27 = vadd.f32 %v4047_v16, %v4017_v30  ;;  %v4706_v32 = vpack.c.bf16 %v4809_v31, %v4808_v26  ;;  %v4020_v40 = vmul.f32 %v4809_v31, %v4809_v31 }
 0x29c   : > { %v3722_v33 = vpop.f32.mrf.mxu0 }
 0x29d   : > { %4754 = vst [vmem:[%s6308_s22 + $0x38] sm:$0xff] %v4706_v32   ;;  %v4701_v34 = vpack.c.bf16 %v3722_v33, %v3719_v28  ;;  %v3977_v35 = vadd.f32 %v3976_v29, %v3722_v33  ;;  %v4018_v36 = vmul.f32 %v3722_v33, %v3722_v33 }
 0x29f   : > { %4753 = vst [vmem:[%s6308_s22 + $0x30] sm:$0xff] %v4701_v34   ;;  %v3978_v38 = vadd.f32 %v4808_v26, %v3977_v35  ;;  %v4049_v39 = vadd.f32 %v4048_v27, %v4018_v36 }
 0x2a1   : > { %v4050_v62 = vadd.f32 %v4049_v39, %v4019_v37  ;;  %v3979_v41 = vadd.f32 %v4809_v31, %v3978_v38 }
 0x2a3   : > { %v4051_v42 = vadd.f32 %v4050_v62, %v4020_v40 }
 0x2c2   : > { %v4812_v43 = vpop.f32.mrf.mxu1 }
 0x2c3   : > { %v4023_v54 = vmul.f32 %v4812_v43, %v4812_v43 }
 0x2c4   : > { %v3735_v44 = vpop.f32.mrf.mxu1 }
 0x2c5   : > { %v3980_v45 = vadd.f32 %v3979_v41, %v3735_v44  ;;  %v4021_v46 = vmul.f32 %v3735_v44, %v3735_v44 }
 0x2c6   : > { %v4813_v47 = vpop.f32.mrf.mxu1 }
 0x2c7   : > { %v4052_v48 = vadd.f32 %v4051_v42, %v4021_v46  ;;  %v4716_v49 = vpack.c.bf16 %v4813_v47, %v4812_v43  ;;  %v4024_v57 = vmul.f32 %v4813_v47, %v4813_v47 }
 0x2c8   : > { %v3738_v50 = vpop.f32.mrf.mxu1 }
 0x2c9   : > { %4756 = vst [vmem:[%s6308_s22 + $0x48] sm:$0xff] %v4716_v49   ;;  %v4711_v51 = vpack.c.bf16 %v3738_v50, %v3735_v44  ;;  %v3981_v52 = vadd.f32 %v3980_v45, %v3738_v50  ;;  %v4022_v53 = vmul.f32 %v3738_v50, %v3738_v50 }
 0x2cb   : > { %4755 = vst [vmem:[%s6308_s22 + $0x40] sm:$0xff] %v4711_v51   ;;  %v3982_v55 = vadd.f32 %v4812_v43, %v3981_v52  ;;  %v4053_v56 = vadd.f32 %v4052_v48, %v4022_v53 }
 0x2cd   : > { %v4054_v58 = vadd.f32 %v4053_v56, %v4023_v54  ;;  %v3983_v59 = vadd.f32 %v4813_v47, %v3982_v55 }
 0x2cf   : > { %v4055_v60 = vadd.f32 %v4054_v58, %v4024_v57 }
 0x2f2   : > { %v4816_v63 = vpop.f32.mrf.mxu1 }
 0x2f3   : > { %v4027_v10 = vmul.f32 %v4816_v63, %v4816_v63 }
 0x2f4   : > { %v3751_v0 = vpop.f32.mrf.mxu1 }
 0x2f5   : > { %v3984_v1 = vadd.f32 %v3983_v59, %v3751_v0  ;;  %v4025_v2 = vmul.f32 %v3751_v0, %v3751_v0 }
 0x2f6   : > { %v4817_v3 = vpop.f32.mrf.mxu1 }
 0x2f7   : > { %v4056_v4 = vadd.f32 %v4055_v60, %v4025_v2  ;;  %v4726_v5 = vpack.c.bf16 %v4817_v3, %v4816_v63  ;;  %v4028_v13 = vmul.f32 %v4817_v3, %v4817_v3 }
 0x2f8   : > { %v3754_v6 = vpop.f32.mrf.mxu1 }
 0x2f9   : > { %4758 = vst [vmem:[%s6308_s22 + $0x58] sm:$0xff] %v4726_v5   ;;  %v4721_v7 = vpack.c.bf16 %v3754_v6, %v3751_v0  ;;  %v3985_v8 = vadd.f32 %v3984_v1, %v3754_v6  ;;  %v4026_v9 = vmul.f32 %v3754_v6, %v3754_v6  ;;  %v4004_v1 = vld [vmem:[%s6388_s28] sm:$0x1] }
 0x2fb   : > { %4757 = vst [vmem:[%s6308_s22 + $0x50] sm:$0xff] %v4721_v7   ;;  %v3986_v11 = vadd.f32 %v4816_v63, %v3985_v8  ;;  %v4057_v12 = vadd.f32 %v4056_v4, %v4026_v9 }
 0x2fd   : > { %v4058_v14 = vadd.f32 %v4057_v12, %v4027_v10  ;;  %v3987_v15 = vadd.f32 %v4817_v3, %v3986_v11 }
 0x2ff   : > { %v4059_v16 = vadd.f32 %v4058_v14, %v4028_v13 }
 0x322   : > { %v4820_v17 = vpop.f32.mrf.mxu1 }
 0x323   : > { %v4031_v30 = vmul.f32 %v4820_v17, %v4820_v17 }
 0x324   : > { %v3767_v18 = vpop.f32.mrf.mxu1 }
 0x325   : > { %v4029_v23 = vmul.f32 %v3767_v18, %v3767_v18  ;;  %v3988_v24 = vadd.f32 %v3987_v15, %v3767_v18 }
 0x326   : > { %v4821_v19 = vpop.f32.mrf.mxu1 }
 0x327   : > { %v4736_v20 = vpack.c.bf16 %v4821_v19, %v4820_v17  ;;  %v4060_v26 = vadd.f32 %v4059_v16, %v4029_v23  ;;  %v4032_v34 = vmul.f32 %v4821_v19, %v4821_v19 }
 0x328   : > { %v3770_v21 = vpop.f32.mrf.mxu1 }
 0x329   : > { %4760 = vst [vmem:[%s6308_s22 + $0x68] sm:$0xff] %v4736_v20   ;;  %v4731_v22 = vpack.c.bf16 %v3770_v21, %v3767_v18  ;;  %v4030_v25 = vmul.f32 %v3770_v21, %v3770_v21  ;;  %v3989_v28 = vadd.f32 %v3988_v24, %v3770_v21 }
 0x32b   : > { %4759 = vst [vmem:[%s6308_s22 + $0x60] sm:$0xff] %v4731_v22   ;;  %v4061_v29 = vadd.f32 %v4060_v26, %v4030_v25  ;;  %v3990_v31 = vadd.f32 %v4820_v17, %v3989_v28 }
 0x32d   : > { %v4062_v32 = vadd.f32 %v4061_v29, %v4031_v30  ;;  %v3991_v35 = vadd.f32 %v4821_v19, %v3990_v31 }
 0x32f   : > { %v4063_v39 = vadd.f32 %v4062_v32, %v4032_v34 }
 0x352   : > { %v4824_v27 = vpop.f32.mrf.mxu1 }
 0x353   : > { %v4035_v45 = vmul.f32 %v4824_v27, %v4824_v27 }
 0x354   : > { %v3783_v33 = vpop.f32.mrf.mxu1 }
 0x355   : > { %v4033_v36 = vmul.f32 %v3783_v33, %v3783_v33  ;;  %v3992_v38 = vadd.f32 %v3991_v35, %v3783_v33 }
 0x356   : > { %v4825_v37 = vpop.f32.mrf.mxu1 }
 0x357   : > { %v4746_v40 = vpack.c.bf16 %v4825_v37, %v4824_v27  ;;  %v4064_v41 = vadd.f32 %v4063_v39, %v4033_v36  ;;  %v4036_v48 = vmul.f32 %v4825_v37, %v4825_v37 }
 0x358   : > { %v3786_v62 = vpop.f32.mrf.mxu1 }
 0x359   : > { %4762 = vst [vmem:[%s6308_s22 + $0x78] sm:$0xff] %v4746_v40   ;;  %v4741_v42 = vpack.c.bf16 %v3786_v62, %v3783_v33  ;;  %v3993_v43 = vadd.f32 %v3992_v38, %v3786_v62  ;;  %v4034_v44 = vmul.f32 %v3786_v62, %v3786_v62 }
 0x35b   : > { %4761 = vst [vmem:[%s6308_s22 + $0x70] sm:$0xff] %v4741_v42   ;;  %v3994_v46 = vadd.f32 %v4824_v27, %v3993_v43  ;;  %v4065_v47 = vadd.f32 %v4064_v41, %v4034_v44 }
 0x35d   : > { %v3995_v49 = vadd.f32 %v4825_v37, %v3994_v46  ;;  %v4066_v50 = vadd.f32 %v4065_v47, %v4035_v45 }
 0x35f   : > { %v3996_v51 = vrot.slane %v3995_v49, 4  ;;  %v4067_v52 = vadd.f32 %v4066_v50, %v4036_v48 }
 0x361   : > { %v3997_v53 = vadd.f32 %v3996_v51, %v3995_v49  ;;  %v4068_v54 = vrot.slane %v4067_v52, 4 }
 0x363   : > { %v3998_v55 = vrot.slane %v3997_v53, 2  ;;  %v4069_v56 = vadd.f32 %v4068_v54, %v4067_v52 }
 0x365   : > { %v3999_v57 = vadd.f32 %v3998_v55, %v3997_v53  ;;  %v4070_v58 = vrot.slane %v4069_v56, 2 }
 0x367   : > { %v4000_v59 = vrot.slane %v3999_v57, 1  ;;  %v4071_v60 = vadd.f32 %v4070_v58, %v4069_v56 }
 0x369   : > { %v4001_v63 = vadd.f32 %v4000_v59, %v3999_v57  ;;  %v4072_v0 = vrot.slane %v4071_v60, 1 }
 0x36b   : > { %v4002_v2 = vadd.f32 %v4001_v63, %v3964_v61  ;;  %v4073_v3 = vadd.f32 %v4072_v0, %v4071_v60 }
 0x36d   : > { %4003 = vst [vmem:[%s6382_s25] sm:$0x1] %v4002_v2  ;;  %v4074_v4 = vadd.f32 %v4073_v3, %v4004_v1 }
 0x36f   : > { %4075 = vst [vmem:[%s6388_s28] sm:$0x1] %v4074_v4 }
 0x370 PF: > { %s15_s17 = sadd.s32 1, %s4915_s17   ;;  %s6420_s15 = smov %s4911_s16 }
 0x371   : > { %p12_p5 = scmp.ge.s32.totalorder %s15_s17, 4   ;;  %s6421_s16 = smov %s6423_s18 }
 0x373   :  { %14 = sbr.rel (!%p12_p5) target bundleno = 2 (0x2), region = 90 }

</bundles_post_ra>
